<compile_context>
chip_gen: v7x
topology: tpu7x:2x2x1
jax: 0.10.0
libtpu: 0.0.40
codegen_flags: <defaults>
</compile_context>

<pallas_src>
import functools

import jax
import jax.numpy as jnp
from jax import lax
from jax.experimental import pallas as pl
from jax.experimental.pallas import tpu as pltpu


# ----------------------------- tiling / hardware helpers ----------------------------


@functools.lru_cache(maxsize=1)
def _matmul_config():
    """Per-generation matmul tile sizes + scoped-VMEM limit (None = compiler default)."""
    try:
        kind = jax.devices()[0].device_kind.lower()
    except Exception:
        kind = ""
    if "v7" in kind or "7x" in kind:
        # v7x: 64 MiB VMEM per TC. With bf16 operands, 512x512 blocks give ~4 MiB of
        # double-buffered inputs + 2 MiB f32 accumulators -> well under the 48 MiB limit.
        return (512, 512, 512), 48 * 1024 * 1024
    if "v5" in kind or "v6" in kind:
        # v5e / v6e: 128 MiB VMEM; tn/tk multiples of 128 suit the 128-wide MXU paths.
        return (512, 512, 512), 96 * 1024 * 1024
    return (256, 256, 256), None


def _pick_tile(dim, pref, align):
    """Largest tile <= pref that divides dim and is aligned; full dim if dim <= pref."""
    if dim <= pref:
        return dim
    t = (pref // align) * align
    while t >= align:
        if dim % t == 0:
            return t
        t -= align
    return dim  # fallback: single block along this dim


# ----------------------------- Pallas kernels ---------------------------------------


def _cmatmul_kernel(ar_ref, ai_ref, br_ref, bi_ref, biasr_ref, biasi_ref,
                    cr_ref, ci_ref, accr_ref, acci_ref, *, apply_gelu):
    """Tiled complex matmul, Karatsuba (3 MXU matmuls / step), fused bias (+GELU) epilogue.

    Operands arrive already in bf16 (wrapper cast); accumulation in f32 VMEM scratch.
    """
    k = pl.program_id(2)

    @pl.when(k == 0)
    def _init():
        accr_ref[...] = jnp.zeros_like(accr_ref)
        acci_ref[...] = jnp.zeros_like(acci_ref)

    ar = ar_ref[...]          # bf16
    ai = ai_ref[...]
    br = br_ref[...]
    bi = bi_ref[...]
    asum = ar + ai            # bf16 VPU adds (hide under the MXU)
    bsum = br + bi

    t1 = jnp.dot(ar, br, preferred_element_type=jnp.float32)
    t2 = jnp.dot(ai, bi, preferred_element_type=jnp.float32)
    t3 = jnp.dot(asum, bsum, preferred_element_type=jnp.float32)
    accr_ref[...] += t1 - t2            # real part
    acci_ref[...] += t3 - t1 - t2       # imag part (Karatsuba)

    @pl.when(k == pl.num_programs(2) - 1)
    def _store():
        yr = accr_ref[...] + biasr_ref[...]
        yi = acci_ref[...] + biasi_ref[...]
        if apply_gelu:
            yr = jax.nn.gelu(yr)
            yi = jax.nn.gelu(yi)
        cr_ref[...] = yr.astype(cr_ref.dtype)
        ci_ref[...] = yi.astype(ci_ref.dtype)


def cmatmul(ar, ai, br, bi, biasr, biasi, apply_gelu=False, out_dtype=jnp.float32):
    """Complex (M,K)@(K,N) + bias [+ GELU], re/im split, tiled with f32 VMEM accumulators."""
    M, K = ar.shape
    _, N = br.shape
    (tm_pref, tn_pref, tk_pref), vmem_limit = _matmul_config()
    tm = _pick_tile(M, tm_pref, 16)    # 16: bf16 sublane packing
    tn = _pick_tile(N, tn_pref, 128)
    tk = _pick_tile(K, tk_pref, 128)

    # Cast operands to bf16 once in the wrapper: halves streamed HBM bytes / VMEM per block
    # and removes all per-K-step in-kernel casts. Bias stays f32 (added in the epilogue).
    ar = ar.astype(jnp.bfloat16)
    ai = ai.astype(jnp.bfloat16)
    br = br.astype(jnp.bfloat16)
    bi = bi.astype(jnp.bfloat16)
    biasr = biasr.astype(jnp.float32).reshape(1, N)
    biasi = biasi.astype(jnp.float32).reshape(1, N)

    a_spec = pl.BlockSpec((tm, tk), lambda i, j, k: (i, k))
    b_spec = pl.BlockSpec((tk, tn), lambda i, j, k: (k, j))
    bias_spec = pl.BlockSpec((1, tn), lambda i, j, k: (0, j))
    o_spec = pl.BlockSpec((tm, tn), lambda i, j, k: (i, j))
    out_shape = (
        jax.ShapeDtypeStruct((M, N), out_dtype),
        jax.ShapeDtypeStruct((M, N), out_dtype),
    )
    return pl.pallas_call(
        functools.partial(_cmatmul_kernel, apply_gelu=apply_gelu),
        out_shape=out_shape,
        grid=(M // tm, N // tn, K // tk),
        in_specs=[a_spec, a_spec, b_spec, b_spec, bias_spec, bias_spec],
        out_specs=(o_spec, o_spec),
        scratch_shapes=[
            pltpu.VMEM((tm, tn), jnp.float32),
            pltpu.VMEM((tm, tn), jnp.float32),
        ],
        compiler_params=pltpu.CompilerParams(
            dimension_semantics=("parallel", "parallel", "arbitrary"),
            vmem_limit_bytes=vmem_limit,
        ),
    )(ar, ai, br, bi, biasr, biasi)


def _cattn_kernel(q_ref, k_ref, v_ref, o_ref):
    """One (batch, head) step.  q/k/v are (N, 2*dh) bf16 with re/im concatenated along dh
    and the 1/sqrt(dh) scale pre-folded into q.

    scores = q_cat @ k_cat^T  (== Re(q conj(k)^T) * scale, one MXU matmul)
    out    = softmax(scores) @ v_cat  (real|imag halves in one lane-dense matmul)
    """
    q = q_ref[...]
    k = k_ref[...]
    s = lax.dot_general(q, k, dimension_numbers=(((1,), (1,)), ((), ())),
                        preferred_element_type=jnp.float32)       # (N, N)
    s = s - jnp.max(s, axis=-1, keepdims=True)
    p = jnp.exp(s)
    p = p * pl.reciprocal(jnp.sum(p, axis=-1, keepdims=True), approx=True)
    o_ref[...] = jnp.dot(p.astype(jnp.bfloat16), v_ref[...],
                         preferred_element_type=jnp.float32).astype(o_ref.dtype)


def cattention(qr, qi, kr, ki, vr, vi, num_heads):
    """q/k/v: (B, N, D) complex (split) -> attention output (B, N, D) complex (split)."""
    B, N, D = qr.shape
    dh = D // num_heads
    scale = 1.0 / (dh ** 0.5)

    def pack(re, im, s=None):
        # (B, N, D) x2 -> (B, nh, N, 2*dh) bf16, re/im concatenated along the head dim.
        re = re.reshape(B, N, num_heads, dh)
        im = im.reshape(B, N, num_heads, dh)
        cat = jnp.concatenate([re, im], axis=-1).transpose(0, 2, 1, 3)
        if s is not None:
            cat = cat * s
        return cat.astype(jnp.bfloat16)

    q = pack(qr, qi, scale)
    k = pack(kr, ki)
    v = pack(vr, vi)

    # TODO(synk): for production dh (>=64) the head slicing could instead be expressed via
    #             the BlockSpec index_map on the D axis to drop the wrapper transposes.
    spec = pl.BlockSpec((None, None, N, 2 * dh), lambda b, h: (b, h, 0, 0))
    out = pl.pallas_call(
        _cattn_kernel,
        out_shape=jax.ShapeDtypeStruct((B, num_heads, N, 2 * dh), jnp.bfloat16),
        grid=(B, num_heads),
        in_specs=[spec, spec, spec],
        out_specs=spec,
        compiler_params=pltpu.CompilerParams(
            dimension_semantics=("parallel", "parallel")),
    )(q, k, v)

    out = out.transpose(0, 2, 1, 3)                 # (B, N, nh, 2*dh)
    o_r = out[..., :dh].reshape(B, N, D)
    o_i = out[..., dh:].reshape(B, N, D)
    return o_r, o_i


def _head_kernel(fr_ref, fi_ref, wr_ref, wi_ref, biasr_ref, biasi_ref, out_ref,
                 sr_acc, si_acc, *, inv_n):
    """mean over patches (grid-reduced over the sequence axis) -> complex Linear -> Mod()."""
    n = pl.program_id(1)

    @pl.when(n == 0)
    def _init():
        sr_acc[...] = jnp.zeros_like(sr_acc)
        si_acc[...] = jnp.zeros_like(si_acc)

    sr_acc[...] += jnp.sum(fr_ref[...].astype(jnp.float32), axis=1)   # (tb, D)
    si_acc[...] += jnp.sum(fi_ref[...].astype(jnp.float32), axis=1)

    @pl.when(n == pl.num_programs(1) - 1)
    def _finish():
        mr = sr_acc[...] * inv_n
        mi = si_acc[...] * inv_n
        mrb = mr.astype(jnp.bfloat16)
        mib = mi.astype(jnp.bfloat16)
        msb = (mr + mi).astype(jnp.bfloat16)
        wr = wr_ref[...]              # bf16
        wi = wi_ref[...]
        t1 = jnp.dot(mrb, wr, preferred_element_type=jnp.float32)
        t2 = jnp.dot(mib, wi, preferred_element_type=jnp.float32)
        t3 = jnp.dot(msb, wr + wi, preferred_element_type=jnp.float32)
        yr = t1 - t2 + biasr_ref[...]
        yi = t3 - t1 - t2 + biasi_ref[...]
        out_ref[...] = jnp.sqrt(yr * yr + yi * yi)


def head_mean_linear_mod(fr, fi, wr, wi, br, bi):
    B, N, D = fr.shape
    C = wr.shape[1]
    Cp = ((C + 127) // 128) * 128          # pad class dim -> lane-dense (unmasked) stores
    pad = Cp - C
    wr_p = jnp.pad(wr, ((0, 0), (0, pad))).astype(jnp.bfloat16)
    wi_p = jnp.pad(wi, ((0, 0), (0, pad))).astype(jnp.bfloat16)
    br_p = jnp.pad(br, (0, pad)).astype(jnp.float32).reshape(1, Cp)
    bi_p = jnp.pad(bi, (0, pad)).astype(jnp.float32).reshape(1, Cp)
    frb = fr.astype(jnp.bfloat16)
    fib = fi.astype(jnp.bfloat16)

    tb = B if B <= 8 else _pick_tile(B, 8, 8)
    tn = _pick_tile(N, 512, 8)             # tile the sequence axis -> bounded VMEM at large N
    f_spec = pl.BlockSpec((tb, tn, D), lambda b, n: (b, n, 0))
    w_spec = pl.BlockSpec((D, Cp), lambda b, n: (0, 0))
    bias_spec = pl.BlockSpec((1, Cp), lambda b, n: (0, 0))
    o_spec = pl.BlockSpec((tb, Cp), lambda b, n: (b, 0))

    out = pl.pallas_call(
        functools.partial(_head_kernel, inv_n=1.0 / N),
        out_shape=jax.ShapeDtypeStruct((B, Cp), jnp.float32),
        grid=(B // tb, N // tn),
        in_specs=[f_spec, f_spec, w_spec, w_spec, bias_spec, bias_spec],
        out_specs=o_spec,
        scratch_shapes=[
            pltpu.VMEM((tb, D), jnp.float32),
            pltpu.VMEM((tb, D), jnp.float32),
        ],
        compiler_params=pltpu.CompilerParams(
            dimension_semantics=("parallel", "arbitrary")),
    )(frb, fib, wr_p, wi_p, br_p, bi_p)
    return out[:, :C]


# ----------------------------- JAX glue ---------------------------------------------


def complex_layernorm(xr, xi, wr, wi, br, bi, axes, eps=1e-5):
    mr = jnp.mean(xr, axis=axes, keepdims=True)
    mi = jnp.mean(xi, axis=axes, keepdims=True)
    cr = xr - mr
    ci = xi - mi
    var = jnp.mean(cr * cr + ci * ci, axis=axes, keepdims=True)
    inv = lax.rsqrt(var + eps)
    nr = cr * inv
    ni = ci * inv
    yr = nr * wr - ni * wi + br
    yi = nr * wi + ni * wr + bi
    return yr, yi


def clinear(xr, xi, wr, wi, br, bi, apply_gelu=False, out_dtype=jnp.bfloat16):
    """Complex dense layer on trailing dim via the tiled Pallas matmul kernel."""
    lead = xr.shape[:-1]
    din = xr.shape[-1]
    dout = wr.shape[-1]
    yr, yi = cmatmul(xr.reshape(-1, din), xi.reshape(-1, din), wr, wi, br, bi,
                     apply_gelu=apply_gelu, out_dtype=out_dtype)
    return yr.reshape(*lead, dout), yi.reshape(*lead, dout)


def rope_embedding(H, W, hidden_dim):
    """2D RoPE table — real/imag split.  Matches the reference exactly:
    theta = 100 ** (+arange(0, d, 2) / (d/2)), emb = exp(1j*theta) ** pos."""
    pos_h = jnp.arange(H, dtype=jnp.float32)
    pos_w = jnp.arange(W, dtype=jnp.float32)
    theta = 100.0 ** (jnp.arange(0, hidden_dim, 2, dtype=jnp.float32) / (hidden_dim / 2.0))
    ang_h = theta[:, None] * pos_h[None, :]  # (hd/2, H)
    ang_w = theta[:, None] * pos_w[None, :]  # (hd/2, W)
    half = hidden_dim // 2
    emb_r = jnp.zeros((hidden_dim, H, W), jnp.float32)
    emb_i = jnp.zeros((hidden_dim, H, W), jnp.float32)
    emb_r = emb_r.at[0::2].set(jnp.broadcast_to(jnp.cos(ang_h)[:, :, None], (half, H, W)))
    emb_i = emb_i.at[0::2].set(jnp.broadcast_to(jnp.sin(ang_h)[:, :, None], (half, H, W)))
    emb_r = emb_r.at[1::2].set(jnp.broadcast_to(jnp.cos(ang_w)[:, None, :], (half, H, W)))
    emb_i = emb_i.at[1::2].set(jnp.broadcast_to(jnp.sin(ang_w)[:, None, :], (half, H, W)))
    return emb_r, emb_i


def encoder_layer(sr, si, lp, num_heads):
    # pre-norm multi-head complex attention + residual (QKV fused into one matmul)
    nr, ni = complex_layernorm(sr, si, *lp["ln1"], axes=(-1,))
    qkv_r, qkv_i = clinear(nr, ni, *lp["qkv"])                  # bf16 out
    qr, kr, vr = jnp.split(qkv_r, 3, axis=-1)
    qi, ki, vi = jnp.split(qkv_i, 3, axis=-1)

    oar, oai = cattention(qr, qi, kr, ki, vr, vi, num_heads)    # bf16 out
    ar, ai = clinear(oar, oai, *lp["o"])                        # bf16 out
    sr = sr + ar                                                # residual stays f32
    si = si + ai

    # pre-norm MLP (complex GELU per component, fused into fc1 epilogue) + residual
    nr, ni = complex_layernorm(sr, si, *lp["ln2"], axes=(-1,))
    hr, hi = clinear(nr, ni, *lp["fc1"], apply_gelu=True)       # bf16 out
    hr, hi = clinear(hr, hi, *lp["fc2"])                        # bf16 out
    sr = sr + hr
    si = si + hi
    return sr, si


def model_forward(params, xr, xi, cfg):
    B, C, H, W = xr.shape
    p = cfg["patch_size"]
    D = cfg["hidden_dim"]
    nh = cfg["num_heads"]
    nH, nW = H // p, W // p

    # --- PatchEmbedder ---
    # LayerNorm over [cin, H, W]
    xr, xi = complex_layernorm(xr, xi, *params["ln0"], axes=(1, 2, 3))

    # Conv2d(kernel=stride=patch) == patchify + complex matmul (Pallas kernel, fused bias)
    def patchify(x):
        x = x.reshape(B, C, nH, p, nW, p)
        x = x.transpose(0, 2, 4, 1, 3, 5)  # (B, nH, nW, C, p, p)
        return x.reshape(B * nH * nW, C * p * p)

    pr, pi = patchify(xr), patchify(xi)
    wr, wi, br_, bi_ = params["patch_proj"]
    er, ei = cmatmul(pr, pi, wr, wi, br_, bi_, out_dtype=jnp.float32)
    er = er.reshape(B, nH, nW, D).transpose(0, 3, 1, 2)  # (B, D, nH, nW)
    ei = ei.reshape(B, nH, nW, D).transpose(0, 3, 1, 2)

    # LayerNorm over [hidden, nH, nW]
    er, ei = complex_layernorm(er, ei, *params["ln_embed"], axes=(1, 2, 3))

    # + complex RoPE positional embedding
    per, pei = rope_embedding(nH, nW, D)
    er = er + per
    ei = ei + pei

    # --- ViT backbone ---
    # flatten(2).transpose(1,2): (B, D, nH, nW) -> (B, N, D)
    N = nH * nW
    sr = er.reshape(B, D, N).transpose(0, 2, 1)
    si = ei.reshape(B, D, N).transpose(0, 2, 1)

    for lp in params["layers"]:
        sr, si = encoder_layer(sr, si, lp, nh)

    sr, si = complex_layernorm(sr, si, *params["ln_final"], axes=(-1,))

    # --- head: mean over patches, complex Linear, modulus (single Pallas kernel) ---
    hwr, hwi, hbr, hbi = params["head"]
    return head_mean_linear_mod(sr, si, hwr, hwi, hbr, hbi)


# ----------------------------- deterministic parameter init -------------------------


def cdense_init(key, din, dout, scale=0.02):
    k1, k2 = jax.random.split(key)
    wr = scale * jax.random.normal(k1, (din, dout), jnp.float32)
    wi = scale * jax.random.normal(k2, (din, dout), jnp.float32)
    return wr, wi, jnp.zeros((dout,), jnp.float32), jnp.zeros((dout,), jnp.float32)


def ln_params(shape):
    return (
        jnp.ones(shape, jnp.float32),   # weight real
        jnp.zeros(shape, jnp.float32),  # weight imag
        jnp.zeros(shape, jnp.float32),  # bias real
        jnp.zeros(shape, jnp.float32),  # bias imag
    )


def init_params(key, cfg, num_classes=10):
    D = cfg["hidden_dim"]
    p = cfg["patch_size"]
    C = cfg["cin"]
    H = W = cfg["input_size"]
    nH, nW = H // p, W // p
    keys = iter(jax.random.split(key, 8 * cfg["num_layers"] + 8))

    params = {
        "ln0": ln_params((C, H, W)),
        "patch_proj": cdense_init(next(keys), C * p * p, D),
        "ln_embed": ln_params((D, nH, nW)),
        "layers": [],
        "ln_final": ln_params((D,)),
        "head": cdense_init(next(keys), D, num_classes),
    }
    for _ in range(cfg["num_layers"]):
        params["layers"].append(
            dict(
                ln1=ln_params((D,)),
                qkv=cdense_init(next(keys), D, 3 * D),   # fused Q/K/V projection
                o=cdense_init(next(keys), D, D),
                ln2=ln_params((D,)),
                fc1=cdense_init(next(keys), D, 4 * D),
                fc2=cdense_init(next(keys), 4 * D, D),
            )
        )
    return params


# ----------------------------- main --------------------------------------------------


if __name__ == "__main__":
    cfg = dict(input_size=16, patch_size=4, hidden_dim=32, num_layers=2, num_heads=4, cin=1)
    num_classes = 10
    B = 2

    key = jax.random.PRNGKey(0)
    k_x, k_p = jax.random.split(key)
    # complex64 input split into (real, imag) float32
    xr = jax.random.normal(jax.random.fold_in(k_x, 0), (B, cfg["cin"], 16, 16), jnp.float32)
    xi = jax.random.normal(jax.random.fold_in(k_x, 1), (B, cfg["cin"], 16, 16), jnp.float32)

    params = init_params(k_p, cfg, num_classes=num_classes)

    fwd = jax.jit(functools.partial(model_forward, cfg=cfg))
    out = fwd(params, xr, xi)
    out = jax.block_until_ready(out)

    assert out.shape == (B, num_classes), out.shape
    assert out.dtype == jnp.float32
    assert bool(jnp.all(jnp.isfinite(out))) and bool(jnp.all(out >= 0.0))  # Mod() output
    print("KERNEL_OK")
</pallas_src>

<mosaic_0001>
module attributes {stable_mosaic.version = 11 : i64} {
  func.func @_cmatmul_kernel(%arg0: i32, %arg1: i32, %arg2: i32, %arg3: memref<32x16xbf16, #tpu.memory_space<vmem>>, %arg4: memref<32x16xbf16, #tpu.memory_space<vmem>>, %arg5: memref<16x32xbf16, #tpu.memory_space<vmem>>, %arg6: memref<16x32xbf16, #tpu.memory_space<vmem>>, %arg7: memref<1x32xf32, #tpu.memory_space<vmem>>, %arg8: memref<1x32xf32, #tpu.memory_space<vmem>>, %arg9: memref<32x32xf32, #tpu.memory_space<vmem>>, %arg10: memref<32x32xf32, #tpu.memory_space<vmem>>, %arg11: memref<32x32xf32, #tpu.memory_space<vmem>>, %arg12: memref<32x32xf32, #tpu.memory_space<vmem>>) attributes {dimension_semantics = [#tpu.dimension_semantics<parallel>, #tpu.dimension_semantics<parallel>, #tpu.dimension_semantics<arbitrary>], iteration_bounds = array<i64: 1, 1, 1>, scalar_prefetch = 0 : i64, scratch_operands = 2 : i64, tpu.core_type = #tpu.core_type<tc>, window_params = [{transform_indices = @transform_0, window_bounds = array<i64: 32, 16>}, {transform_indices = @transform_1, window_bounds = array<i64: 32, 16>}, {transform_indices = @transform_2, window_bounds = array<i64: 16, 32>}, {transform_indices = @transform_3, window_bounds = array<i64: 16, 32>}, {transform_indices = @transform_4, window_bounds = array<i64: 1, 32>}, {transform_indices = @transform_5, window_bounds = array<i64: 1, 32>}, {transform_indices = @transform_6, window_bounds = array<i64: 32, 32>}, {transform_indices = @transform_7, window_bounds = array<i64: 32, 32>}]} {
    %c0_i32 = arith.constant 0 : i32
    %0 = arith.cmpi eq, %arg2, %c0_i32 : i32
    %1 = arith.extui %0 : i1 to i32
    %c0_i32_0 = arith.constant 0 : i32
    %2 = arith.cmpi ne, %1, %c0_i32_0 : i32
    scf.if %2 {
      %cst_20 = arith.constant 0.000000e+00 : f32
      %24 = vector.broadcast %cst_20 : f32 to vector<32x32xf32>
      %c0_21 = arith.constant 0 : index
      %c0_22 = arith.constant 0 : index
      %25 = vector.load %arg11[%c0_21, %c0_22] : memref<32x32xf32, #tpu.memory_space<vmem>>, vector<32x32xf32>
      tpu.vector_store %arg11[%c0_21, %c0_22], %24 {strides = array<i32>} : memref<32x32xf32, #tpu.memory_space<vmem>>, vector<32x32xf32>,
      %cst_23 = arith.constant 0.000000e+00 : f32
      %26 = vector.broadcast %cst_23 : f32 to vector<32x32xf32>
      %c0_24 = arith.constant 0 : index
      %c0_25 = arith.constant 0 : index
      %27 = vector.load %arg12[%c0_24, %c0_25] : memref<32x32xf32, #tpu.memory_space<vmem>>, vector<32x32xf32>
      tpu.vector_store %arg12[%c0_24, %c0_25], %26 {strides = array<i32>} : memref<32x32xf32, #tpu.memory_space<vmem>>, vector<32x32xf32>,
    } else {
    }
    %c0 = arith.constant 0 : index
    %c0_1 = arith.constant 0 : index
    %3 = vector.load %arg3[%c0, %c0_1] : memref<32x16xbf16, #tpu.memory_space<vmem>>, vector<32x16xbf16>
    %c0_2 = arith.constant 0 : index
    %c0_3 = arith.constant 0 : index
    %4 = vector.load %arg4[%c0_2, %c0_3] : memref<32x16xbf16, #tpu.memory_space<vmem>>, vector<32x16xbf16>
    %c0_4 = arith.constant 0 : index
    %c0_5 = arith.constant 0 : index
    %5 = vector.load %arg5[%c0_4, %c0_5] : memref<16x32xbf16, #tpu.memory_space<vmem>>, vector<16x32xbf16>
    %c0_6 = arith.constant 0 : index
    %c0_7 = arith.constant 0 : index
    %6 = vector.load %arg6[%c0_6, %c0_7] : memref<16x32xbf16, #tpu.memory_space<vmem>>, vector<16x32xbf16>
    %7 = arith.addf %3, %4 : vector<32x16xbf16>
    %8 = arith.addf %5, %6 : vector<16x32xbf16>
    %cst = arith.constant dense<0.000000e+00> : vector<32x32xf32>
    %9 = tpu.matmul %3, %5, %cst {dimension_numbers = #tpu.dot_dimension_numbers<[1], [0], [0], [1], [0, 0, 1, 1], [], []>} : vector<32x16xbf16>, vector<16x32xbf16>, vector<32x32xf32> -> vector<32x32xf32>
    %cst_8 = arith.constant dense<0.000000e+00> : vector<32x32xf32>
    %10 = tpu.matmul %4, %6, %cst_8 {dimension_numbers = #tpu.dot_dimension_numbers<[1], [0], [0], [1], [0, 0, 1, 1], [], []>} : vector<32x16xbf16>, vector<16x32xbf16>, vector<32x32xf32> -> vector<32x32xf32>
    %cst_9 = arith.constant dense<0.000000e+00> : vector<32x32xf32>
    %11 = tpu.matmul %7, %8, %cst_9 {dimension_numbers = #tpu.dot_dimension_numbers<[1], [0], [0], [1], [0, 0, 1, 1], [], []>} : vector<32x16xbf16>, vector<16x32xbf16>, vector<32x32xf32> -> vector<32x32xf32>
    %c0_10 = arith.constant 0 : index
    %c0_11 = arith.constant 0 : index
    %12 = vector.load %arg11[%c0_10, %c0_11] : memref<32x32xf32, #tpu.memory_space<vmem>>, vector<32x32xf32>
    %13 = arith.subf %9, %10 : vector<32x32xf32>
    %14 = arith.addf %12, %13 : vector<32x32xf32>
    %c0_12 = arith.constant 0 : index
    %c0_13 = arith.constant 0 : index
    %15 = vector.load %arg11[%c0_12, %c0_13] : memref<32x32xf32, #tpu.memory_space<vmem>>, vector<32x32xf32>
    tpu.vector_store %arg11[%c0_12, %c0_13], %14 {strides = array<i32>} : memref<32x32xf32, #tpu.memory_space<vmem>>, vector<32x32xf32>,
    %c0_14 = arith.constant 0 : index
    %c0_15 = arith.constant 0 : index
    %16 = vector.load %arg12[%c0_14, %c0_15] : memref<32x32xf32, #tpu.memory_space<vmem>>, vector<32x32xf32>
    %17 = arith.subf %11, %9 : vector<32x32xf32>
    %18 = arith.subf %17, %10 : vector<32x32xf32>
    %19 = arith.addf %16, %18 : vector<32x32xf32>
    %c0_16 = arith.constant 0 : index
    %c0_17 = arith.constant 0 : index
    %20 = vector.load %arg12[%c0_16, %c0_17] : memref<32x32xf32, #tpu.memory_space<vmem>>, vector<32x32xf32>
    tpu.vector_store %arg12[%c0_16, %c0_17], %19 {strides = array<i32>} : memref<32x32xf32, #tpu.memory_space<vmem>>, vector<32x32xf32>,
    %c0_i32_18 = arith.constant 0 : i32
    %21 = arith.cmpi eq, %arg2, %c0_i32_18 : i32
    %22 = arith.extui %21 : i1 to i32
    %c0_i32_19 = arith.constant 0 : i32
    %23 = arith.cmpi ne, %22, %c0_i32_19 : i32
    scf.if %23 {
      %c0_20 = arith.constant 0 : index
      %c0_21 = arith.constant 0 : index
      %24 = vector.load %arg11[%c0_20, %c0_21] : memref<32x32xf32, #tpu.memory_space<vmem>>, vector<32x32xf32>
      %c0_22 = arith.constant 0 : index
      %c0_23 = arith.constant 0 : index
      %25 = vector.load %arg7[%c0_22, %c0_23] : memref<1x32xf32, #tpu.memory_space<vmem>>, vector<1x32xf32>
      %26 = vector.broadcast %25 : vector<1x32xf32> to vector<32x32xf32>
      %27 = arith.addf %24, %26 : vector<32x32xf32>
      %c0_24 = arith.constant 0 : index
      %c0_25 = arith.constant 0 : index
      %28 = vector.load %arg12[%c0_24, %c0_25] : memref<32x32xf32, #tpu.memory_space<vmem>>, vector<32x32xf32>
      %c0_26 = arith.constant 0 : index
      %c0_27 = arith.constant 0 : index
      %29 = vector.load %arg8[%c0_26, %c0_27] : memref<1x32xf32, #tpu.memory_space<vmem>>, vector<1x32xf32>
      %30 = vector.broadcast %29 : vector<1x32xf32> to vector<32x32xf32>
      %31 = arith.addf %28, %30 : vector<32x32xf32>
      %c0_28 = arith.constant 0 : index
      %c0_29 = arith.constant 0 : index
      %32 = vector.load %arg9[%c0_28, %c0_29] : memref<32x32xf32, #tpu.memory_space<vmem>>, vector<32x32xf32>
      tpu.vector_store %arg9[%c0_28, %c0_29], %27 {strides = array<i32>} : memref<32x32xf32, #tpu.memory_space<vmem>>, vector<32x32xf32>,
      %c0_30 = arith.constant 0 : index
      %c0_31 = arith.constant 0 : index
      %33 = vector.load %arg10[%c0_30, %c0_31] : memref<32x32xf32, #tpu.memory_space<vmem>>, vector<32x32xf32>
      tpu.vector_store %arg10[%c0_30, %c0_31], %31 {strides = array<i32>} : memref<32x32xf32, #tpu.memory_space<vmem>>, vector<32x32xf32>,
    } else {
    }
    return
  }
  func.func @transform_0(%arg0: i32, %arg1: i32, %arg2: i32) -> (i32, i32) {
    %c0_i32 = arith.constant 0 : i32
    return %arg0, %arg2 : i32, i32
  }
  func.func @transform_1(%arg0: i32, %arg1: i32, %arg2: i32) -> (i32, i32) {
    %c0_i32 = arith.constant 0 : i32
    return %arg0, %arg2 : i32, i32
  }
  func.func @transform_2(%arg0: i32, %arg1: i32, %arg2: i32) -> (i32, i32) {
    %c0_i32 = arith.constant 0 : i32
    return %arg2, %arg1 : i32, i32
  }
  func.func @transform_3(%arg0: i32, %arg1: i32, %arg2: i32) -> (i32, i32) {
    %c0_i32 = arith.constant 0 : i32
    return %arg2, %arg1 : i32, i32
  }
  func.func @transform_4(%arg0: i32, %arg1: i32, %arg2: i32) -> (i32, i32) {
    %c0_i32 = arith.constant 0 : i32
    %c0_i32_0 = arith.constant 0 : i32
    return %c0_i32, %arg1 : i32, i32
  }
  func.func @transform_5(%arg0: i32, %arg1: i32, %arg2: i32) -> (i32, i32) {
    %c0_i32 = arith.constant 0 : i32
    %c0_i32_0 = arith.constant 0 : i32
    return %c0_i32, %arg1 : i32, i32
  }
  func.func @transform_6(%arg0: i32, %arg1: i32, %arg2: i32) -> (i32, i32) {
    %c0_i32 = arith.constant 0 : i32
    return %arg0, %arg1 : i32, i32
  }
  func.func @transform_7(%arg0: i32, %arg1: i32, %arg2: i32) -> (i32, i32) {
    %c0_i32 = arith.constant 0 : i32
    return %arg0, %arg1 : i32, i32
  }
}

module attributes {stable_mosaic.version = 11 : i64} {
  func.func @_cmatmul_kernel(%arg0: i32, %arg1: i32, %arg2: i32, %arg3: memref<32x32xbf16, #tpu.memory_space<vmem>>, %arg4: memref<32x32xbf16, #tpu.memory_space<vmem>>, %arg5: memref<32x96xbf16, #tpu.memory_space<vmem>>, %arg6: memref<32x96xbf16, #tpu.memory_space<vmem>>, %arg7: memref<1x96xf32, #tpu.memory_space<vmem>>, %arg8: memref<1x96xf32, #tpu.memory_space<vmem>>, %arg9: memref<32x96xbf16, #tpu.memory_space<vmem>>, %arg10: memref<32x96xbf16, #tpu.memory_space<vmem>>, %arg11: memref<32x96xf32, #tpu.memory_space<vmem>>, %arg12: memref<32x96xf32, #tpu.memory_space<vmem>>) attributes {dimension_semantics = [#tpu.dimension_semantics<parallel>, #tpu.dimension_semantics<parallel>, #tpu.dimension_semantics<arbitrary>], iteration_bounds = array<i64: 1, 1, 1>, scalar_prefetch = 0 : i64, scratch_operands = 2 : i64, tpu.core_type = #tpu.core_type<tc>, window_params = [{transform_indices = @transform_0, window_bounds = array<i64: 32, 32>}, {transform_indices = @transform_1, window_bounds = array<i64: 32, 32>}, {transform_indices = @transform_2, window_bounds = array<i64: 32, 96>}, {transform_indices = @transform_3, window_bounds = array<i64: 32, 96>}, {transform_indices = @transform_4, window_bounds = array<i64: 1, 96>}, {transform_indices = @transform_5, window_bounds = array<i64: 1, 96>}, {transform_indices = @transform_6, window_bounds = array<i64: 32, 96>}, {transform_indices = @transform_7, window_bounds = array<i64: 32, 96>}]} {
    %c0_i32 = arith.constant 0 : i32
    %0 = arith.cmpi eq, %arg2, %c0_i32 : i32
    %1 = arith.extui %0 : i1 to i32
    %c0_i32_0 = arith.constant 0 : i32
    %2 = arith.cmpi ne, %1, %c0_i32_0 : i32
    scf.if %2 {
      %cst_20 = arith.constant 0.000000e+00 : f32
      %24 = vector.broadcast %cst_20 : f32 to vector<32x96xf32>
      %c0_21 = arith.constant 0 : index
      %c0_22 = arith.constant 0 : index
      %25 = vector.load %arg11[%c0_21, %c0_22] : memref<32x96xf32, #tpu.memory_space<vmem>>, vector<32x96xf32>
      tpu.vector_store %arg11[%c0_21, %c0_22], %24 {strides = array<i32>} : memref<32x96xf32, #tpu.memory_space<vmem>>, vector<32x96xf32>,
      %cst_23 = arith.constant 0.000000e+00 : f32
      %26 = vector.broadcast %cst_23 : f32 to vector<32x96xf32>
      %c0_24 = arith.constant 0 : index
      %c0_25 = arith.constant 0 : index
      %27 = vector.load %arg12[%c0_24, %c0_25] : memref<32x96xf32, #tpu.memory_space<vmem>>, vector<32x96xf32>
      tpu.vector_store %arg12[%c0_24, %c0_25], %26 {strides = array<i32>} : memref<32x96xf32, #tpu.memory_space<vmem>>, vector<32x96xf32>,
    } else {
    }
    %c0 = arith.constant 0 : index
    %c0_1 = arith.constant 0 : index
    %3 = vector.load %arg3[%c0, %c0_1] : memref<32x32xbf16, #tpu.memory_space<vmem>>, vector<32x32xbf16>
    %c0_2 = arith.constant 0 : index
    %c0_3 = arith.constant 0 : index
    %4 = vector.load %arg4[%c0_2, %c0_3] : memref<32x32xbf16, #tpu.memory_space<vmem>>, vector<32x32xbf16>
    %c0_4 = arith.constant 0 : index
    %c0_5 = arith.constant 0 : index
    %5 = vector.load %arg5[%c0_4, %c0_5] : memref<32x96xbf16, #tpu.memory_space<vmem>>, vector<32x96xbf16>
    %c0_6 = arith.constant 0 : index
    %c0_7 = arith.constant 0 : index
    %6 = vector.load %arg6[%c0_6, %c0_7] : memref<32x96xbf16, #tpu.memory_space<vmem>>, vector<32x96xbf16>
    %7 = arith.addf %3, %4 : vector<32x32xbf16>
    %8 = arith.addf %5, %6 : vector<32x96xbf16>
    %cst = arith.constant dense<0.000000e+00> : vector<32x96xf32>
    %9 = tpu.matmul %3, %5, %cst {dimension_numbers = #tpu.dot_dimension_numbers<[1], [0], [0], [1], [0, 0, 1, 1], [], []>} : vector<32x32xbf16>, vector<32x96xbf16>, vector<32x96xf32> -> vector<32x96xf32>
    %cst_8 = arith.constant dense<0.000000e+00> : vector<32x96xf32>
    %10 = tpu.matmul %4, %6, %cst_8 {dimension_numbers = #tpu.dot_dimension_numbers<[1], [0], [0], [1], [0, 0, 1, 1], [], []>} : vector<32x32xbf16>, vector<32x96xbf16>, vector<32x96xf32> -> vector<32x96xf32>
    %cst_9 = arith.constant dense<0.000000e+00> : vector<32x96xf32>
    %11 = tpu.matmul %7, %8, %cst_9 {dimension_numbers = #tpu.dot_dimension_numbers<[1], [0], [0], [1], [0, 0, 1, 1], [], []>} : vector<32x32xbf16>, vector<32x96xbf16>, vector<32x96xf32> -> vector<32x96xf32>
    %c0_10 = arith.constant 0 : index
    %c0_11 = arith.constant 0 : index
    %12 = vector.load %arg11[%c0_10, %c0_11] : memref<32x96xf32, #tpu.memory_space<vmem>>, vector<32x96xf32>
    %13 = arith.subf %9, %10 : vector<32x96xf32>
    %14 = arith.addf %12, %13 : vector<32x96xf32>
    %c0_12 = arith.constant 0 : index
    %c0_13 = arith.constant 0 : index
    %15 = vector.load %arg11[%c0_12, %c0_13] : memref<32x96xf32, #tpu.memory_space<vmem>>, vector<32x96xf32>
    tpu.vector_store %arg11[%c0_12, %c0_13], %14 {strides = array<i32>} : memref<32x96xf32, #tpu.memory_space<vmem>>, vector<32x96xf32>,
    %c0_14 = arith.constant 0 : index
    %c0_15 = arith.constant 0 : index
    %16 = vector.load %arg12[%c0_14, %c0_15] : memref<32x96xf32, #tpu.memory_space<vmem>>, vector<32x96xf32>
    %17 = arith.subf %11, %9 : vector<32x96xf32>
    %18 = arith.subf %17, %10 : vector<32x96xf32>
    %19 = arith.addf %16, %18 : vector<32x96xf32>
    %c0_16 = arith.constant 0 : index
    %c0_17 = arith.constant 0 : index
    %20 = vector.load %arg12[%c0_16, %c0_17] : memref<32x96xf32, #tpu.memory_space<vmem>>, vector<32x96xf32>
    tpu.vector_store %arg12[%c0_16, %c0_17], %19 {strides = array<i32>} : memref<32x96xf32, #tpu.memory_space<vmem>>, vector<32x96xf32>,
    %c0_i32_18 = arith.constant 0 : i32
    %21 = arith.cmpi eq, %arg2, %c0_i32_18 : i32
    %22 = arith.extui %21 : i1 to i32
    %c0_i32_19 = arith.constant 0 : i32
    %23 = arith.cmpi ne, %22, %c0_i32_19 : i32
    scf.if %23 {
      %c0_20 = arith.constant 0 : index
      %c0_21 = arith.constant 0 : index
      %24 = vector.load %arg11[%c0_20, %c0_21] : memref<32x96xf32, #tpu.memory_space<vmem>>, vector<32x96xf32>
      %c0_22 = arith.constant 0 : index
      %c0_23 = arith.constant 0 : index
      %25 = vector.load %arg7[%c0_22, %c0_23] : memref<1x96xf32, #tpu.memory_space<vmem>>, vector<1x96xf32>
      %26 = vector.broadcast %25 : vector<1x96xf32> to vector<32x96xf32>
      %27 = arith.addf %24, %26 : vector<32x96xf32>
      %c0_24 = arith.constant 0 : index
      %c0_25 = arith.constant 0 : index
      %28 = vector.load %arg12[%c0_24, %c0_25] : memref<32x96xf32, #tpu.memory_space<vmem>>, vector<32x96xf32>
      %c0_26 = arith.constant 0 : index
      %c0_27 = arith.constant 0 : index
      %29 = vector.load %arg8[%c0_26, %c0_27] : memref<1x96xf32, #tpu.memory_space<vmem>>, vector<1x96xf32>
      %30 = vector.broadcast %29 : vector<1x96xf32> to vector<32x96xf32>
      %31 = arith.addf %28, %30 : vector<32x96xf32>
      %32 = arith.truncf %27 : vector<32x96xf32> to vector<32x96xbf16>
      %c0_28 = arith.constant 0 : index
      %c0_29 = arith.constant 0 : index
      %33 = vector.load %arg9[%c0_28, %c0_29] : memref<32x96xbf16, #tpu.memory_space<vmem>>, vector<32x96xbf16>
      tpu.vector_store %arg9[%c0_28, %c0_29], %32 {strides = array<i32>} : memref<32x96xbf16, #tpu.memory_space<vmem>>, vector<32x96xbf16>,
      %34 = arith.truncf %31 : vector<32x96xf32> to vector<32x96xbf16>
      %c0_30 = arith.constant 0 : index
      %c0_31 = arith.constant 0 : index
      %35 = vector.load %arg10[%c0_30, %c0_31] : memref<32x96xbf16, #tpu.memory_space<vmem>>, vector<32x96xbf16>
      tpu.vector_store %arg10[%c0_30, %c0_31], %34 {strides = array<i32>} : memref<32x96xbf16, #tpu.memory_space<vmem>>, vector<32x96xbf16>,
    } else {
    }
    return
  }
  func.func @transform_0(%arg0: i32, %arg1: i32, %arg2: i32) -> (i32, i32) {
    %c0_i32 = arith.constant 0 : i32
    return %arg0, %arg2 : i32, i32
  }
  func.func @transform_1(%arg0: i32, %arg1: i32, %arg2: i32) -> (i32, i32) {
    %c0_i32 = arith.constant 0 : i32
    return %arg0, %arg2 : i32, i32
  }
  func.func @transform_2(%arg0: i32, %arg1: i32, %arg2: i32) -> (i32, i32) {
    %c0_i32 = arith.constant 0 : i32
    return %arg2, %arg1 : i32, i32
  }
  func.func @transform_3(%arg0: i32, %arg1: i32, %arg2: i32) -> (i32, i32) {
    %c0_i32 = arith.constant 0 : i32
    return %arg2, %arg1 : i32, i32
  }
  func.func @transform_4(%arg0: i32, %arg1: i32, %arg2: i32) -> (i32, i32) {
    %c0_i32 = arith.constant 0 : i32
    %c0_i32_0 = arith.constant 0 : i32
    return %c0_i32, %arg1 : i32, i32
  }
  func.func @transform_5(%arg0: i32, %arg1: i32, %arg2: i32) -> (i32, i32) {
    %c0_i32 = arith.constant 0 : i32
    %c0_i32_0 = arith.constant 0 : i32
    return %c0_i32, %arg1 : i32, i32
  }
  func.func @transform_6(%arg0: i32, %arg1: i32, %arg2: i32) -> (i32, i32) {
    %c0_i32 = arith.constant 0 : i32
    return %arg0, %arg1 : i32, i32
  }
  func.func @transform_7(%arg0: i32, %arg1: i32, %arg2: i32) -> (i32, i32) {
    %c0_i32 = arith.constant 0 : i32
    return %arg0, %arg1 : i32, i32
  }
}

module attributes {stable_mosaic.version = 11 : i64} {
  func.func @_cattn_kernel(%arg0: i32, %arg1: i32, %arg2: memref<1x1x16x16xbf16, #tpu.memory_space<vmem>>, %arg3: memref<1x1x16x16xbf16, #tpu.memory_space<vmem>>, %arg4: memref<1x1x16x16xbf16, #tpu.memory_space<vmem>>, %arg5: memref<1x1x16x16xbf16, #tpu.memory_space<vmem>>) attributes {dimension_semantics = [#tpu.dimension_semantics<parallel>, #tpu.dimension_semantics<parallel>], iteration_bounds = array<i64: 2, 4>, scalar_prefetch = 0 : i64, scratch_operands = 0 : i64, tpu.core_type = #tpu.core_type<tc>, window_params = [{transform_indices = @transform_0, window_bounds = array<i64: 1, 1, 16, 16>}, {transform_indices = @transform_1, window_bounds = array<i64: 1, 1, 16, 16>}, {transform_indices = @transform_2, window_bounds = array<i64: 1, 1, 16, 16>}, {transform_indices = @transform_3, window_bounds = array<i64: 1, 1, 16, 16>}]} {
    %c0 = arith.constant 0 : index
    %c0_0 = arith.constant 0 : index
    %c0_1 = arith.constant 0 : index
    %c0_2 = arith.constant 0 : index
    %0 = vector.load %arg2[%c0, %c0_0, %c0_1, %c0_2] : memref<1x1x16x16xbf16, #tpu.memory_space<vmem>>, vector<1x1x16x16xbf16>
    %1 = vector.shape_cast %0 : vector<1x1x16x16xbf16> to vector<16x16xbf16>
    %c0_3 = arith.constant 0 : index
    %c0_4 = arith.constant 0 : index
    %c0_5 = arith.constant 0 : index
    %c0_6 = arith.constant 0 : index
    %2 = vector.load %arg3[%c0_3, %c0_4, %c0_5, %c0_6] : memref<1x1x16x16xbf16, #tpu.memory_space<vmem>>, vector<1x1x16x16xbf16>
    %3 = vector.shape_cast %2 : vector<1x1x16x16xbf16> to vector<16x16xbf16>
    %cst = arith.constant dense<0.000000e+00> : vector<16x16xf32>
    %4 = tpu.matmul %1, %3, %cst {dimension_numbers = #tpu.dot_dimension_numbers<[1], [1], [0], [0], [0, 0, 1, 0], [], []>} : vector<16x16xbf16>, vector<16x16xbf16>, vector<16x16xf32> -> vector<16x16xf32>
    %cst_7 = arith.constant dense<0xFF800000> : vector<16xf32>
    %5 = vector.multi_reduction <maximumf>, %4, %cst_7 [1] : vector<16x16xf32> to vector<16xf32>
    %6 = vector.shape_cast %5 : vector<16xf32> to vector<16x1xf32>
    %7 = vector.broadcast %6 : vector<16x1xf32> to vector<16x16xf32>
    %8 = arith.subf %4, %7 : vector<16x16xf32>
    %9 = math.exp %8 : vector<16x16xf32>
    %cst_8 = arith.constant dense<0.000000e+00> : vector<16xf32>
    %10 = vector.multi_reduction <add>, %9, %cst_8 [1] : vector<16x16xf32> to vector<16xf32>
    %11 = vector.shape_cast %10 : vector<16xf32> to vector<16x1xf32>
    %12 = tpu.reciprocal %11 {approx = true} : vector<16x1xf32> -> vector<16x1xf32>
    %13 = vector.broadcast %12 : vector<16x1xf32> to vector<16x16xf32>
    %14 = arith.mulf %9, %13 : vector<16x16xf32>
    %15 = arith.truncf %14 : vector<16x16xf32> to vector<16x16xbf16>
    %c0_9 = arith.constant 0 : index
    %c0_10 = arith.constant 0 : index
    %c0_11 = arith.constant 0 : index
    %c0_12 = arith.constant 0 : index
    %16 = vector.load %arg4[%c0_9, %c0_10, %c0_11, %c0_12] : memref<1x1x16x16xbf16, #tpu.memory_space<vmem>>, vector<1x1x16x16xbf16>
    %17 = vector.shape_cast %16 : vector<1x1x16x16xbf16> to vector<16x16xbf16>
    %cst_13 = arith.constant dense<0.000000e+00> : vector<16x16xf32>
    %18 = tpu.matmul %15, %17, %cst_13 {dimension_numbers = #tpu.dot_dimension_numbers<[1], [0], [0], [1], [0, 0, 1, 1], [], []>} : vector<16x16xbf16>, vector<16x16xbf16>, vector<16x16xf32> -> vector<16x16xf32>
    %19 = arith.truncf %18 : vector<16x16xf32> to vector<16x16xbf16>
    %c0_14 = arith.constant 0 : index
    %c0_15 = arith.constant 0 : index
    %c0_16 = arith.constant 0 : index
    %c0_17 = arith.constant 0 : index
    %20 = vector.load %arg5[%c0_14, %c0_15, %c0_16, %c0_17] : memref<1x1x16x16xbf16, #tpu.memory_space<vmem>>, vector<1x1x16x16xbf16>
    %21 = vector.shape_cast %20 : vector<1x1x16x16xbf16> to vector<16x16xbf16>
    %22 = vector.shape_cast %19 : vector<16x16xbf16> to vector<1x1x16x16xbf16>
    tpu.vector_store %arg5[%c0_14, %c0_15, %c0_16, %c0_17], %22 {strides = array<i32>} : memref<1x1x16x16xbf16, #tpu.memory_space<vmem>>, vector<1x1x16x16xbf16>,
    return
  }
  func.func @transform_0(%arg0: i32, %arg1: i32) -> (i32, i32, i32, i32) {
    %c0_i32 = arith.constant 0 : i32
    %c0_i32_0 = arith.constant 0 : i32
    %c0_i32_1 = arith.constant 0 : i32
    return %arg0, %arg1, %c0_i32, %c0_i32_0 : i32, i32, i32, i32
  }
  func.func @transform_1(%arg0: i32, %arg1: i32) -> (i32, i32, i32, i32) {
    %c0_i32 = arith.constant 0 : i32
    %c0_i32_0 = arith.constant 0 : i32
    %c0_i32_1 = arith.constant 0 : i32
    return %arg0, %arg1, %c0_i32, %c0_i32_0 : i32, i32, i32, i32
  }
  func.func @transform_2(%arg0: i32, %arg1: i32) -> (i32, i32, i32, i32) {
    %c0_i32 = arith.constant 0 : i32
    %c0_i32_0 = arith.constant 0 : i32
    %c0_i32_1 = arith.constant 0 : i32
    return %arg0, %arg1, %c0_i32, %c0_i32_0 : i32, i32, i32, i32
  }
  func.func @transform_3(%arg0: i32, %arg1: i32) -> (i32, i32, i32, i32) {
    %c0_i32 = arith.constant 0 : i32
    %c0_i32_0 = arith.constant 0 : i32
    %c0_i32_1 = arith.constant 0 : i32
    return %arg0, %arg1, %c0_i32, %c0_i32_0 : i32, i32, i32, i32
  }
}

module attributes {stable_mosaic.version = 11 : i64} {
  func.func @_cmatmul_kernel(%arg0: i32, %arg1: i32, %arg2: i32, %arg3: memref<32x32xbf16, #tpu.memory_space<vmem>>, %arg4: memref<32x32xbf16, #tpu.memory_space<vmem>>, %arg5: memref<32x32xbf16, #tpu.memory_space<vmem>>, %arg6: memref<32x32xbf16, #tpu.memory_space<vmem>>, %arg7: memref<1x32xf32, #tpu.memory_space<vmem>>, %arg8: memref<1x32xf32, #tpu.memory_space<vmem>>, %arg9: memref<32x32xbf16, #tpu.memory_space<vmem>>, %arg10: memref<32x32xbf16, #tpu.memory_space<vmem>>, %arg11: memref<32x32xf32, #tpu.memory_space<vmem>>, %arg12: memref<32x32xf32, #tpu.memory_space<vmem>>) attributes {dimension_semantics = [#tpu.dimension_semantics<parallel>, #tpu.dimension_semantics<parallel>, #tpu.dimension_semantics<arbitrary>], iteration_bounds = array<i64: 1, 1, 1>, scalar_prefetch = 0 : i64, scratch_operands = 2 : i64, tpu.core_type = #tpu.core_type<tc>, window_params = [{transform_indices = @transform_0, window_bounds = array<i64: 32, 32>}, {transform_indices = @transform_1, window_bounds = array<i64: 32, 32>}, {transform_indices = @transform_2, window_bounds = array<i64: 32, 32>}, {transform_indices = @transform_3, window_bounds = array<i64: 32, 32>}, {transform_indices = @transform_4, window_bounds = array<i64: 1, 32>}, {transform_indices = @transform_5, window_bounds = array<i64: 1, 32>}, {transform_indices = @transform_6, window_bounds = array<i64: 32, 32>}, {transform_indices = @transform_7, window_bounds = array<i64: 32, 32>}]} {
    %c0_i32 = arith.constant 0 : i32
    %0 = arith.cmpi eq, %arg2, %c0_i32 : i32
    %1 = arith.extui %0 : i1 to i32
    %c0_i32_0 = arith.constant 0 : i32
    %2 = arith.cmpi ne, %1, %c0_i32_0 : i32
    scf.if %2 {
      %cst_20 = arith.constant 0.000000e+00 : f32
      %24 = vector.broadcast %cst_20 : f32 to vector<32x32xf32>
      %c0_21 = arith.constant 0 : index
      %c0_22 = arith.constant 0 : index
      %25 = vector.load %arg11[%c0_21, %c0_22] : memref<32x32xf32, #tpu.memory_space<vmem>>, vector<32x32xf32>
      tpu.vector_store %arg11[%c0_21, %c0_22], %24 {strides = array<i32>} : memref<32x32xf32, #tpu.memory_space<vmem>>, vector<32x32xf32>,
      %cst_23 = arith.constant 0.000000e+00 : f32
      %26 = vector.broadcast %cst_23 : f32 to vector<32x32xf32>
      %c0_24 = arith.constant 0 : index
      %c0_25 = arith.constant 0 : index
      %27 = vector.load %arg12[%c0_24, %c0_25] : memref<32x32xf32, #tpu.memory_space<vmem>>, vector<32x32xf32>
      tpu.vector_store %arg12[%c0_24, %c0_25], %26 {strides = array<i32>} : memref<32x32xf32, #tpu.memory_space<vmem>>, vector<32x32xf32>,
    } else {
    }
    %c0 = arith.constant 0 : index
    %c0_1 = arith.constant 0 : index
    %3 = vector.load %arg3[%c0, %c0_1] : memref<32x32xbf16, #tpu.memory_space<vmem>>, vector<32x32xbf16>
    %c0_2 = arith.constant 0 : index
    %c0_3 = arith.constant 0 : index
    %4 = vector.load %arg4[%c0_2, %c0_3] : memref<32x32xbf16, #tpu.memory_space<vmem>>, vector<32x32xbf16>
    %c0_4 = arith.constant 0 : index
    %c0_5 = arith.constant 0 : index
    %5 = vector.load %arg5[%c0_4, %c0_5] : memref<32x32xbf16, #tpu.memory_space<vmem>>, vector<32x32xbf16>
    %c0_6 = arith.constant 0 : index
    %c0_7 = arith.constant 0 : index
    %6 = vector.load %arg6[%c0_6, %c0_7] : memref<32x32xbf16, #tpu.memory_space<vmem>>, vector<32x32xbf16>
    %7 = arith.addf %3, %4 : vector<32x32xbf16>
    %8 = arith.addf %5, %6 : vector<32x32xbf16>
    %cst = arith.constant dense<0.000000e+00> : vector<32x32xf32>
    %9 = tpu.matmul %3, %5, %cst {dimension_numbers = #tpu.dot_dimension_numbers<[1], [0], [0], [1], [0, 0, 1, 1], [], []>} : vector<32x32xbf16>, vector<32x32xbf16>, vector<32x32xf32> -> vector<32x32xf32>
    %cst_8 = arith.constant dense<0.000000e+00> : vector<32x32xf32>
    %10 = tpu.matmul %4, %6, %cst_8 {dimension_numbers = #tpu.dot_dimension_numbers<[1], [0], [0], [1], [0, 0, 1, 1], [], []>} : vector<32x32xbf16>, vector<32x32xbf16>, vector<32x32xf32> -> vector<32x32xf32>
    %cst_9 = arith.constant dense<0.000000e+00> : vector<32x32xf32>
    %11 = tpu.matmul %7, %8, %cst_9 {dimension_numbers = #tpu.dot_dimension_numbers<[1], [0], [0], [1], [0, 0, 1, 1], [], []>} : vector<32x32xbf16>, vector<32x32xbf16>, vector<32x32xf32> -> vector<32x32xf32>
    %c0_10 = arith.constant 0 : index
    %c0_11 = arith.constant 0 : index
    %12 = vector.load %arg11[%c0_10, %c0_11] : memref<32x32xf32, #tpu.memory_space<vmem>>, vector<32x32xf32>
    %13 = arith.subf %9, %10 : vector<32x32xf32>
    %14 = arith.addf %12, %13 : vector<32x32xf32>
    %c0_12 = arith.constant 0 : index
    %c0_13 = arith.constant 0 : index
    %15 = vector.load %arg11[%c0_12, %c0_13] : memref<32x32xf32, #tpu.memory_space<vmem>>, vector<32x32xf32>
    tpu.vector_store %arg11[%c0_12, %c0_13], %14 {strides = array<i32>} : memref<32x32xf32, #tpu.memory_space<vmem>>, vector<32x32xf32>,
    %c0_14 = arith.constant 0 : index
    %c0_15 = arith.constant 0 : index
    %16 = vector.load %arg12[%c0_14, %c0_15] : memref<32x32xf32, #tpu.memory_space<vmem>>, vector<32x32xf32>
    %17 = arith.subf %11, %9 : vector<32x32xf32>
    %18 = arith.subf %17, %10 : vector<32x32xf32>
    %19 = arith.addf %16, %18 : vector<32x32xf32>
    %c0_16 = arith.constant 0 : index
    %c0_17 = arith.constant 0 : index
    %20 = vector.load %arg12[%c0_16, %c0_17] : memref<32x32xf32, #tpu.memory_space<vmem>>, vector<32x32xf32>
    tpu.vector_store %arg12[%c0_16, %c0_17], %19 {strides = array<i32>} : memref<32x32xf32, #tpu.memory_space<vmem>>, vector<32x32xf32>,
    %c0_i32_18 = arith.constant 0 : i32
    %21 = arith.cmpi eq, %arg2, %c0_i32_18 : i32
    %22 = arith.extui %21 : i1 to i32
    %c0_i32_19 = arith.constant 0 : i32
    %23 = arith.cmpi ne, %22, %c0_i32_19 : i32
    scf.if %23 {
      %c0_20 = arith.constant 0 : index
      %c0_21 = arith.constant 0 : index
      %24 = vector.load %arg11[%c0_20, %c0_21] : memref<32x32xf32, #tpu.memory_space<vmem>>, vector<32x32xf32>
      %c0_22 = arith.constant 0 : index
      %c0_23 = arith.constant 0 : index
      %25 = vector.load %arg7[%c0_22, %c0_23] : memref<1x32xf32, #tpu.memory_space<vmem>>, vector<1x32xf32>
      %26 = vector.broadcast %25 : vector<1x32xf32> to vector<32x32xf32>
      %27 = arith.addf %24, %26 : vector<32x32xf32>
      %c0_24 = arith.constant 0 : index
      %c0_25 = arith.constant 0 : index
      %28 = vector.load %arg12[%c0_24, %c0_25] : memref<32x32xf32, #tpu.memory_space<vmem>>, vector<32x32xf32>
      %c0_26 = arith.constant 0 : index
      %c0_27 = arith.constant 0 : index
      %29 = vector.load %arg8[%c0_26, %c0_27] : memref<1x32xf32, #tpu.memory_space<vmem>>, vector<1x32xf32>
      %30 = vector.broadcast %29 : vector<1x32xf32> to vector<32x32xf32>
      %31 = arith.addf %28, %30 : vector<32x32xf32>
      %32 = arith.truncf %27 : vector<32x32xf32> to vector<32x32xbf16>
      %c0_28 = arith.constant 0 : index
      %c0_29 = arith.constant 0 : index
      %33 = vector.load %arg9[%c0_28, %c0_29] : memref<32x32xbf16, #tpu.memory_space<vmem>>, vector<32x32xbf16>
      tpu.vector_store %arg9[%c0_28, %c0_29], %32 {strides = array<i32>} : memref<32x32xbf16, #tpu.memory_space<vmem>>, vector<32x32xbf16>,
      %34 = arith.truncf %31 : vector<32x32xf32> to vector<32x32xbf16>
      %c0_30 = arith.constant 0 : index
      %c0_31 = arith.constant 0 : index
      %35 = vector.load %arg10[%c0_30, %c0_31] : memref<32x32xbf16, #tpu.memory_space<vmem>>, vector<32x32xbf16>
      tpu.vector_store %arg10[%c0_30, %c0_31], %34 {strides = array<i32>} : memref<32x32xbf16, #tpu.memory_space<vmem>>, vector<32x32xbf16>,
    } else {
    }
    return
  }
  func.func @transform_0(%arg0: i32, %arg1: i32, %arg2: i32) -> (i32, i32) {
    %c0_i32 = arith.constant 0 : i32
    return %arg0, %arg2 : i32, i32
  }
  func.func @transform_1(%arg0: i32, %arg1: i32, %arg2: i32) -> (i32, i32) {
    %c0_i32 = arith.constant 0 : i32
    return %arg0, %arg2 : i32, i32
  }
  func.func @transform_2(%arg0: i32, %arg1: i32, %arg2: i32) -> (i32, i32) {
    %c0_i32 = arith.constant 0 : i32
    return %arg2, %arg1 : i32, i32
  }
  func.func @transform_3(%arg0: i32, %arg1: i32, %arg2: i32) -> (i32, i32) {
    %c0_i32 = arith.constant 0 : i32
    return %arg2, %arg1 : i32, i32
  }
  func.func @transform_4(%arg0: i32, %arg1: i32, %arg2: i32) -> (i32, i32) {
    %c0_i32 = arith.constant 0 : i32
    %c0_i32_0 = arith.constant 0 : i32
    return %c0_i32, %arg1 : i32, i32
  }
  func.func @transform_5(%arg0: i32, %arg1: i32, %arg2: i32) -> (i32, i32) {
    %c0_i32 = arith.constant 0 : i32
    %c0_i32_0 = arith.constant 0 : i32
    return %c0_i32, %arg1 : i32, i32
  }
  func.func @transform_6(%arg0: i32, %arg1: i32, %arg2: i32) -> (i32, i32) {
    %c0_i32 = arith.constant 0 : i32
    return %arg0, %arg1 : i32, i32
  }
  func.func @transform_7(%arg0: i32, %arg1: i32, %arg2: i32) -> (i32, i32) {
    %c0_i32 = arith.constant 0 : i32
    return %arg0, %arg1 : i32, i32
  }
}

module attributes {stable_mosaic.version = 11 : i64} {
  func.func @_cmatmul_kernel(%arg0: i32, %arg1: i32, %arg2: i32, %arg3: memref<32x32xbf16, #tpu.memory_space<vmem>>, %arg4: memref<32x32xbf16, #tpu.memory_space<vmem>>, %arg5: memref<32x128xbf16, #tpu.memory_space<vmem>>, %arg6: memref<32x128xbf16, #tpu.memory_space<vmem>>, %arg7: memref<1x128xf32, #tpu.memory_space<vmem>>, %arg8: memref<1x128xf32, #tpu.memory_space<vmem>>, %arg9: memref<32x128xbf16, #tpu.memory_space<vmem>>, %arg10: memref<32x128xbf16, #tpu.memory_space<vmem>>, %arg11: memref<32x128xf32, #tpu.memory_space<vmem>>, %arg12: memref<32x128xf32, #tpu.memory_space<vmem>>) attributes {dimension_semantics = [#tpu.dimension_semantics<parallel>, #tpu.dimension_semantics<parallel>, #tpu.dimension_semantics<arbitrary>], iteration_bounds = array<i64: 1, 1, 1>, scalar_prefetch = 0 : i64, scratch_operands = 2 : i64, tpu.core_type = #tpu.core_type<tc>, window_params = [{transform_indices = @transform_0, window_bounds = array<i64: 32, 32>}, {transform_indices = @transform_1, window_bounds = array<i64: 32, 32>}, {transform_indices = @transform_2, window_bounds = array<i64: 32, 128>}, {transform_indices = @transform_3, window_bounds = array<i64: 32, 128>}, {transform_indices = @transform_4, window_bounds = array<i64: 1, 128>}, {transform_indices = @transform_5, window_bounds = array<i64: 1, 128>}, {transform_indices = @transform_6, window_bounds = array<i64: 32, 128>}, {transform_indices = @transform_7, window_bounds = array<i64: 32, 128>}]} {
    %c0_i32 = arith.constant 0 : i32
    %0 = arith.cmpi eq, %arg2, %c0_i32 : i32
    %1 = arith.extui %0 : i1 to i32
    %c0_i32_0 = arith.constant 0 : i32
    %2 = arith.cmpi ne, %1, %c0_i32_0 : i32
    scf.if %2 {
      %cst_20 = arith.constant 0.000000e+00 : f32
      %24 = vector.broadcast %cst_20 : f32 to vector<32x128xf32>
      %c0_21 = arith.constant 0 : index
      %c0_22 = arith.constant 0 : index
      %25 = vector.load %arg11[%c0_21, %c0_22] : memref<32x128xf32, #tpu.memory_space<vmem>>, vector<32x128xf32>
      tpu.vector_store %arg11[%c0_21, %c0_22], %24 {strides = array<i32>} : memref<32x128xf32, #tpu.memory_space<vmem>>, vector<32x128xf32>,
      %cst_23 = arith.constant 0.000000e+00 : f32
      %26 = vector.broadcast %cst_23 : f32 to vector<32x128xf32>
      %c0_24 = arith.constant 0 : index
      %c0_25 = arith.constant 0 : index
      %27 = vector.load %arg12[%c0_24, %c0_25] : memref<32x128xf32, #tpu.memory_space<vmem>>, vector<32x128xf32>
      tpu.vector_store %arg12[%c0_24, %c0_25], %26 {strides = array<i32>} : memref<32x128xf32, #tpu.memory_space<vmem>>, vector<32x128xf32>,
    } else {
    }
    %c0 = arith.constant 0 : index
    %c0_1 = arith.constant 0 : index
    %3 = vector.load %arg3[%c0, %c0_1] : memref<32x32xbf16, #tpu.memory_space<vmem>>, vector<32x32xbf16>
    %c0_2 = arith.constant 0 : index
    %c0_3 = arith.constant 0 : index
    %4 = vector.load %arg4[%c0_2, %c0_3] : memref<32x32xbf16, #tpu.memory_space<vmem>>, vector<32x32xbf16>
    %c0_4 = arith.constant 0 : index
    %c0_5 = arith.constant 0 : index
    %5 = vector.load %arg5[%c0_4, %c0_5] : memref<32x128xbf16, #tpu.memory_space<vmem>>, vector<32x128xbf16>
    %c0_6 = arith.constant 0 : index
    %c0_7 = arith.constant 0 : index
    %6 = vector.load %arg6[%c0_6, %c0_7] : memref<32x128xbf16, #tpu.memory_space<vmem>>, vector<32x128xbf16>
    %7 = arith.addf %3, %4 : vector<32x32xbf16>
    %8 = arith.addf %5, %6 : vector<32x128xbf16>
    %cst = arith.constant dense<0.000000e+00> : vector<32x128xf32>
    %9 = tpu.matmul %3, %5, %cst {dimension_numbers = #tpu.dot_dimension_numbers<[1], [0], [0], [1], [0, 0, 1, 1], [], []>} : vector<32x32xbf16>, vector<32x128xbf16>, vector<32x128xf32> -> vector<32x128xf32>
    %cst_8 = arith.constant dense<0.000000e+00> : vector<32x128xf32>
    %10 = tpu.matmul %4, %6, %cst_8 {dimension_numbers = #tpu.dot_dimension_numbers<[1], [0], [0], [1], [0, 0, 1, 1], [], []>} : vector<32x32xbf16>, vector<32x128xbf16>, vector<32x128xf32> -> vector<32x128xf32>
    %cst_9 = arith.constant dense<0.000000e+00> : vector<32x128xf32>
    %11 = tpu.matmul %7, %8, %cst_9 {dimension_numbers = #tpu.dot_dimension_numbers<[1], [0], [0], [1], [0, 0, 1, 1], [], []>} : vector<32x32xbf16>, vector<32x128xbf16>, vector<32x128xf32> -> vector<32x128xf32>
    %c0_10 = arith.constant 0 : index
    %c0_11 = arith.constant 0 : index
    %12 = vector.load %arg11[%c0_10, %c0_11] : memref<32x128xf32, #tpu.memory_space<vmem>>, vector<32x128xf32>
    %13 = arith.subf %9, %10 : vector<32x128xf32>
    %14 = arith.addf %12, %13 : vector<32x128xf32>
    %c0_12 = arith.constant 0 : index
    %c0_13 = arith.constant 0 : index
    %15 = vector.load %arg11[%c0_12, %c0_13] : memref<32x128xf32, #tpu.memory_space<vmem>>, vector<32x128xf32>
    tpu.vector_store %arg11[%c0_12, %c0_13], %14 {strides = array<i32>} : memref<32x128xf32, #tpu.memory_space<vmem>>, vector<32x128xf32>,
    %c0_14 = arith.constant 0 : index
    %c0_15 = arith.constant 0 : index
    %16 = vector.load %arg12[%c0_14, %c0_15] : memref<32x128xf32, #tpu.memory_space<vmem>>, vector<32x128xf32>
    %17 = arith.subf %11, %9 : vector<32x128xf32>
    %18 = arith.subf %17, %10 : vector<32x128xf32>
    %19 = arith.addf %16, %18 : vector<32x128xf32>
    %c0_16 = arith.constant 0 : index
    %c0_17 = arith.constant 0 : index
    %20 = vector.load %arg12[%c0_16, %c0_17] : memref<32x128xf32, #tpu.memory_space<vmem>>, vector<32x128xf32>
    tpu.vector_store %arg12[%c0_16, %c0_17], %19 {strides = array<i32>} : memref<32x128xf32, #tpu.memory_space<vmem>>, vector<32x128xf32>,
    %c0_i32_18 = arith.constant 0 : i32
    %21 = arith.cmpi eq, %arg2, %c0_i32_18 : i32
    %22 = arith.extui %21 : i1 to i32
    %c0_i32_19 = arith.constant 0 : i32
    %23 = arith.cmpi ne, %22, %c0_i32_19 : i32
    scf.if %23 {
      %c0_20 = arith.constant 0 : index
      %c0_21 = arith.constant 0 : index
      %24 = vector.load %arg11[%c0_20, %c0_21] : memref<32x128xf32, #tpu.memory_space<vmem>>, vector<32x128xf32>
      %c0_22 = arith.constant 0 : index
      %c0_23 = arith.constant 0 : index
      %25 = vector.load %arg7[%c0_22, %c0_23] : memref<1x128xf32, #tpu.memory_space<vmem>>, vector<1x128xf32>
      %26 = vector.broadcast %25 : vector<1x128xf32> to vector<32x128xf32>
      %27 = arith.addf %24, %26 : vector<32x128xf32>
      %c0_24 = arith.constant 0 : index
      %c0_25 = arith.constant 0 : index
      %28 = vector.load %arg12[%c0_24, %c0_25] : memref<32x128xf32, #tpu.memory_space<vmem>>, vector<32x128xf32>
      %c0_26 = arith.constant 0 : index
      %c0_27 = arith.constant 0 : index
      %29 = vector.load %arg8[%c0_26, %c0_27] : memref<1x128xf32, #tpu.memory_space<vmem>>, vector<1x128xf32>
      %30 = vector.broadcast %29 : vector<1x128xf32> to vector<32x128xf32>
      %31 = arith.addf %28, %30 : vector<32x128xf32>
      %32 = arith.mulf %27, %27 : vector<32x128xf32>
      %33 = arith.mulf %27, %32 : vector<32x128xf32>
      %cst_28 = arith.constant 4.471500e-02 : f32
      %34 = vector.broadcast %cst_28 : f32 to vector<32x128xf32>
      %35 = arith.mulf %34, %33 : vector<32x128xf32>
      %36 = arith.addf %27, %35 : vector<32x128xf32>
      %cst_29 = arith.constant 0.797884583 : f32
      %37 = vector.broadcast %cst_29 : f32 to vector<32x128xf32>
      %38 = arith.mulf %37, %36 : vector<32x128xf32>
      %39 = math.tanh %38 : vector<32x128xf32>
      %cst_30 = arith.constant 1.000000e+00 : f32
      %40 = vector.broadcast %cst_30 : f32 to vector<32x128xf32>
      %41 = arith.addf %40, %39 : vector<32x128xf32>
      %cst_31 = arith.constant 5.000000e-01 : f32
      %42 = vector.broadcast %cst_31 : f32 to vector<32x128xf32>
      %43 = arith.mulf %42, %41 : vector<32x128xf32>
      %44 = arith.mulf %27, %43 : vector<32x128xf32>
      %45 = arith.mulf %31, %31 : vector<32x128xf32>
      %46 = arith.mulf %31, %45 : vector<32x128xf32>
      %cst_32 = arith.constant 4.471500e-02 : f32
      %47 = vector.broadcast %cst_32 : f32 to vector<32x128xf32>
      %48 = arith.mulf %47, %46 : vector<32x128xf32>
      %49 = arith.addf %31, %48 : vector<32x128xf32>
      %cst_33 = arith.constant 0.797884583 : f32
      %50 = vector.broadcast %cst_33 : f32 to vector<32x128xf32>
      %51 = arith.mulf %50, %49 : vector<32x128xf32>
      %52 = math.tanh %51 : vector<32x128xf32>
      %cst_34 = arith.constant 1.000000e+00 : f32
      %53 = vector.broadcast %cst_34 : f32 to vector<32x128xf32>
      %54 = arith.addf %53, %52 : vector<32x128xf32>
      %cst_35 = arith.constant 5.000000e-01 : f32
      %55 = vector.broadcast %cst_35 : f32 to vector<32x128xf32>
      %56 = arith.mulf %55, %54 : vector<32x128xf32>
      %57 = arith.mulf %31, %56 : vector<32x128xf32>
      %58 = arith.truncf %44 : vector<32x128xf32> to vector<32x128xbf16>
      %c0_36 = arith.constant 0 : index
      %c0_37 = arith.constant 0 : index
      %59 = vector.load %arg9[%c0_36, %c0_37] : memref<32x128xbf16, #tpu.memory_space<vmem>>, vector<32x128xbf16>
      tpu.vector_store %arg9[%c0_36, %c0_37], %58 {strides = array<i32>} : memref<32x128xbf16, #tpu.memory_space<vmem>>, vector<32x128xbf16>,
      %60 = arith.truncf %57 : vector<32x128xf32> to vector<32x128xbf16>
      %c0_38 = arith.constant 0 : index
      %c0_39 = arith.constant 0 : index
      %61 = vector.load %arg10[%c0_38, %c0_39] : memref<32x128xbf16, #tpu.memory_space<vmem>>, vector<32x128xbf16>
      tpu.vector_store %arg10[%c0_38, %c0_39], %60 {strides = array<i32>} : memref<32x128xbf16, #tpu.memory_space<vmem>>, vector<32x128xbf16>,
    } else {
    }
    return
  }
  func.func @transform_0(%arg0: i32, %arg1: i32, %arg2: i32) -> (i32, i32) {
    %c0_i32 = arith.constant 0 : i32
    return %arg0, %arg2 : i32, i32
  }
  func.func @transform_1(%arg0: i32, %arg1: i32, %arg2: i32) -> (i32, i32) {
    %c0_i32 = arith.constant 0 : i32
    return %arg0, %arg2 : i32, i32
  }
  func.func @transform_2(%arg0: i32, %arg1: i32, %arg2: i32) -> (i32, i32) {
    %c0_i32 = arith.constant 0 : i32
    return %arg2, %arg1 : i32, i32
  }
  func.func @transform_3(%arg0: i32, %arg1: i32, %arg2: i32) -> (i32, i32) {
    %c0_i32 = arith.constant 0 : i32
    return %arg2, %arg1 : i32, i32
  }
  func.func @transform_4(%arg0: i32, %arg1: i32, %arg2: i32) -> (i32, i32) {
    %c0_i32 = arith.constant 0 : i32
    %c0_i32_0 = arith.constant 0 : i32
    return %c0_i32, %arg1 : i32, i32
  }
  func.func @transform_5(%arg0: i32, %arg1: i32, %arg2: i32) -> (i32, i32) {
    %c0_i32 = arith.constant 0 : i32
    %c0_i32_0 = arith.constant 0 : i32
    return %c0_i32, %arg1 : i32, i32
  }
  func.func @transform_6(%arg0: i32, %arg1: i32, %arg2: i32) -> (i32, i32) {
    %c0_i32 = arith.constant 0 : i32
    return %arg0, %arg1 : i32, i32
  }
  func.func @transform_7(%arg0: i32, %arg1: i32, %arg2: i32) -> (i32, i32) {
    %c0_i32 = arith.constant 0 : i32
    return %arg0, %arg1 : i32, i32
  }
}

module attributes {stable_mosaic.version = 11 : i64} {
  func.func @_cmatmul_kernel(%arg0: i32, %arg1: i32, %arg2: i32, %arg3: memref<32x128xbf16, #tpu.memory_space<vmem>>, %arg4: memref<32x128xbf16, #tpu.memory_space<vmem>>, %arg5: memref<128x32xbf16, #tpu.memory_space<vmem>>, %arg6: memref<128x32xbf16, #tpu.memory_space<vmem>>, %arg7: memref<1x32xf32, #tpu.memory_space<vmem>>, %arg8: memref<1x32xf32, #tpu.memory_space<vmem>>, %arg9: memref<32x32xbf16, #tpu.memory_space<vmem>>, %arg10: memref<32x32xbf16, #tpu.memory_space<vmem>>, %arg11: memref<32x32xf32, #tpu.memory_space<vmem>>, %arg12: memref<32x32xf32, #tpu.memory_space<vmem>>) attributes {dimension_semantics = [#tpu.dimension_semantics<parallel>, #tpu.dimension_semantics<parallel>, #tpu.dimension_semantics<arbitrary>], iteration_bounds = array<i64: 1, 1, 1>, scalar_prefetch = 0 : i64, scratch_operands = 2 : i64, tpu.core_type = #tpu.core_type<tc>, window_params = [{transform_indices = @transform_0, window_bounds = array<i64: 32, 128>}, {transform_indices = @transform_1, window_bounds = array<i64: 32, 128>}, {transform_indices = @transform_2, window_bounds = array<i64: 128, 32>}, {transform_indices = @transform_3, window_bounds = array<i64: 128, 32>}, {transform_indices = @transform_4, window_bounds = array<i64: 1, 32>}, {transform_indices = @transform_5, window_bounds = array<i64: 1, 32>}, {transform_indices = @transform_6, window_bounds = array<i64: 32, 32>}, {transform_indices = @transform_7, window_bounds = array<i64: 32, 32>}]} {
    %c0_i32 = arith.constant 0 : i32
    %0 = arith.cmpi eq, %arg2, %c0_i32 : i32
    %1 = arith.extui %0 : i1 to i32
    %c0_i32_0 = arith.constant 0 : i32
    %2 = arith.cmpi ne, %1, %c0_i32_0 : i32
    scf.if %2 {
      %cst_20 = arith.constant 0.000000e+00 : f32
      %24 = vector.broadcast %cst_20 : f32 to vector<32x32xf32>
      %c0_21 = arith.constant 0 : index
      %c0_22 = arith.constant 0 : index
      %25 = vector.load %arg11[%c0_21, %c0_22] : memref<32x32xf32, #tpu.memory_space<vmem>>, vector<32x32xf32>
      tpu.vector_store %arg11[%c0_21, %c0_22], %24 {strides = array<i32>} : memref<32x32xf32, #tpu.memory_space<vmem>>, vector<32x32xf32>,
      %cst_23 = arith.constant 0.000000e+00 : f32
      %26 = vector.broadcast %cst_23 : f32 to vector<32x32xf32>
      %c0_24 = arith.constant 0 : index
      %c0_25 = arith.constant 0 : index
      %27 = vector.load %arg12[%c0_24, %c0_25] : memref<32x32xf32, #tpu.memory_space<vmem>>, vector<32x32xf32>
      tpu.vector_store %arg12[%c0_24, %c0_25], %26 {strides = array<i32>} : memref<32x32xf32, #tpu.memory_space<vmem>>, vector<32x32xf32>,
    } else {
    }
    %c0 = arith.constant 0 : index
    %c0_1 = arith.constant 0 : index
    %3 = vector.load %arg3[%c0, %c0_1] : memref<32x128xbf16, #tpu.memory_space<vmem>>, vector<32x128xbf16>
    %c0_2 = arith.constant 0 : index
    %c0_3 = arith.constant 0 : index
    %4 = vector.load %arg4[%c0_2, %c0_3] : memref<32x128xbf16, #tpu.memory_space<vmem>>, vector<32x128xbf16>
    %c0_4 = arith.constant 0 : index
    %c0_5 = arith.constant 0 : index
    %5 = vector.load %arg5[%c0_4, %c0_5] : memref<128x32xbf16, #tpu.memory_space<vmem>>, vector<128x32xbf16>
    %c0_6 = arith.constant 0 : index
    %c0_7 = arith.constant 0 : index
    %6 = vector.load %arg6[%c0_6, %c0_7] : memref<128x32xbf16, #tpu.memory_space<vmem>>, vector<128x32xbf16>
    %7 = arith.addf %3, %4 : vector<32x128xbf16>
    %8 = arith.addf %5, %6 : vector<128x32xbf16>
    %cst = arith.constant dense<0.000000e+00> : vector<32x32xf32>
    %9 = tpu.matmul %3, %5, %cst {dimension_numbers = #tpu.dot_dimension_numbers<[1], [0], [0], [1], [0, 0, 1, 1], [], []>} : vector<32x128xbf16>, vector<128x32xbf16>, vector<32x32xf32> -> vector<32x32xf32>
    %cst_8 = arith.constant dense<0.000000e+00> : vector<32x32xf32>
    %10 = tpu.matmul %4, %6, %cst_8 {dimension_numbers = #tpu.dot_dimension_numbers<[1], [0], [0], [1], [0, 0, 1, 1], [], []>} : vector<32x128xbf16>, vector<128x32xbf16>, vector<32x32xf32> -> vector<32x32xf32>
    %cst_9 = arith.constant dense<0.000000e+00> : vector<32x32xf32>
    %11 = tpu.matmul %7, %8, %cst_9 {dimension_numbers = #tpu.dot_dimension_numbers<[1], [0], [0], [1], [0, 0, 1, 1], [], []>} : vector<32x128xbf16>, vector<128x32xbf16>, vector<32x32xf32> -> vector<32x32xf32>
    %c0_10 = arith.constant 0 : index
    %c0_11 = arith.constant 0 : index
    %12 = vector.load %arg11[%c0_10, %c0_11] : memref<32x32xf32, #tpu.memory_space<vmem>>, vector<32x32xf32>
    %13 = arith.subf %9, %10 : vector<32x32xf32>
    %14 = arith.addf %12, %13 : vector<32x32xf32>
    %c0_12 = arith.constant 0 : index
    %c0_13 = arith.constant 0 : index
    %15 = vector.load %arg11[%c0_12, %c0_13] : memref<32x32xf32, #tpu.memory_space<vmem>>, vector<32x32xf32>
    tpu.vector_store %arg11[%c0_12, %c0_13], %14 {strides = array<i32>} : memref<32x32xf32, #tpu.memory_space<vmem>>, vector<32x32xf32>,
    %c0_14 = arith.constant 0 : index
    %c0_15 = arith.constant 0 : index
    %16 = vector.load %arg12[%c0_14, %c0_15] : memref<32x32xf32, #tpu.memory_space<vmem>>, vector<32x32xf32>
    %17 = arith.subf %11, %9 : vector<32x32xf32>
    %18 = arith.subf %17, %10 : vector<32x32xf32>
    %19 = arith.addf %16, %18 : vector<32x32xf32>
    %c0_16 = arith.constant 0 : index
    %c0_17 = arith.constant 0 : index
    %20 = vector.load %arg12[%c0_16, %c0_17] : memref<32x32xf32, #tpu.memory_space<vmem>>, vector<32x32xf32>
    tpu.vector_store %arg12[%c0_16, %c0_17], %19 {strides = array<i32>} : memref<32x32xf32, #tpu.memory_space<vmem>>, vector<32x32xf32>,
    %c0_i32_18 = arith.constant 0 : i32
    %21 = arith.cmpi eq, %arg2, %c0_i32_18 : i32
    %22 = arith.extui %21 : i1 to i32
    %c0_i32_19 = arith.constant 0 : i32
    %23 = arith.cmpi ne, %22, %c0_i32_19 : i32
    scf.if %23 {
      %c0_20 = arith.constant 0 : index
      %c0_21 = arith.constant 0 : index
      %24 = vector.load %arg11[%c0_20, %c0_21] : memref<32x32xf32, #tpu.memory_space<vmem>>, vector<32x32xf32>
      %c0_22 = arith.constant 0 : index
      %c0_23 = arith.constant 0 : index
      %25 = vector.load %arg7[%c0_22, %c0_23] : memref<1x32xf32, #tpu.memory_space<vmem>>, vector<1x32xf32>
      %26 = vector.broadcast %25 : vector<1x32xf32> to vector<32x32xf32>
      %27 = arith.addf %24, %26 : vector<32x32xf32>
      %c0_24 = arith.constant 0 : index
      %c0_25 = arith.constant 0 : index
      %28 = vector.load %arg12[%c0_24, %c0_25] : memref<32x32xf32, #tpu.memory_space<vmem>>, vector<32x32xf32>
      %c0_26 = arith.constant 0 : index
      %c0_27 = arith.constant 0 : index
      %29 = vector.load %arg8[%c0_26, %c0_27] : memref<1x32xf32, #tpu.memory_space<vmem>>, vector<1x32xf32>
      %30 = vector.broadcast %29 : vector<1x32xf32> to vector<32x32xf32>
      %31 = arith.addf %28, %30 : vector<32x32xf32>
      %32 = arith.truncf %27 : vector<32x32xf32> to vector<32x32xbf16>
      %c0_28 = arith.constant 0 : index
      %c0_29 = arith.constant 0 : index
      %33 = vector.load %arg9[%c0_28, %c0_29] : memref<32x32xbf16, #tpu.memory_space<vmem>>, vector<32x32xbf16>
      tpu.vector_store %arg9[%c0_28, %c0_29], %32 {strides = array<i32>} : memref<32x32xbf16, #tpu.memory_space<vmem>>, vector<32x32xbf16>,
      %34 = arith.truncf %31 : vector<32x32xf32> to vector<32x32xbf16>
      %c0_30 = arith.constant 0 : index
      %c0_31 = arith.constant 0 : index
      %35 = vector.load %arg10[%c0_30, %c0_31] : memref<32x32xbf16, #tpu.memory_space<vmem>>, vector<32x32xbf16>
      tpu.vector_store %arg10[%c0_30, %c0_31], %34 {strides = array<i32>} : memref<32x32xbf16, #tpu.memory_space<vmem>>, vector<32x32xbf16>,
    } else {
    }
    return
  }
  func.func @transform_0(%arg0: i32, %arg1: i32, %arg2: i32) -> (i32, i32) {
    %c0_i32 = arith.constant 0 : i32
    return %arg0, %arg2 : i32, i32
  }
  func.func @transform_1(%arg0: i32, %arg1: i32, %arg2: i32) -> (i32, i32) {
    %c0_i32 = arith.constant 0 : i32
    return %arg0, %arg2 : i32, i32
  }
  func.func @transform_2(%arg0: i32, %arg1: i32, %arg2: i32) -> (i32, i32) {
    %c0_i32 = arith.constant 0 : i32
    return %arg2, %arg1 : i32, i32
  }
  func.func @transform_3(%arg0: i32, %arg1: i32, %arg2: i32) -> (i32, i32) {
    %c0_i32 = arith.constant 0 : i32
    return %arg2, %arg1 : i32, i32
  }
  func.func @transform_4(%arg0: i32, %arg1: i32, %arg2: i32) -> (i32, i32) {
    %c0_i32 = arith.constant 0 : i32
    %c0_i32_0 = arith.constant 0 : i32
    return %c0_i32, %arg1 : i32, i32
  }
  func.func @transform_5(%arg0: i32, %arg1: i32, %arg2: i32) -> (i32, i32) {
    %c0_i32 = arith.constant 0 : i32
    %c0_i32_0 = arith.constant 0 : i32
    return %c0_i32, %arg1 : i32, i32
  }
  func.func @transform_6(%arg0: i32, %arg1: i32, %arg2: i32) -> (i32, i32) {
    %c0_i32 = arith.constant 0 : i32
    return %arg0, %arg1 : i32, i32
  }
  func.func @transform_7(%arg0: i32, %arg1: i32, %arg2: i32) -> (i32, i32) {
    %c0_i32 = arith.constant 0 : i32
    return %arg0, %arg1 : i32, i32
  }
}

module attributes {stable_mosaic.version = 11 : i64} {
  func.func @_head_kernel(%arg0: i32, %arg1: i32, %arg2: memref<2x16x32xbf16, #tpu.memory_space<vmem>>, %arg3: memref<2x16x32xbf16, #tpu.memory_space<vmem>>, %arg4: memref<32x128xbf16, #tpu.memory_space<vmem>>, %arg5: memref<32x128xbf16, #tpu.memory_space<vmem>>, %arg6: memref<1x128xf32, #tpu.memory_space<vmem>>, %arg7: memref<1x128xf32, #tpu.memory_space<vmem>>, %arg8: memref<2x128xf32, #tpu.memory_space<vmem>>, %arg9: memref<2x32xf32, #tpu.memory_space<vmem>>, %arg10: memref<2x32xf32, #tpu.memory_space<vmem>>) attributes {dimension_semantics = [#tpu.dimension_semantics<parallel>, #tpu.dimension_semantics<arbitrary>], iteration_bounds = array<i64: 1, 1>, scalar_prefetch = 0 : i64, scratch_operands = 2 : i64, tpu.core_type = #tpu.core_type<tc>, window_params = [{transform_indices = @transform_0, window_bounds = array<i64: 2, 16, 32>}, {transform_indices = @transform_1, window_bounds = array<i64: 2, 16, 32>}, {pipeline_mode = #tpu.pipeline_mode<synchronous>, transform_indices = @transform_2, window_bounds = array<i64: 32, 128>}, {pipeline_mode = #tpu.pipeline_mode<synchronous>, transform_indices = @transform_3, window_bounds = array<i64: 32, 128>}, {pipeline_mode = #tpu.pipeline_mode<synchronous>, transform_indices = @transform_4, window_bounds = array<i64: 1, 128>}, {pipeline_mode = #tpu.pipeline_mode<synchronous>, transform_indices = @transform_5, window_bounds = array<i64: 1, 128>}, {transform_indices = @transform_6, window_bounds = array<i64: 2, 128>}]} {
    %c0_i32 = arith.constant 0 : i32
    %0 = arith.cmpi eq, %arg1, %c0_i32 : i32
    %1 = arith.extui %0 : i1 to i32
    %c0_i32_0 = arith.constant 0 : i32
    %2 = arith.cmpi ne, %1, %c0_i32_0 : i32
    scf.if %2 {
      %cst_17 = arith.constant 0.000000e+00 : f32
      %18 = vector.broadcast %cst_17 : f32 to vector<2x32xf32>
      %c0_18 = arith.constant 0 : index
      %c0_19 = arith.constant 0 : index
      %19 = vector.load %arg9[%c0_18, %c0_19] : memref<2x32xf32, #tpu.memory_space<vmem>>, vector<2x32xf32>
      tpu.vector_store %arg9[%c0_18, %c0_19], %18 {strides = array<i32>} : memref<2x32xf32, #tpu.memory_space<vmem>>, vector<2x32xf32>,
      %cst_20 = arith.constant 0.000000e+00 : f32
      %20 = vector.broadcast %cst_20 : f32 to vector<2x32xf32>
      %c0_21 = arith.constant 0 : index
      %c0_22 = arith.constant 0 : index
      %21 = vector.load %arg10[%c0_21, %c0_22] : memref<2x32xf32, #tpu.memory_space<vmem>>, vector<2x32xf32>
      tpu.vector_store %arg10[%c0_21, %c0_22], %20 {strides = array<i32>} : memref<2x32xf32, #tpu.memory_space<vmem>>, vector<2x32xf32>,
    } else {
    }
    %c0 = arith.constant 0 : index
    %c0_1 = arith.constant 0 : index
    %3 = vector.load %arg9[%c0, %c0_1] : memref<2x32xf32, #tpu.memory_space<vmem>>, vector<2x32xf32>
    %c0_2 = arith.constant 0 : index
    %c0_3 = arith.constant 0 : index
    %c0_4 = arith.constant 0 : index
    %4 = vector.load %arg2[%c0_2, %c0_3, %c0_4] : memref<2x16x32xbf16, #tpu.memory_space<vmem>>, vector<2x16x32xbf16>
    %5 = arith.extf %4 : vector<2x16x32xbf16> to vector<2x16x32xf32>
    %cst = arith.constant dense<0.000000e+00> : vector<2x32xf32>
    %6 = vector.multi_reduction <add>, %5, %cst [1] : vector<2x16x32xf32> to vector<2x32xf32>
    %7 = arith.addf %3, %6 : vector<2x32xf32>
    %c0_5 = arith.constant 0 : index
    %c0_6 = arith.constant 0 : index
    %8 = vector.load %arg9[%c0_5, %c0_6] : memref<2x32xf32, #tpu.memory_space<vmem>>, vector<2x32xf32>
    tpu.vector_store %arg9[%c0_5, %c0_6], %7 {strides = array<i32>} : memref<2x32xf32, #tpu.memory_space<vmem>>, vector<2x32xf32>,
    %c0_7 = arith.constant 0 : index
    %c0_8 = arith.constant 0 : index
    %9 = vector.load %arg10[%c0_7, %c0_8] : memref<2x32xf32, #tpu.memory_space<vmem>>, vector<2x32xf32>
    %c0_9 = arith.constant 0 : index
    %c0_10 = arith.constant 0 : index
    %c0_11 = arith.constant 0 : index
    %10 = vector.load %arg3[%c0_9, %c0_10, %c0_11] : memref<2x16x32xbf16, #tpu.memory_space<vmem>>, vector<2x16x32xbf16>
    %11 = arith.extf %10 : vector<2x16x32xbf16> to vector<2x16x32xf32>
    %cst_12 = arith.constant dense<0.000000e+00> : vector<2x32xf32>
    %12 = vector.multi_reduction <add>, %11, %cst_12 [1] : vector<2x16x32xf32> to vector<2x32xf32>
    %13 = arith.addf %9, %12 : vector<2x32xf32>
    %c0_13 = arith.constant 0 : index
    %c0_14 = arith.constant 0 : index
    %14 = vector.load %arg10[%c0_13, %c0_14] : memref<2x32xf32, #tpu.memory_space<vmem>>, vector<2x32xf32>
    tpu.vector_store %arg10[%c0_13, %c0_14], %13 {strides = array<i32>} : memref<2x32xf32, #tpu.memory_space<vmem>>, vector<2x32xf32>,
    %c0_i32_15 = arith.constant 0 : i32
    %15 = arith.cmpi eq, %arg1, %c0_i32_15 : i32
    %16 = arith.extui %15 : i1 to i32
    %c0_i32_16 = arith.constant 0 : i32
    %17 = arith.cmpi ne, %16, %c0_i32_16 : i32
    scf.if %17 {
      %c0_17 = arith.constant 0 : index
      %c0_18 = arith.constant 0 : index
      %18 = vector.load %arg9[%c0_17, %c0_18] : memref<2x32xf32, #tpu.memory_space<vmem>>, vector<2x32xf32>
      %cst_19 = arith.constant 6.250000e-02 : f32
      %19 = vector.broadcast %cst_19 : f32 to vector<2x32xf32>
      %20 = arith.mulf %18, %19 : vector<2x32xf32>
      %c0_20 = arith.constant 0 : index
      %c0_21 = arith.constant 0 : index
      %21 = vector.load %arg10[%c0_20, %c0_21] : memref<2x32xf32, #tpu.memory_space<vmem>>, vector<2x32xf32>
      %cst_22 = arith.constant 6.250000e-02 : f32
      %22 = vector.broadcast %cst_22 : f32 to vector<2x32xf32>
      %23 = arith.mulf %21, %22 : vector<2x32xf32>
      %24 = arith.truncf %20 : vector<2x32xf32> to vector<2x32xbf16>
      %25 = arith.truncf %23 : vector<2x32xf32> to vector<2x32xbf16>
      %26 = arith.addf %20, %23 : vector<2x32xf32>
      %27 = arith.truncf %26 : vector<2x32xf32> to vector<2x32xbf16>
      %c0_23 = arith.constant 0 : index
      %c0_24 = arith.constant 0 : index
      %28 = vector.load %arg4[%c0_23, %c0_24] : memref<32x128xbf16, #tpu.memory_space<vmem>>, vector<32x128xbf16>
      %c0_25 = arith.constant 0 : index
      %c0_26 = arith.constant 0 : index
      %29 = vector.load %arg5[%c0_25, %c0_26] : memref<32x128xbf16, #tpu.memory_space<vmem>>, vector<32x128xbf16>
      %cst_27 = arith.constant dense<0.000000e+00> : vector<2x128xf32>
      %30 = tpu.matmul %24, %28, %cst_27 {dimension_numbers = #tpu.dot_dimension_numbers<[1], [0], [0], [1], [0, 0, 1, 1], [], []>} : vector<2x32xbf16>, vector<32x128xbf16>, vector<2x128xf32> -> vector<2x128xf32>
      %cst_28 = arith.constant dense<0.000000e+00> : vector<2x128xf32>
      %31 = tpu.matmul %25, %29, %cst_28 {dimension_numbers = #tpu.dot_dimension_numbers<[1], [0], [0], [1], [0, 0, 1, 1], [], []>} : vector<2x32xbf16>, vector<32x128xbf16>, vector<2x128xf32> -> vector<2x128xf32>
      %32 = arith.addf %28, %29 : vector<32x128xbf16>
      %cst_29 = arith.constant dense<0.000000e+00> : vector<2x128xf32>
      %33 = tpu.matmul %27, %32, %cst_29 {dimension_numbers = #tpu.dot_dimension_numbers<[1], [0], [0], [1], [0, 0, 1, 1], [], []>} : vector<2x32xbf16>, vector<32x128xbf16>, vector<2x128xf32> -> vector<2x128xf32>
      %34 = arith.subf %30, %31 : vector<2x128xf32>
      %c0_30 = arith.constant 0 : index
      %c0_31 = arith.constant 0 : index
      %35 = vector.load %arg6[%c0_30, %c0_31] : memref<1x128xf32, #tpu.memory_space<vmem>>, vector<1x128xf32>
      %36 = vector.broadcast %35 : vector<1x128xf32> to vector<2x128xf32>
      %37 = arith.addf %34, %36 : vector<2x128xf32>
      %38 = arith.subf %33, %30 : vector<2x128xf32>
      %39 = arith.subf %38, %31 : vector<2x128xf32>
      %c0_32 = arith.constant 0 : index
      %c0_33 = arith.constant 0 : index
      %40 = vector.load %arg7[%c0_32, %c0_33] : memref<1x128xf32, #tpu.memory_space<vmem>>, vector<1x128xf32>
      %41 = vector.broadcast %40 : vector<1x128xf32> to vector<2x128xf32>
      %42 = arith.addf %39, %41 : vector<2x128xf32>
      %43 = arith.mulf %37, %37 : vector<2x128xf32>
      %44 = arith.mulf %42, %42 : vector<2x128xf32>
      %45 = arith.addf %43, %44 : vector<2x128xf32>
      %46 = math.sqrt %45 : vector<2x128xf32>
      %c0_34 = arith.constant 0 : index
      %c0_35 = arith.constant 0 : index
      %47 = vector.load %arg8[%c0_34, %c0_35] : memref<2x128xf32, #tpu.memory_space<vmem>>, vector<2x128xf32>
      tpu.vector_store %arg8[%c0_34, %c0_35], %46 {strides = array<i32>} : memref<2x128xf32, #tpu.memory_space<vmem>>, vector<2x128xf32>,
    } else {
    }
    return
  }
  func.func @transform_0(%arg0: i32, %arg1: i32) -> (i32, i32, i32) {
    %c0_i32 = arith.constant 0 : i32
    %c0_i32_0 = arith.constant 0 : i32
    return %arg0, %arg1, %c0_i32 : i32, i32, i32
  }
  func.func @transform_1(%arg0: i32, %arg1: i32) -> (i32, i32, i32) {
    %c0_i32 = arith.constant 0 : i32
    %c0_i32_0 = arith.constant 0 : i32
    return %arg0, %arg1, %c0_i32 : i32, i32, i32
  }
  func.func @transform_2(%arg0: i32, %arg1: i32) -> (i32, i32) {
    %c0_i32 = arith.constant 0 : i32
    %c0_i32_0 = arith.constant 0 : i32
    %c0_i32_1 = arith.constant 0 : i32
    return %c0_i32, %c0_i32_0 : i32, i32
  }
  func.func @transform_3(%arg0: i32, %arg1: i32) -> (i32, i32) {
    %c0_i32 = arith.constant 0 : i32
    %c0_i32_0 = arith.constant 0 : i32
    %c0_i32_1 = arith.constant 0 : i32
    return %c0_i32, %c0_i32_0 : i32, i32
  }
  func.func @transform_4(%arg0: i32, %arg1: i32) -> (i32, i32) {
    %c0_i32 = arith.constant 0 : i32
    %c0_i32_0 = arith.constant 0 : i32
    %c0_i32_1 = arith.constant 0 : i32
    return %c0_i32, %c0_i32_0 : i32, i32
  }
  func.func @transform_5(%arg0: i32, %arg1: i32) -> (i32, i32) {
    %c0_i32 = arith.constant 0 : i32
    %c0_i32_0 = arith.constant 0 : i32
    %c0_i32_1 = arith.constant 0 : i32
    return %c0_i32, %c0_i32_0 : i32, i32
  }
  func.func @transform_6(%arg0: i32, %arg1: i32) -> (i32, i32) {
    %c0_i32 = arith.constant 0 : i32
    %c0_i32_0 = arith.constant 0 : i32
    return %arg0, %c0_i32 : i32, i32
  }
}

</mosaic_0001>

<bundles_post_ra>
// kernel: model_forward.12
= control target key start
LH: loop header
LB: loop body
LE: loop exit
PB: predicated region body
PF: predicated region fallthrough
CT: control target
= control target key end

     0   :  { %vm73_vm0 = vcmask 130048   ;;  %vm30_vm1 = vcmask 261120   ;;  %v408_v27 = vmov 0.0   ;;  %s545_s2 = inlined_call_operand.vmem [shape: bf16[16,32], index: 2, kind: input, shape index: {}]   ;;  %s546_s3 = inlined_call_operand.vmem [shape: bf16[16,32], index: 3, kind: input, shape index: {}]   ;;  %s547_s0 = inlined_call_operand.vmem [shape: bf16[32,16], index: 0, kind: input, shape index: {}]   ;;  %s548_s1 = inlined_call_operand.vmem [shape: bf16[32,16], index: 1, kind: input, shape index: {}]   ;;  %s549_s4 = inlined_call_operand.vmem [shape: f32[1,32], index: 4, kind: input, shape index: {}]   ;;  %s550_s6 = inlined_call_operand.vmem [shape: f32[32,32], index: 6, kind: output, shape index: {0}]   ;;  %s551_s5 = inlined_call_operand.vmem [shape: f32[1,32], index: 5, kind: input, shape index: {}]   ;;  %s552_s7 = inlined_call_operand.vmem [shape: f32[32,32], index: 7, kind: output, shape index: {1}]  }
   0x1   :  { %v47_v0 = vld [vmem:[%s545_s2] sm:$0xf]  ;;  %v48_v1 = vld [vmem:[%s545_s2 + $0x4] sm:$0xf]  ;;  %v41_v13 = vld [vmem:[%s547_s0 + $0x8] sm:$0xf] }
   0x2   :  { %v49_v2 = vld [vmem:[%s546_s3] sm:$0xf]  ;;  %v359_v3 = vcombine.low %v47_v0, %v48_v1  ;;  %v50_v4 = vld [vmem:[%s546_s3 + $0x4] sm:$0xf]  ;;  %v42_v17 = vld [vmem:[%s547_s0 + $0xc] sm:$0xf] }
   0x3   :  { %v55_v5 = vadd.bf16 %v49_v2, %v47_v0  ;;  %v39_v6 = vld [vmem:[%s547_s0] sm:$0xf]  ;;  %v40_v7 = vld [vmem:[%s547_s0 + $0x4] sm:$0xf]  ;;  %v56_v8 = vadd.bf16 %v50_v4, %v48_v1  ;;  %v364_v9 = vcombine.low %v49_v2, %v50_v4  ;;  %v45_v18 = vld [vmem:[%s548_s1 + $0x8] sm:$0xf]  ;;  %v358_v20 = vcombine.low %v41_v13, %v42_v17 }
   0x4   :  { %v357_v10 = vcombine.low %v39_v6, %v40_v7  ;;  %v43_v11 = vld [vmem:[%s548_s1] sm:$0xf]  ;;  %v44_v12 = vld [vmem:[%s548_s1 + $0x4] sm:$0xf]  ;;  %383 = vmatprep.subr.bf16.mxu0 %v359_v3  ;;  %v46_v19 = vld [vmem:[%s548_s1 + $0xc] sm:$0xf]  ;;  %v53_v24 = vadd.bf16 %v45_v18, %v41_v13 }
   0x5   :  { %v51_v14 = vadd.bf16 %v43_v11, %v39_v6  ;;  %v52_v15 = vadd.bf16 %v44_v12, %v40_v7  ;;  %v362_v16 = vcombine.low %v43_v11, %v44_v12  ;;  %389 = vmatprep.subr.bf16.mxu1 %v364_v9  ;;  %384 = vmatpush3.bf16.msra.mxu0 %v359_v3  ;;  %v372_v54 = vld [vmem:[%s549_s4] ss:$0 sm:$0xff] }
   0x6   :  { %390 = vmatpush3.bf16.msra.mxu1 %v364_v9  ;;  %385 = vmatprep.mubr.msk.bf16.mxu0 %vm73_vm0, %v357_v10  ;;  %v363_v22 = vcombine.low %v45_v18, %v46_v19  ;;  %v369_v23 = vcombine.low %v55_v5, %v56_v8  ;;  %v54_v25 = vadd.bf16 %v46_v19, %v42_v17  ;;  %v373_v13 = vld [vmem:[%s551_s5] ss:$0 sm:$0xff] }
   0x7   :  { %v367_v21 = vcombine.low %v51_v14, %v52_v15  ;;  %391 = vmatprep.mubr.msk.bf16.mxu1 %vm73_vm0, %v362_v16  ;;  %33 = vst.msk [vmem:[#allocation2 + $0x10] sm:$0xff] %vm30_vm1, %v408_v27  ;;  %31 = vst.msk [vmem:[#allocation2] sm:$0xff] %vm30_vm1, %v408_v27 }
   0x8   :  { %386 = vmatmul.mubr.msk.bf16.vlgmr.msra.gmra.mrb[0].mxu0 %vm73_vm0, %v358_v20  ;;  %395 = vmatprep.subr.bf16.mxu0 %v369_v23  ;;  %v368_v26 = vcombine.low %v53_v24, %v54_v25  ;;  %32 = vst.msk [vmem:[#allocation2 + $0x8] sm:$0xff] %vm30_vm1, %v408_v27  ;;  %34 = vst.msk [vmem:[#allocation2 + $0x18] sm:$0xff] %vm30_vm1, %v408_v27 }
   0x9   :  { %392 = vmatmul.mubr.msk.bf16.vlgmr.msra.gmra.mrb[0].mxu1 %vm73_vm0, %v363_v22  ;;  %396 = vmatpush3.bf16.msra.mxu0 %v369_v23  ;;  %35 = vst.msk [vmem:[#allocation3] sm:$0xff] %vm30_vm1, %v408_v27  ;;  %36 = vst.msk [vmem:[#allocation3 + $0x8] sm:$0xff] %vm30_vm1, %v408_v27 }
   0xa   :  { %397 = vmatprep.mubr.msk.bf16.mxu0 %vm73_vm0, %v367_v21  ;;  %37 = vst.msk [vmem:[#allocation3 + $0x10] sm:$0xff] %vm30_vm1, %v408_v27  ;;  %38 = vst.msk [vmem:[#allocation3 + $0x18] sm:$0xff] %vm30_vm1, %v408_v27 }
   0xe   :  { %v273_v30 = vld [vmem:[#allocation2 + $0x10] sm:$0xff]  ;;  %v271_v34 = vld [vmem:[#allocation2] sm:$0xff] }
   0xf   :  { %v274_v38 = vld [vmem:[#allocation2 + $0x18] sm:$0xff]  ;;  %v272_v43 = vld [vmem:[#allocation2 + $0x8] sm:$0xff] }
  0x10   :  { %398 = vmatmul.mubr.msk.bf16.vlgmr.msra.gmra.mrb[4].mxu0 %vm73_vm0, %v368_v26  ;;  %v288_v56 = vld [vmem:[#allocation3] sm:$0xff]  ;;  %v289_v1 = vld [vmem:[#allocation3 + $0x8] sm:$0xff] }
  0x11   :  { %v290_v51 = vld [vmem:[#allocation3 + $0x10] sm:$0xff]  ;;  %v291_v60 = vld [vmem:[#allocation3 + $0x18] sm:$0xff] }
  0xdb   :  { %v387_v28 = vpop.f32.mrb[0].mxu0 }
  0xdc   :  { %v393_v29 = vpop.f32.mrb[0].mxu1  ;;  %v114_v31 = vpop.f32.mrb[1].mxu0 }
  0xdd   :  { %v277_v32 = vsub.f32 %v387_v28, %v393_v29  ;;  %v185_v33 = vpop.f32.mrb[1].mxu1  ;;  %v388_v35 = vpop.f32.mrb[2].mxu0 }
  0xde   :  { %v275_v36 = vsub.f32 %v114_v31, %v185_v33  ;;  %v394_v37 = vpop.f32.mrb[2].mxu1  ;;  %v117_v39 = vpop.f32.mrb[3].mxu0 }
  0xdf   :  { %v281_v40 = vadd.f32 %v277_v32, %v273_v30  ;;  %v278_v41 = vsub.f32 %v388_v35, %v394_v37  ;;  %v188_v42 = vpop.f32.mrb[3].mxu1 }
  0xe0   :  { %v279_v44 = vadd.f32 %v275_v36, %v271_v34  ;;  %v276_v45 = vsub.f32 %v117_v39, %v188_v42 }
  0xe1   :  { %286 = vst.msk [vmem:[#allocation2 + $0x10] sm:$0xff] %vm30_vm1, %v281_v40  ;;  %v282_v46 = vadd.f32 %v278_v41, %v274_v38 }
  0xe2   :  { %284 = vst.msk [vmem:[#allocation2] sm:$0xff] %vm30_vm1, %v279_v44  ;;  %v280_v47 = vadd.f32 %v276_v45, %v272_v43 }
  0xe3   :  { %287 = vst.msk [vmem:[#allocation2 + $0x18] sm:$0xff] %vm30_vm1, %v282_v46  ;;  %v399_v48 = vpop.f32.mrb[4].mxu0 }
  0xe4   :  { %285 = vst.msk [vmem:[#allocation2 + $0x8] sm:$0xff] %vm30_vm1, %v280_v47  ;;  %v294_v49 = vsub.f32 %v399_v48, %v387_v28  ;;  %v256_v50 = vpop.f32.mrb[5].mxu0 }
  0xe5   :  { %v292_v52 = vsub.f32 %v256_v50, %v114_v31  ;;  %v400_v53 = vpop.f32.mrb[6].mxu0 }
  0xe6   :  { %v298_v55 = vsub.f32 %v294_v49, %v393_v29  ;;  %v295_v57 = vsub.f32 %v400_v53, %v388_v35  ;;  %v259_v58 = vpop.f32.mrb[7].mxu0 }
  0xe7   :  { %v296_v59 = vsub.f32 %v292_v52, %v185_v33  ;;  %v293_v61 = vsub.f32 %v259_v58, %v117_v39 }
  0xe8   :  { %v313_v62 = vld [vmem:[#allocation2 + $0x10] sm:$0xff]  ;;  %v302_v63 = vadd.f32 %v298_v55, %v290_v51  ;;  %v299_v0 = vsub.f32 %v295_v57, %v394_v37 }
  0xe9   :  { %v324_v2 = vadd.f32 %v372_v54, %v313_v62  ;;  %v311_v3 = vld [vmem:[#allocation2] sm:$0xff]  ;;  %v300_v4 = vadd.f32 %v296_v59, %v288_v56  ;;  %v297_v5 = vsub.f32 %v293_v61, %v188_v42 }
  0xea   :  { %v322_v6 = vadd.f32 %v372_v54, %v311_v3  ;;  %v314_v7 = vld [vmem:[#allocation2 + $0x18] sm:$0xff]  ;;  %306 = vst.msk [vmem:[#allocation3 + $0x10] sm:$0xff] %vm30_vm1, %v302_v63  ;;  %v303_v8 = vadd.f32 %v299_v0, %v291_v60 }
  0xeb   :  { %343 = vst.msk [vmem:[%s550_s6 + $0x10] sm:$0xff] %vm30_vm1, %v324_v2  ;;  %v325_v9 = vadd.f32 %v372_v54, %v314_v7  ;;  %v312_v10 = vld [vmem:[#allocation2 + $0x8] sm:$0xff]  ;;  %304 = vst.msk [vmem:[#allocation3] sm:$0xff] %vm30_vm1, %v300_v4  ;;  %v301_v11 = vadd.f32 %v297_v5, %v289_v1 }
  0xec   :  { %341 = vst.msk [vmem:[%s550_s6] sm:$0xff] %vm30_vm1, %v322_v6  ;;  %v323_v12 = vadd.f32 %v372_v54, %v312_v10  ;;  %307 = vst.msk [vmem:[#allocation3 + $0x18] sm:$0xff] %vm30_vm1, %v303_v8 }
  0xed   :  { %344 = vst.msk [vmem:[%s550_s6 + $0x18] sm:$0xff] %vm30_vm1, %v325_v9  ;;  %305 = vst.msk [vmem:[#allocation3 + $0x8] sm:$0xff] %vm30_vm1, %v301_v11 }
  0xee   :  { %342 = vst.msk [vmem:[%s550_s6 + $0x8] sm:$0xff] %vm30_vm1, %v323_v12 }
  0xf1   :  { %v328_v14 = vld [vmem:[#allocation3 + $0x10] sm:$0xff] }
  0xf2   :  { %v339_v15 = vadd.f32 %v373_v13, %v328_v14  ;;  %v326_v16 = vld [vmem:[#allocation3] sm:$0xff] }
  0xf3   :  { %v337_v17 = vadd.f32 %v373_v13, %v326_v16  ;;  %v329_v18 = vld [vmem:[#allocation3 + $0x18] sm:$0xff] }
  0xf4   :  { %347 = vst.msk [vmem:[%s552_s7 + $0x10] sm:$0xff] %vm30_vm1, %v339_v15  ;;  %v340_v19 = vadd.f32 %v373_v13, %v329_v18  ;;  %v327_v20 = vld [vmem:[#allocation3 + $0x8] sm:$0xff] }
  0xf5   :  { %345 = vst.msk [vmem:[%s552_s7] sm:$0xff] %vm30_vm1, %v337_v17  ;;  %v338_v21 = vadd.f32 %v373_v13, %v327_v20 }
  0xf6   :  { %348 = vst.msk [vmem:[%s552_s7 + $0x18] sm:$0xff] %vm30_vm1, %v340_v19 }
  0xf7   :  { %346 = vst.msk [vmem:[%s552_s7 + $0x8] sm:$0xff] %vm30_vm1, %v338_v21 }

// kernel: model_forward.13
= control target key start
LH: loop header
LB: loop body
LE: loop exit
PB: predicated region body
PF: predicated region fallthrough
CT: control target
= control target key end

     0   :  { %vm85_vm0 = vcmask 261120   ;;  %vm30_vm1 = vcmask 785408   ;;  %v495_v36 = vmov 0.0   ;;  %vm381_vm2 = vcmask 781312   ;;  %s644_s2 = inlined_call_operand.vmem [shape: bf16[32,96], index: 2, kind: input, shape index: {}]   ;;  %s645_s3 = inlined_call_operand.vmem [shape: bf16[32,96], index: 3, kind: input, shape index: {}]   ;;  %s646_s0 = inlined_call_operand.vmem [shape: bf16[32,32], index: 0, kind: input, shape index: {}]   ;;  %s647_s1 = inlined_call_operand.vmem [shape: bf16[32,32], index: 1, kind: input, shape index: {}]   ;;  %s648_s4 = inlined_call_operand.vmem [shape: f32[1,96], index: 4, kind: input, shape index: {}]   ;;  %s649_s6 = inlined_call_operand.vmem [shape: bf16[32,96], index: 6, kind: output, shape index: {0}]   ;;  %s650_s5 = inlined_call_operand.vmem [shape: f32[1,96], index: 5, kind: input, shape index: {}]   ;;  %s651_s7 = inlined_call_operand.vmem [shape: bf16[32,96], index: 7, kind: output, shape index: {1}]  }
   0x1   :  { %v47_v0 = vld [vmem:[%s644_s2] sm:$0xf]  ;;  %v48_v1 = vld [vmem:[%s644_s2 + $0x4] sm:$0xf]  ;;  %v49_v5 = vld [vmem:[%s644_s2 + $0x8] sm:$0xf] }
   0x2   :  { %v51_v2 = vld [vmem:[%s645_s3] sm:$0xf]  ;;  %v416_v3 = vcombine.low %v47_v0, %v48_v1  ;;  %v52_v4 = vld [vmem:[%s645_s3 + $0x4] sm:$0xf]  ;;  %v50_v6 = vld [vmem:[%s644_s2 + $0xc] sm:$0xf] }
   0x3   :  { %v422_v7 = vcombine.low %v51_v2, %v52_v4  ;;  %v417_v8 = vcombine.low %v49_v5, %v50_v6  ;;  %v53_v9 = vld [vmem:[%s645_s3 + $0x8] sm:$0xf]  ;;  %v54_v10 = vld [vmem:[%s645_s3 + $0xc] sm:$0xf]  ;;  %v39_v11 = vld [vmem:[%s646_s0] sm:$0xf]  ;;  %v59_v12 = vadd.bf16 %v51_v2, %v47_v0  ;;  %v60_v13 = vadd.bf16 %v52_v4, %v48_v1 }
   0x4   :  { %462 = vmatprep.subr.bf16.mxu0 %v416_v3  ;;  %v423_v14 = vcombine.low %v53_v9, %v54_v10  ;;  %v40_v15 = vld [vmem:[%s646_s0 + $0x4] sm:$0xf]  ;;  %v43_v16 = vld [vmem:[%s647_s1] sm:$0xf]  ;;  %v41_v19 = vld [vmem:[%s646_s0 + $0x8] sm:$0xf]  ;;  %v61_v21 = vadd.bf16 %v53_v9, %v49_v5  ;;  %v62_v22 = vadd.bf16 %v54_v10, %v50_v6 }
   0x5   :  { %v44_v17 = vld [vmem:[%s647_s1 + $0x4] sm:$0xf]  ;;  %470 = vmatprep.subr.bf16.mxu1 %v422_v7  ;;  %463 = vmatpush3.bf16.msra.mxu0 %v416_v3  ;;  %v414_v18 = vcombine.low %v39_v11, %v40_v15  ;;  %v42_v20 = vld [vmem:[%s646_s0 + $0xc] sm:$0xf]  ;;  %v55_v23 = vadd.bf16 %v43_v16, %v39_v11  ;;  %v45_v26 = vld [vmem:[%s647_s1 + $0x8] sm:$0xf]  ;;  %v428_v29 = vcombine.low %v59_v12, %v60_v13 }
   0x6   :  { %471 = vmatpush3.bf16.msra.mxu1 %v422_v7  ;;  %464 = vmatprep.subr.bf16.mxu0 %v417_v8  ;;  %v56_v24 = vadd.bf16 %v44_v17, %v40_v15  ;;  %v420_v25 = vcombine.low %v43_v16, %v44_v17  ;;  %v46_v27 = vld [vmem:[%s647_s1 + $0xc] sm:$0xf]  ;;  %v415_v28 = vcombine.low %v41_v19, %v42_v20  ;;  %v432_v63 = vld [vmem:[%s648_s4] ss:$0 sm:$0xff] }
   0x7   :  { %472 = vmatprep.subr.bf16.mxu1 %v423_v14  ;;  %466 = vmatprep.mubr.msk.bf16.mxu0 %vm85_vm0, %v414_v18  ;;  %v421_v30 = vcombine.low %v45_v26, %v46_v27  ;;  %v429_v32 = vcombine.low %v61_v21, %v62_v22  ;;  %v57_v33 = vadd.bf16 %v45_v26, %v41_v19  ;;  %v433_v26 = vld [vmem:[%s650_s5] ss:$0 sm:$0xff] }
   0x8   :  { %474 = vmatprep.mubr.msk.bf16.mxu1 %vm85_vm0, %v420_v25  ;;  %v426_v31 = vcombine.low %v55_v23, %v56_v24  ;;  %v58_v34 = vadd.bf16 %v46_v27, %v42_v20  ;;  %33 = vst.msk [vmem:[#allocation2 + $0x10] sm:$0xff] %vm30_vm1, %v495_v36  ;;  %31 = vst.msk [vmem:[#allocation2] sm:$0xff] %vm30_vm1, %v495_v36 }
   0x9   :  { %465 = vmatpush3.bf16.msra.mxu0 %v417_v8  ;;  %32 = vst.msk [vmem:[#allocation2 + $0x8] sm:$0xff] %vm30_vm1, %v495_v36  ;;  %34 = vst.msk [vmem:[#allocation2 + $0x18] sm:$0xff] %vm30_vm1, %v495_v36 }
   0xa   :  { %473 = vmatpush3.bf16.msra.mxu1 %v423_v14  ;;  %478 = vmatprep.subr.bf16.mxu0 %v428_v29  ;;  %v427_v35 = vcombine.low %v57_v33, %v58_v34  ;;  %35 = vst.msk [vmem:[#allocation3] sm:$0xff] %vm30_vm1, %v495_v36  ;;  %36 = vst.msk [vmem:[#allocation3 + $0x8] sm:$0xff] %vm30_vm1, %v495_v36 }
   0xb   :  { %37 = vst.msk [vmem:[#allocation3 + $0x10] sm:$0xff] %vm30_vm1, %v495_v36  ;;  %38 = vst.msk [vmem:[#allocation3 + $0x18] sm:$0xff] %vm30_vm1, %v495_v36 }
   0xc   :  { %467 = vmatmul.mubr.msk.bf16.vlgmr.msra.gmra.mrb[0].mxu0 %vm85_vm0, %v415_v28 }
   0xd   :  { %475 = vmatmul.mubr.msk.bf16.vlgmr.msra.gmra.mrb[0].mxu1 %vm85_vm0, %v421_v30  ;;  %479 = vmatpush3.bf16.msra.mxu0 %v428_v29 }
   0xe   :  { %480 = vmatprep.subr.bf16.mxu0 %v429_v32  ;;  %482 = vmatprep.mubr.msk.bf16.mxu0 %vm85_vm0, %v426_v31 }
   0xf   :  { %v297_v39 = vld [vmem:[#allocation2 + $0x10] sm:$0xff]  ;;  %v295_v43 = vld [vmem:[#allocation2] sm:$0xff] }
  0x10   :  { %v298_v47 = vld [vmem:[#allocation2 + $0x18] sm:$0xff]  ;;  %v296_v52 = vld [vmem:[#allocation2 + $0x8] sm:$0xff] }
  0x11   :  { %481 = vmatpush3.bf16.msra.mxu0 %v429_v32  ;;  %v312_v1 = vld [vmem:[#allocation3] sm:$0xff]  ;;  %v313_v10 = vld [vmem:[#allocation3 + $0x8] sm:$0xff] }
  0x12   :  { %v314_v60 = vld [vmem:[#allocation3 + $0x10] sm:$0xff]  ;;  %v315_v5 = vld [vmem:[#allocation3 + $0x18] sm:$0xff] }
  0x14   :  { %483 = vmatmul.mubr.msk.bf16.vlgmr.msra.gmra.mrb[4].mxu0 %vm85_vm0, %v427_v35 }
  0xdf   :  { %v468_v37 = vpop.f32.mrb[0].mxu0 }
  0xe0   :  { %v476_v38 = vpop.f32.mrb[0].mxu1  ;;  %v126_v40 = vpop.f32.mrb[1].mxu0 }
  0xe1   :  { %v301_v41 = vsub.f32 %v468_v37, %v476_v38  ;;  %v203_v42 = vpop.f32.mrb[1].mxu1  ;;  %v469_v44 = vpop.f32.mrb[2].mxu0 }
  0xe2   :  { %v299_v45 = vsub.f32 %v126_v40, %v203_v42  ;;  %v477_v46 = vpop.f32.mrb[2].mxu1  ;;  %v129_v48 = vpop.f32.mrb[3].mxu0 }
  0xe3   :  { %v305_v49 = vadd.f32 %v301_v41, %v297_v39  ;;  %v302_v50 = vsub.f32 %v469_v44, %v477_v46  ;;  %v206_v51 = vpop.f32.mrb[3].mxu1 }
  0xe4   :  { %v303_v53 = vadd.f32 %v299_v45, %v295_v43  ;;  %v300_v54 = vsub.f32 %v129_v48, %v206_v51 }
  0xe5   :  { %310 = vst.msk [vmem:[#allocation2 + $0x10] sm:$0xff] %vm30_vm1, %v305_v49  ;;  %v306_v55 = vadd.f32 %v302_v50, %v298_v47 }
  0xe6   :  { %308 = vst.msk [vmem:[#allocation2] sm:$0xff] %vm30_vm1, %v303_v53  ;;  %v304_v56 = vadd.f32 %v300_v54, %v296_v52 }
  0xe7   :  { %311 = vst.msk [vmem:[#allocation2 + $0x18] sm:$0xff] %vm30_vm1, %v306_v55  ;;  %v484_v57 = vpop.f32.mrb[4].mxu0 }
  0xe8   :  { %309 = vst.msk [vmem:[#allocation2 + $0x8] sm:$0xff] %vm30_vm1, %v304_v56  ;;  %v318_v58 = vsub.f32 %v484_v57, %v468_v37  ;;  %v280_v59 = vpop.f32.mrb[5].mxu0 }
  0xe9   :  { %v316_v61 = vsub.f32 %v280_v59, %v126_v40  ;;  %v485_v62 = vpop.f32.mrb[6].mxu0 }
  0xea   :  { %v322_v0 = vsub.f32 %v318_v58, %v476_v38  ;;  %v319_v2 = vsub.f32 %v485_v62, %v469_v44  ;;  %v283_v3 = vpop.f32.mrb[7].mxu0 }
  0xeb   :  { %v320_v4 = vsub.f32 %v316_v61, %v203_v42  ;;  %v317_v6 = vsub.f32 %v283_v3, %v129_v48 }
  0xec   :  { %v337_v7 = vld [vmem:[#allocation2 + $0x10] sm:$0xff]  ;;  %v326_v8 = vadd.f32 %v322_v0, %v314_v60  ;;  %v323_v9 = vsub.f32 %v319_v2, %v477_v46 }
  0xed   :  { %v348_v11 = vadd.f32 %v432_v63, %v337_v7  ;;  %v335_v12 = vld [vmem:[#allocation2] sm:$0xff]  ;;  %v324_v13 = vadd.f32 %v320_v4, %v312_v1  ;;  %v321_v14 = vsub.f32 %v317_v6, %v206_v51 }
  0xee   :  { %v346_v15 = vadd.f32 %v432_v63, %v335_v12  ;;  %v338_v16 = vld [vmem:[#allocation2 + $0x18] sm:$0xff]  ;;  %330 = vst.msk [vmem:[#allocation3 + $0x10] sm:$0xff] %vm30_vm1, %v326_v8  ;;  %v327_v17 = vadd.f32 %v323_v9, %v315_v5 }
  0xef   :  { %v444_v18 = vpack.c.bf16 %v348_v11, %v348_v11  ;;  %v349_v19 = vadd.f32 %v432_v63, %v338_v16  ;;  %v336_v20 = vld [vmem:[#allocation2 + $0x8] sm:$0xff]  ;;  %328 = vst.msk [vmem:[#allocation3] sm:$0xff] %vm30_vm1, %v324_v13  ;;  %v325_v21 = vadd.f32 %v321_v14, %v313_v10 }
  0xf0   :  { %v442_v22 = vpack.c.bf16 %v346_v15, %v346_v15  ;;  %v347_v23 = vadd.f32 %v432_v63, %v336_v20  ;;  %331 = vst.msk [vmem:[#allocation3 + $0x18] sm:$0xff] %vm30_vm1, %v327_v17 }
  0xf1   :  { %384 = vst.msk [vmem:[%s649_s6 + $0x8] sm:$0xf] %vm381_vm2, %v444_v18  ;;  %v445_v24 = vpack.c.bf16 %v349_v19, %v349_v19 }
  0xf2   :  { %329 = vst.msk [vmem:[#allocation3 + $0x8] sm:$0xff] %vm30_vm1, %v325_v21  ;;  %v443_v25 = vpack.c.bf16 %v347_v23, %v347_v23 }
  0xf3   :  { %382 = vst.msk [vmem:[%s649_s6] sm:$0xf] %vm381_vm2, %v442_v22  ;;  %385 = vst.msk [vmem:[%s649_s6 + $0xc] sm:$0xf] %vm381_vm2, %v445_v24 }
  0xf4   :  { %383 = vst.msk [vmem:[%s649_s6 + $0x4] sm:$0xf] %vm381_vm2, %v443_v25 }
  0xf5   :  { %v352_v27 = vld [vmem:[#allocation3 + $0x10] sm:$0xff] }
  0xf6   :  { %v363_v28 = vadd.f32 %v433_v26, %v352_v27  ;;  %v350_v29 = vld [vmem:[#allocation3] sm:$0xff] }
  0xf7   :  { %v361_v30 = vadd.f32 %v433_v26, %v350_v29  ;;  %v353_v31 = vld [vmem:[#allocation3 + $0x18] sm:$0xff] }
  0xf8   :  { %v448_v32 = vpack.c.bf16 %v363_v28, %v363_v28  ;;  %v364_v33 = vadd.f32 %v433_v26, %v353_v31 }
  0xf9   :  { %v351_v34 = vld [vmem:[#allocation3 + $0x8] sm:$0xff]  ;;  %v446_v35 = vpack.c.bf16 %v361_v30, %v361_v30 }
  0xfa   :  { %v362_v36 = vadd.f32 %v433_v26, %v351_v34  ;;  %404 = vst.msk [vmem:[%s651_s7 + $0x8] sm:$0xf] %vm381_vm2, %v448_v32  ;;  %v449_v37 = vpack.c.bf16 %v364_v33, %v364_v33 }
  0xfb   :  { %402 = vst.msk [vmem:[%s651_s7] sm:$0xf] %vm381_vm2, %v446_v35 }
  0xfc   :  { %v447_v38 = vpack.c.bf16 %v362_v36, %v362_v36  ;;  %405 = vst.msk [vmem:[%s651_s7 + $0xc] sm:$0xf] %vm381_vm2, %v449_v37 }
  0xfe   :  { %403 = vst.msk [vmem:[%s651_s7 + $0x4] sm:$0xf] %vm381_vm2, %v447_v38 }

// kernel: model_forward.14
= control target key start
LH: loop header
LB: loop body
LE: loop exit
PB: predicated region body
PF: predicated region fallthrough
CT: control target
= control target key end

     0   :  { %s720_s12 = smov 0   ;;  %s722_s13 = smov 0   ;;  %s790_s0 = inlined_call_operand.vmem [shape: bf16[2,4,16,16], index: 0, kind: input, shape index: {}]   ;;  %s791_s1 = inlined_call_operand.vmem [shape: bf16[2,4,16,16], index: 1, kind: input, shape index: {}]   ;;  %s792_s2 = inlined_call_operand.vmem [shape: bf16[2,4,16,16], index: 2, kind: input, shape index: {}]   ;;  %s793_s3 = inlined_call_operand.vmem [shape: bf16[2,4,16,16], index: 3, kind: output, shape index: {}]  }
   0x1   :  { %s724_s14 = smov 0   ;;  %s726_s15 = smov 0  }
   0x2   :  { %s728_s16 = smov 0  }
   0x3 LB: > { %s22_s17 = sadd.s32 1, %s688_s14  ;;  %s25_s18 = sadd.s32 1, %s692_s15  ;;  %s696_s16 = sphi %s728_s16, %s13_s16   ;;  %s692_s15 = sphi %s726_s15, %s797_s15   ;;  %s688_s14 = sphi %s724_s14, %s796_s14   ;;  %s684_s13 = sphi %s722_s13, %s795_s13   ;;  %s680_s12 = sphi %s720_s12, %s794_s12  }
   0x4   : > { %p23_p0 = scmp.ge.s32.totalorder %s22_s17, 4  ;;  %p565_p1 = scmp.ge.s32.totalorder %s696_s16, 1 }
   0x5   : > { %p189_p2 = scmp.lt.s32.totalorder %s696_s16, 9 }
   0x6   : > { %s799_s17 = smov (%p23_p0, %s22_s17), 0  ;;  %s801_s18 = smov (!%p23_p0, %s25_s18), %s692_s15 }
   0x7   : > { %p190_p3 = pnand %p565_p1, %p189_p2  ;;  %p27_p4 = scmp.ge.s32.totalorder %s801_s18, 2 }
   0x8   : > { %p239_p5 = scmp.lt.s32.totalorder (!%p190_p3), %s684_s13, 1  ;;  %p241_p6 = scmp.lt.s32.totalorder (!%p190_p3), %s680_s12, 3  ;;  %v698_v0 = vmov (!%p190_p3), 0.0   ;;  %vm699_vm0 = vmmov (!%p190_p3), 0   ;;  %vm290_vm1 = vcmask (!%p190_p3), 130048   ;;  %vm421_vm2 = vcmask (!%p190_p3), 125952  }
   0x9   : > { %s803_s18 = smov (%p27_p4, %s801_s18), 0  ;;  %193 = sbr.rel (%p190_p3) target bundleno = 779 (0x30b), region = 32 }
   0xa   : > { %593 = vmatprep.subr.bf16.mxu0 (!%p190_p3), %v698_v0  ;;  %595 = vmatprep.mubr.msk.bf16.mxu0 (!%p190_p3), %vm699_vm0, %v698_v0 }
   0xb   : > { %599 = vmatprep.subr.bf16.mxu1 (!%p190_p3), %v698_v0  ;;  %601 = vmatprep.mubr.msk.bf16.mxu1 (!%p190_p3), %vm699_vm0, %v698_v0 }
  0x10   : > { %s805_s13 = smov (!%p239_p5, %s684_s13), 1  ;;  %s807_s12 = smov (!%p241_p6, %s680_s12), 3 }
  0x11   : > { %s567_s19 = sshll.u32 %s805_s13, 3  ;;  %s566_s20 = sshll.u32 %s807_s12, 1 }
  0x12   : > { %s245_s21 = sadd.s32 %s567_s19, %s566_s20 }
  0x13   : > { %s750_s22 = sshll.u32 %s245_s21, 2 }
  0x14   : > { %s256_s25 = scalar_lea.vmem %s791_s1, %s750_s22  ;;  %s247_s28 = scalar_lea.vmem %s790_s0, %s750_s22 }
  0x15   : > { %v647_v1 = vld [vmem:[%s256_s25] sm:$0xff]   ;;  %s265_s4 = scalar_lea.vmem %s792_s2, %s750_s22  ;;  %s274_s7 = scalar_lea.vmem %s793_s3, %s750_s22 }
  0x16   : > { %v295_v2 = vsel %vm290_vm1, %v647_v1, 0  ;;  %v648_v3 = vld [vmem:[%s247_s28] sm:$0xff]  }
  0x17   : > { %594 = vmatpush3.bf16.xpose.msra.mxu0 %v295_v2  ;;  %v649_v20 = vld [vmem:[%s265_s4] sm:$0xff]  }
  0x18   : > { %600 = vmatpush3.bf16.msra.mxu1 %v649_v20 }
  0x1e   : > { %596 = vmatmul.mubr.msk.bf16.vlgmr.msra.gmra.mrb[0].mxu0 %vm290_vm1, %v648_v3 }
  0xf1   : > { %v331_v4 = vpop.f32.mrb[0].mxu0 }
  0xf2   : > { %v597_v5 = vpop.f32.mrb[1].mxu0  ;;  %v338_v6 = vsel %vm290_vm1, %v331_v4, -inf }
  0xf3   : > { %339 = vmax.xlane.f32.xlu0 %v338_v6  ;;  %v334_v7 = vpop.f32.mrb[2].mxu0 }
  0xf4   : > { %v598_v8 = vpop.f32.mrb[3].mxu0  ;;  %v341_v9 = vsel %vm290_vm1, %v334_v7, -inf }
  0xf7   : > { %342 = vmax.xlane.f32.xlu0 %v341_v9 }
 0x180   : > { %v340_v10 = vpop.xlane.xlu0 %339 }
 0x181   : > { %v344_v11 = vsub.f32 %v331_v4, %v340_v10 }
 0x183   : > { %v346_v12 = vmul.f32 1.442695, %v344_v11 }
 0x184   : > { %v343_v13 = vpop.xlane.xlu0 %342 }
 0x185   : > { %650 = vpow2.f32 %v346_v12  ;;  %v345_v14 = vsub.f32 %v334_v7, %v343_v13 }
 0x187   : > { %v348_v15 = vmul.f32 1.442695, %v345_v14 }
 0x189   : > { %652 = vpow2.f32 %v348_v15 }
 0x18f   : > { %v651_v16 = vpop.eup %650 }
 0x190   : > { %v350_v17 = vsel %vm290_vm1, %v651_v16, 0.0 }
 0x191   : > { %351 = vadd.xlane.f32.xlu1 %v350_v17 }
 0x193   : > { %v653_v18 = vpop.eup %652 }
 0x194   : > { %v353_v19 = vsel %vm290_vm1, %v653_v18, 0.0 }
 0x195   : > { %354 = vadd.xlane.f32.xlu1 %v353_v19 }
 0x21e   : > { %v352_v21 = vpop.xlane.xlu1 %351 }
 0x21f   : > { %654 = vrcp.f32 %v352_v21 }
 0x222   : > { %v355_v22 = vpop.xlane.xlu1 %354 }
 0x223   : > { %656 = vrcp.f32 %v355_v22 }
 0x229   : > { %v655_v23 = vpop.eup %654 }
 0x22a   : > { %v358_v25 = vmul.f32 %v655_v23, %v651_v16 }
 0x22d   : > { %v657_v24 = vpop.eup %656 }
 0x22e   : > { %v359_v26 = vmul.f32 %v657_v24, %v653_v18 }
 0x230   : > { %v360_v27 = vpack.c.bf16 %v359_v26, %v358_v25 }
 0x232   : > { %602 = vmatmul.mubr.msk.bf16.vlgmr.msra.gmra.mrb[0].mxu1 %vm290_vm1, %v360_v27 }
 0x305   : > { %v406_v28 = vpop.f32.mrb[0].mxu1 }
 0x306   : > { %v587_v29 = vpack.c.bf16 %v406_v28, %v406_v28  ;;  %v603_v30 = vpop.f32.mrb[1].mxu1 }
 0x307   : > { %v409_v31 = vpop.f32.mrb[2].mxu1 }
 0x308   : > { %422 = vst.msk [vmem:[%s274_s7] sm:$0xf] %vm421_vm2, %v587_v29  ;;  %v588_v32 = vpack.c.bf16 %v409_v31, %v409_v31  ;;  %v604_v33 = vpop.f32.mrb[3].mxu1 }
 0x30a   : > { %423 = vst.msk [vmem:[%s274_s7 + $0x4] sm:$0xf] %vm421_vm2, %v588_v32 }
 0x30b PF: > { %s13_s16 = sadd.s32 1, %s696_s16   ;;  %s794_s12 = smov %s688_s14 }
 0x30c   : > { %p10_p7 = scmp.ge.s32.totalorder %s13_s16, 10   ;;  %s795_s13 = smov %s692_s15 }
 0x30d   : > { %s796_s14 = smov %s799_s17  ;;  %s797_s15 = smov %s803_s18 }
 0x30e   :  { %12 = sbr.rel (!%p10_p7) target bundleno = 3 (0x3), region = 68 }

// kernel: model_forward.15
= control target key start
LH: loop header
LB: loop body
LE: loop exit
PB: predicated region body
PF: predicated region fallthrough
CT: control target
= control target key end

     0   :  { %vm30_vm0 = vcmask 261120   ;;  %v494_v36 = vmov 0.0   ;;  %vm380_vm1 = vcmask 257024   ;;  %s643_s2 = inlined_call_operand.vmem [shape: bf16[32,32], index: 2, kind: input, shape index: {}]   ;;  %s644_s3 = inlined_call_operand.vmem [shape: bf16[32,32], index: 3, kind: input, shape index: {}]   ;;  %s645_s0 = inlined_call_operand.vmem [shape: bf16[32,32], index: 0, kind: input, shape index: {}]   ;;  %s646_s1 = inlined_call_operand.vmem [shape: bf16[32,32], index: 1, kind: input, shape index: {}]   ;;  %s647_s4 = inlined_call_operand.vmem [shape: f32[1,32], index: 4, kind: input, shape index: {}]   ;;  %s648_s6 = inlined_call_operand.vmem [shape: bf16[32,32], index: 6, kind: output, shape index: {0}]   ;;  %s649_s5 = inlined_call_operand.vmem [shape: f32[1,32], index: 5, kind: input, shape index: {}]   ;;  %s650_s7 = inlined_call_operand.vmem [shape: bf16[32,32], index: 7, kind: output, shape index: {1}]  }
   0x1   :  { %v47_v0 = vld [vmem:[%s643_s2] sm:$0xf]  ;;  %v48_v1 = vld [vmem:[%s643_s2 + $0x4] sm:$0xf]  ;;  %v49_v5 = vld [vmem:[%s643_s2 + $0x8] sm:$0xf] }
   0x2   :  { %v51_v2 = vld [vmem:[%s644_s3] sm:$0xf]  ;;  %v415_v3 = vcombine.low %v47_v0, %v48_v1  ;;  %v52_v4 = vld [vmem:[%s644_s3 + $0x4] sm:$0xf]  ;;  %v50_v6 = vld [vmem:[%s643_s2 + $0xc] sm:$0xf] }
   0x3   :  { %v421_v7 = vcombine.low %v51_v2, %v52_v4  ;;  %v416_v8 = vcombine.low %v49_v5, %v50_v6  ;;  %v53_v9 = vld [vmem:[%s644_s3 + $0x8] sm:$0xf]  ;;  %v54_v10 = vld [vmem:[%s644_s3 + $0xc] sm:$0xf]  ;;  %v39_v11 = vld [vmem:[%s645_s0] sm:$0xf]  ;;  %v59_v12 = vadd.bf16 %v51_v2, %v47_v0  ;;  %v60_v13 = vadd.bf16 %v52_v4, %v48_v1 }
   0x4   :  { %461 = vmatprep.subr.bf16.mxu0 %v415_v3  ;;  %v422_v14 = vcombine.low %v53_v9, %v54_v10  ;;  %v40_v15 = vld [vmem:[%s645_s0 + $0x4] sm:$0xf]  ;;  %v43_v16 = vld [vmem:[%s646_s1] sm:$0xf]  ;;  %v41_v19 = vld [vmem:[%s645_s0 + $0x8] sm:$0xf]  ;;  %v61_v21 = vadd.bf16 %v53_v9, %v49_v5  ;;  %v62_v22 = vadd.bf16 %v54_v10, %v50_v6 }
   0x5   :  { %v44_v17 = vld [vmem:[%s646_s1 + $0x4] sm:$0xf]  ;;  %469 = vmatprep.subr.bf16.mxu1 %v421_v7  ;;  %462 = vmatpush3.bf16.msra.mxu0 %v415_v3  ;;  %v413_v18 = vcombine.low %v39_v11, %v40_v15  ;;  %v42_v20 = vld [vmem:[%s645_s0 + $0xc] sm:$0xf]  ;;  %v55_v23 = vadd.bf16 %v43_v16, %v39_v11  ;;  %v45_v26 = vld [vmem:[%s646_s1 + $0x8] sm:$0xf]  ;;  %v427_v29 = vcombine.low %v59_v12, %v60_v13 }
   0x6   :  { %470 = vmatpush3.bf16.msra.mxu1 %v421_v7  ;;  %463 = vmatprep.subr.bf16.mxu0 %v416_v8  ;;  %v56_v24 = vadd.bf16 %v44_v17, %v40_v15  ;;  %v419_v25 = vcombine.low %v43_v16, %v44_v17  ;;  %v46_v27 = vld [vmem:[%s646_s1 + $0xc] sm:$0xf]  ;;  %v414_v28 = vcombine.low %v41_v19, %v42_v20  ;;  %v431_v63 = vld [vmem:[%s647_s4] ss:$0 sm:$0xff] }
   0x7   :  { %471 = vmatprep.subr.bf16.mxu1 %v422_v14  ;;  %465 = vmatprep.mubr.msk.bf16.mxu0 %vm30_vm0, %v413_v18  ;;  %v420_v30 = vcombine.low %v45_v26, %v46_v27  ;;  %v428_v32 = vcombine.low %v61_v21, %v62_v22  ;;  %v57_v33 = vadd.bf16 %v45_v26, %v41_v19  ;;  %v432_v26 = vld [vmem:[%s649_s5] ss:$0 sm:$0xff] }
   0x8   :  { %473 = vmatprep.mubr.msk.bf16.mxu1 %vm30_vm0, %v419_v25  ;;  %v425_v31 = vcombine.low %v55_v23, %v56_v24  ;;  %v58_v34 = vadd.bf16 %v46_v27, %v42_v20  ;;  %33 = vst.msk [vmem:[#allocation2 + $0x10] sm:$0xff] %vm30_vm0, %v494_v36  ;;  %31 = vst.msk [vmem:[#allocation2] sm:$0xff] %vm30_vm0, %v494_v36 }
   0x9   :  { %464 = vmatpush3.bf16.msra.mxu0 %v416_v8  ;;  %32 = vst.msk [vmem:[#allocation2 + $0x8] sm:$0xff] %vm30_vm0, %v494_v36  ;;  %34 = vst.msk [vmem:[#allocation2 + $0x18] sm:$0xff] %vm30_vm0, %v494_v36 }
   0xa   :  { %472 = vmatpush3.bf16.msra.mxu1 %v422_v14  ;;  %477 = vmatprep.subr.bf16.mxu0 %v427_v29  ;;  %v426_v35 = vcombine.low %v57_v33, %v58_v34  ;;  %35 = vst.msk [vmem:[#allocation3] sm:$0xff] %vm30_vm0, %v494_v36  ;;  %36 = vst.msk [vmem:[#allocation3 + $0x8] sm:$0xff] %vm30_vm0, %v494_v36 }
   0xb   :  { %37 = vst.msk [vmem:[#allocation3 + $0x10] sm:$0xff] %vm30_vm0, %v494_v36  ;;  %38 = vst.msk [vmem:[#allocation3 + $0x18] sm:$0xff] %vm30_vm0, %v494_v36 }
   0xc   :  { %466 = vmatmul.mubr.msk.bf16.vlgmr.msra.gmra.mrb[0].mxu0 %vm30_vm0, %v414_v28 }
   0xd   :  { %474 = vmatmul.mubr.msk.bf16.vlgmr.msra.gmra.mrb[0].mxu1 %vm30_vm0, %v420_v30  ;;  %478 = vmatpush3.bf16.msra.mxu0 %v427_v29 }
   0xe   :  { %479 = vmatprep.subr.bf16.mxu0 %v428_v32  ;;  %481 = vmatprep.mubr.msk.bf16.mxu0 %vm30_vm0, %v425_v31 }
   0xf   :  { %v297_v39 = vld [vmem:[#allocation2 + $0x10] sm:$0xff]  ;;  %v295_v43 = vld [vmem:[#allocation2] sm:$0xff] }
  0x10   :  { %v298_v47 = vld [vmem:[#allocation2 + $0x18] sm:$0xff]  ;;  %v296_v52 = vld [vmem:[#allocation2 + $0x8] sm:$0xff] }
  0x11   :  { %480 = vmatpush3.bf16.msra.mxu0 %v428_v32  ;;  %v311_v1 = vld [vmem:[#allocation3] sm:$0xff]  ;;  %v312_v10 = vld [vmem:[#allocation3 + $0x8] sm:$0xff] }
  0x12   :  { %v313_v60 = vld [vmem:[#allocation3 + $0x10] sm:$0xff]  ;;  %v314_v5 = vld [vmem:[#allocation3 + $0x18] sm:$0xff] }
  0x14   :  { %482 = vmatmul.mubr.msk.bf16.vlgmr.msra.gmra.mrb[4].mxu0 %vm30_vm0, %v426_v35 }
  0xdf   :  { %v467_v37 = vpop.f32.mrb[0].mxu0 }
  0xe0   :  { %v475_v38 = vpop.f32.mrb[0].mxu1  ;;  %v126_v40 = vpop.f32.mrb[1].mxu0 }
  0xe1   :  { %v301_v41 = vsub.f32 %v467_v37, %v475_v38  ;;  %v203_v42 = vpop.f32.mrb[1].mxu1  ;;  %v468_v44 = vpop.f32.mrb[2].mxu0 }
  0xe2   :  { %v299_v45 = vsub.f32 %v126_v40, %v203_v42  ;;  %v476_v46 = vpop.f32.mrb[2].mxu1  ;;  %v129_v48 = vpop.f32.mrb[3].mxu0 }
  0xe3   :  { %v305_v49 = vadd.f32 %v301_v41, %v297_v39  ;;  %v302_v50 = vsub.f32 %v468_v44, %v476_v46  ;;  %v206_v51 = vpop.f32.mrb[3].mxu1 }
  0xe4   :  { %v303_v53 = vadd.f32 %v299_v45, %v295_v43  ;;  %v300_v54 = vsub.f32 %v129_v48, %v206_v51 }
  0xe5   :  { %309 = vst.msk [vmem:[#allocation2 + $0x10] sm:$0xff] %vm30_vm0, %v305_v49  ;;  %v306_v55 = vadd.f32 %v302_v50, %v298_v47 }
  0xe6   :  { %307 = vst.msk [vmem:[#allocation2] sm:$0xff] %vm30_vm0, %v303_v53  ;;  %v304_v56 = vadd.f32 %v300_v54, %v296_v52 }
  0xe7   :  { %310 = vst.msk [vmem:[#allocation2 + $0x18] sm:$0xff] %vm30_vm0, %v306_v55  ;;  %v483_v57 = vpop.f32.mrb[4].mxu0 }
  0xe8   :  { %308 = vst.msk [vmem:[#allocation2 + $0x8] sm:$0xff] %vm30_vm0, %v304_v56  ;;  %v317_v58 = vsub.f32 %v483_v57, %v467_v37  ;;  %v280_v59 = vpop.f32.mrb[5].mxu0 }
  0xe9   :  { %v315_v61 = vsub.f32 %v280_v59, %v126_v40  ;;  %v484_v62 = vpop.f32.mrb[6].mxu0 }
  0xea   :  { %v321_v0 = vsub.f32 %v317_v58, %v475_v38  ;;  %v318_v2 = vsub.f32 %v484_v62, %v468_v44  ;;  %v283_v3 = vpop.f32.mrb[7].mxu0 }
  0xeb   :  { %v319_v4 = vsub.f32 %v315_v61, %v203_v42  ;;  %v316_v6 = vsub.f32 %v283_v3, %v129_v48 }
  0xec   :  { %v336_v7 = vld [vmem:[#allocation2 + $0x10] sm:$0xff]  ;;  %v325_v8 = vadd.f32 %v321_v0, %v313_v60  ;;  %v322_v9 = vsub.f32 %v318_v2, %v476_v46 }
  0xed   :  { %v347_v11 = vadd.f32 %v431_v63, %v336_v7  ;;  %v334_v12 = vld [vmem:[#allocation2] sm:$0xff]  ;;  %v323_v13 = vadd.f32 %v319_v4, %v311_v1  ;;  %v320_v14 = vsub.f32 %v316_v6, %v206_v51 }
  0xee   :  { %v345_v15 = vadd.f32 %v431_v63, %v334_v12  ;;  %v337_v16 = vld [vmem:[#allocation2 + $0x18] sm:$0xff]  ;;  %329 = vst.msk [vmem:[#allocation3 + $0x10] sm:$0xff] %vm30_vm0, %v325_v8  ;;  %v326_v17 = vadd.f32 %v322_v9, %v314_v5 }
  0xef   :  { %v443_v18 = vpack.c.bf16 %v347_v11, %v347_v11  ;;  %v348_v19 = vadd.f32 %v431_v63, %v337_v16  ;;  %v335_v20 = vld [vmem:[#allocation2 + $0x8] sm:$0xff]  ;;  %327 = vst.msk [vmem:[#allocation3] sm:$0xff] %vm30_vm0, %v323_v13  ;;  %v324_v21 = vadd.f32 %v320_v14, %v312_v10 }
  0xf0   :  { %v441_v22 = vpack.c.bf16 %v345_v15, %v345_v15  ;;  %v346_v23 = vadd.f32 %v431_v63, %v335_v20  ;;  %330 = vst.msk [vmem:[#allocation3 + $0x18] sm:$0xff] %vm30_vm0, %v326_v17 }
  0xf1   :  { %383 = vst.msk [vmem:[%s648_s6 + $0x8] sm:$0xf] %vm380_vm1, %v443_v18  ;;  %v444_v24 = vpack.c.bf16 %v348_v19, %v348_v19 }
  0xf2   :  { %328 = vst.msk [vmem:[#allocation3 + $0x8] sm:$0xff] %vm30_vm0, %v324_v21  ;;  %v442_v25 = vpack.c.bf16 %v346_v23, %v346_v23 }
  0xf3   :  { %381 = vst.msk [vmem:[%s648_s6] sm:$0xf] %vm380_vm1, %v441_v22  ;;  %384 = vst.msk [vmem:[%s648_s6 + $0xc] sm:$0xf] %vm380_vm1, %v444_v24 }
  0xf4   :  { %382 = vst.msk [vmem:[%s648_s6 + $0x4] sm:$0xf] %vm380_vm1, %v442_v25 }
  0xf5   :  { %v351_v27 = vld [vmem:[#allocation3 + $0x10] sm:$0xff] }
  0xf6   :  { %v362_v28 = vadd.f32 %v432_v26, %v351_v27  ;;  %v349_v29 = vld [vmem:[#allocation3] sm:$0xff] }
  0xf7   :  { %v360_v30 = vadd.f32 %v432_v26, %v349_v29  ;;  %v352_v31 = vld [vmem:[#allocation3 + $0x18] sm:$0xff] }
  0xf8   :  { %v447_v32 = vpack.c.bf16 %v362_v28, %v362_v28  ;;  %v363_v33 = vadd.f32 %v432_v26, %v352_v31 }
  0xf9   :  { %v350_v34 = vld [vmem:[#allocation3 + $0x8] sm:$0xff]  ;;  %v445_v35 = vpack.c.bf16 %v360_v30, %v360_v30 }
  0xfa   :  { %v361_v36 = vadd.f32 %v432_v26, %v350_v34  ;;  %403 = vst.msk [vmem:[%s650_s7 + $0x8] sm:$0xf] %vm380_vm1, %v447_v32  ;;  %v448_v37 = vpack.c.bf16 %v363_v33, %v363_v33 }
  0xfb   :  { %401 = vst.msk [vmem:[%s650_s7] sm:$0xf] %vm380_vm1, %v445_v35 }
  0xfc   :  { %v446_v38 = vpack.c.bf16 %v361_v36, %v361_v36  ;;  %404 = vst.msk [vmem:[%s650_s7 + $0xc] sm:$0xf] %vm380_vm1, %v448_v37 }
  0xfe   :  { %402 = vst.msk [vmem:[%s650_s7 + $0x4] sm:$0xf] %vm380_vm1, %v446_v38 }

// kernel: model_forward.16
= control target key start
LH: loop header
LB: loop body
LE: loop exit
PB: predicated region body
PF: predicated region fallthrough
CT: control target
= control target key end

     0   :  { %vm84_vm0 = vcmask 261120   ;;  %s769_s2 = inlined_call_operand.vmem [shape: bf16[32,128], index: 2, kind: input, shape index: {}]   ;;  %s770_s3 = inlined_call_operand.vmem [shape: bf16[32,128], index: 3, kind: input, shape index: {}]   ;;  %s771_s0 = inlined_call_operand.vmem [shape: bf16[32,32], index: 0, kind: input, shape index: {}]   ;;  %s772_s1 = inlined_call_operand.vmem [shape: bf16[32,32], index: 1, kind: input, shape index: {}]   ;;  %s773_s4 = inlined_call_operand.vmem [shape: f32[1,128], index: 4, kind: input, shape index: {}]   ;;  %s774_s5 = inlined_call_operand.vmem [shape: f32[1,128], index: 5, kind: input, shape index: {}]   ;;  %s775_s6 = inlined_call_operand.vmem [shape: bf16[32,128], index: 6, kind: output, shape index: {0}]   ;;  %s776_s7 = inlined_call_operand.vmem [shape: bf16[32,128], index: 7, kind: output, shape index: {1}]  }
   0x1   :  { %v46_v0 = vld [vmem:[%s769_s2] sm:$0xf]  ;;  %v47_v1 = vld [vmem:[%s769_s2 + $0x4] sm:$0xf]  ;;  %v48_v5 = vld [vmem:[%s769_s2 + $0x8] sm:$0xf] }
   0x2   :  { %v50_v2 = vld [vmem:[%s770_s3] sm:$0xf]  ;;  %v485_v3 = vcombine.low %v46_v0, %v47_v1  ;;  %v51_v4 = vld [vmem:[%s770_s3 + $0x4] sm:$0xf]  ;;  %v49_v6 = vld [vmem:[%s769_s2 + $0xc] sm:$0xf] }
   0x3   :  { %v491_v7 = vcombine.low %v50_v2, %v51_v4  ;;  %v486_v8 = vcombine.low %v48_v5, %v49_v6  ;;  %v52_v9 = vld [vmem:[%s770_s3 + $0x8] sm:$0xf]  ;;  %v53_v10 = vld [vmem:[%s770_s3 + $0xc] sm:$0xf]  ;;  %v38_v11 = vld [vmem:[%s771_s0] sm:$0xf]  ;;  %v58_v12 = vadd.bf16 %v50_v2, %v46_v0  ;;  %v59_v13 = vadd.bf16 %v51_v4, %v47_v1 }
   0x4   :  { %553 = vmatprep.subr.bf16.mxu0 %v485_v3  ;;  %v492_v14 = vcombine.low %v52_v9, %v53_v10  ;;  %v39_v15 = vld [vmem:[%s771_s0 + $0x4] sm:$0xf]  ;;  %v42_v16 = vld [vmem:[%s772_s1] sm:$0xf]  ;;  %v40_v19 = vld [vmem:[%s771_s0 + $0x8] sm:$0xf]  ;;  %v60_v21 = vadd.bf16 %v52_v9, %v48_v5  ;;  %v61_v22 = vadd.bf16 %v53_v10, %v49_v6 }
   0x5   :  { %v43_v17 = vld [vmem:[%s772_s1 + $0x4] sm:$0xf]  ;;  %561 = vmatprep.subr.bf16.mxu1 %v491_v7  ;;  %554 = vmatpush3.bf16.msra.mxu0 %v485_v3  ;;  %v483_v18 = vcombine.low %v38_v11, %v39_v15  ;;  %v41_v20 = vld [vmem:[%s771_s0 + $0xc] sm:$0xf]  ;;  %v54_v23 = vadd.bf16 %v42_v16, %v38_v11  ;;  %v44_v26 = vld [vmem:[%s772_s1 + $0x8] sm:$0xf]  ;;  %v497_v29 = vcombine.low %v58_v12, %v59_v13 }
   0x6   :  { %562 = vmatpush3.bf16.msra.mxu1 %v491_v7  ;;  %555 = vmatprep.subr.bf16.mxu0 %v486_v8  ;;  %v55_v24 = vadd.bf16 %v43_v17, %v39_v15  ;;  %v489_v25 = vcombine.low %v42_v16, %v43_v17  ;;  %v45_v27 = vld [vmem:[%s772_s1 + $0xc] sm:$0xf]  ;;  %v484_v28 = vcombine.low %v40_v19, %v41_v20  ;;  %v501_v38 = vld [vmem:[%s773_s4] ss:$0 sm:$0xff] }
   0x7   :  { %563 = vmatprep.subr.bf16.mxu1 %v492_v14  ;;  %557 = vmatprep.mubr.msk.bf16.mxu0 %vm84_vm0, %v483_v18  ;;  %v490_v30 = vcombine.low %v44_v26, %v45_v27  ;;  %v498_v32 = vcombine.low %v60_v21, %v61_v22  ;;  %v56_v33 = vadd.bf16 %v44_v26, %v40_v19  ;;  %v502_v0 = vld [vmem:[%s774_s5] ss:$0 sm:$0xff] }
   0x8   :  { %565 = vmatprep.mubr.msk.bf16.mxu1 %vm84_vm0, %v489_v25  ;;  %v495_v31 = vcombine.low %v54_v23, %v55_v24  ;;  %v57_v34 = vadd.bf16 %v45_v27, %v41_v20 }
   0x9   :  { %556 = vmatpush3.bf16.msra.mxu0 %v486_v8 }
   0xa   :  { %564 = vmatpush3.bf16.msra.mxu1 %v492_v14  ;;  %569 = vmatprep.subr.bf16.mxu0 %v497_v29  ;;  %v496_v35 = vcombine.low %v56_v33, %v57_v34 }
   0xc   :  { %558 = vmatmul.mubr.msk.bf16.vlgmr.msra.gmra.mrb[0].mxu0 %vm84_vm0, %v484_v28 }
   0xd   :  { %566 = vmatmul.mubr.msk.bf16.vlgmr.msra.gmra.mrb[0].mxu1 %vm84_vm0, %v490_v30  ;;  %570 = vmatpush3.bf16.msra.mxu0 %v497_v29 }
   0xe   :  { %571 = vmatprep.subr.bf16.mxu0 %v498_v32  ;;  %573 = vmatprep.mubr.msk.bf16.mxu0 %vm84_vm0, %v495_v31 }
  0x11   :  { %572 = vmatpush3.bf16.msra.mxu0 %v498_v32 }
  0x14   :  { %574 = vmatmul.mubr.msk.bf16.vlgmr.msra.gmra.mrb[4].mxu0 %vm84_vm0, %v496_v35 }
  0xdf   :  { %v559_v36 = vpop.f32.mrb[0].mxu0 }
  0xe0   :  { %v567_v37 = vpop.f32.mrb[0].mxu1  ;;  %v125_v39 = vpop.f32.mrb[1].mxu0 }
  0xe1   :  { %v300_v40 = vsub.f32 %v559_v36, %v567_v37  ;;  %v202_v41 = vpop.f32.mrb[1].mxu1  ;;  %v560_v42 = vpop.f32.mrb[2].mxu0 }
  0xe2   :  { %v298_v43 = vsub.f32 %v125_v39, %v202_v41  ;;  %v568_v44 = vpop.f32.mrb[2].mxu1  ;;  %v128_v45 = vpop.f32.mrb[3].mxu0 }
  0xe3   :  { %v698_v46 = vadd.f32 %v501_v38, %v300_v40  ;;  %v301_v47 = vsub.f32 %v560_v42, %v568_v44  ;;  %v205_v48 = vpop.f32.mrb[3].mxu1 }
  0xe4   :  { %v700_v49 = vadd.f32 %v501_v38, %v298_v43  ;;  %v299_v50 = vsub.f32 %v128_v45, %v205_v48 }
  0xe5   :  { %v365_v51 = vmul.f32 %v698_v46, %v698_v46  ;;  %v704_v52 = vadd.f32 %v501_v38, %v301_v47 }
  0xe6   :  { %v363_v53 = vmul.f32 %v700_v49, %v700_v49  ;;  %v708_v54 = vadd.f32 %v501_v38, %v299_v50 }
  0xe7   :  { %v369_v55 = vmul.f32 %v365_v51, %v698_v46  ;;  %v366_v56 = vmul.f32 %v704_v52, %v704_v52  ;;  %v575_v57 = vpop.f32.mrb[4].mxu0 }
  0xe8   :  { %v367_v58 = vmul.f32 %v363_v53, %v700_v49  ;;  %v364_v59 = vmul.f32 %v708_v54, %v708_v54  ;;  %v316_v60 = vsub.f32 %v575_v57, %v559_v36  ;;  %v279_v61 = vpop.f32.mrb[5].mxu0 }
  0xe9   :  { %v373_v62 = vmul.f32 0.044715, %v369_v55  ;;  %v370_v63 = vmul.f32 %v366_v56, %v704_v52  ;;  %v314_v1 = vsub.f32 %v279_v61, %v125_v39  ;;  %v576_v2 = vpop.f32.mrb[6].mxu0 }
  0xea   :  { %v371_v3 = vmul.f32 0.044715, %v367_v58  ;;  %v368_v4 = vmul.f32 %v364_v59, %v708_v54  ;;  %v320_v5 = vsub.f32 %v316_v60, %v567_v37  ;;  %v317_v6 = vsub.f32 %v576_v2, %v560_v42  ;;  %v282_v7 = vpop.f32.mrb[7].mxu0 }
  0xeb   :  { %v377_v8 = vadd.f32 %v373_v62, %v698_v46  ;;  %v374_v9 = vmul.f32 0.044715, %v370_v63  ;;  %v318_v10 = vsub.f32 %v314_v1, %v202_v41  ;;  %v315_v11 = vsub.f32 %v282_v7, %v128_v45 }
  0xec   :  { %v375_v12 = vadd.f32 %v371_v3, %v700_v49  ;;  %v372_v13 = vmul.f32 0.044715, %v368_v4  ;;  %v723_v14 = vadd.f32 %v502_v0, %v320_v5  ;;  %v321_v15 = vsub.f32 %v317_v6, %v568_v44 }
  0xed   :  { %v381_v16 = vmul.f32 0.7978846, %v377_v8  ;;  %v378_v17 = vadd.f32 %v374_v9, %v704_v52  ;;  %v726_v18 = vadd.f32 %v502_v0, %v318_v10  ;;  %v319_v19 = vsub.f32 %v315_v11, %v205_v48 }
  0xee   :  { %v379_v20 = vmul.f32 0.7978846, %v375_v12  ;;  %v376_v21 = vadd.f32 %v372_v13, %v708_v54  ;;  %v401_v22 = vmul.f32 %v723_v14, %v723_v14  ;;  %v731_v23 = vadd.f32 %v502_v0, %v321_v15 }
  0xef   :  { %585 = vtanh.f32 %v381_v16  ;;  %v382_v24 = vmul.f32 0.7978846, %v378_v17  ;;  %v399_v25 = vmul.f32 %v726_v18, %v726_v18  ;;  %v735_v26 = vadd.f32 %v502_v0, %v319_v19 }
  0xf0   :  { %587 = vtanh.f32 %v379_v20  ;;  %v380_v27 = vmul.f32 0.7978846, %v376_v21  ;;  %v405_v28 = vmul.f32 %v401_v22, %v723_v14  ;;  %v402_v29 = vmul.f32 %v731_v23, %v731_v23 }
  0xf1   :  { %589 = vtanh.f32 %v382_v24  ;;  %v403_v30 = vmul.f32 %v399_v25, %v726_v18  ;;  %v400_v31 = vmul.f32 %v735_v26, %v735_v26 }
  0xf2   :  { %591 = vtanh.f32 %v380_v27  ;;  %v409_v32 = vmul.f32 0.044715, %v405_v28  ;;  %v406_v33 = vmul.f32 %v402_v29, %v731_v23 }
  0xf3   :  { %v407_v34 = vmul.f32 0.044715, %v403_v30  ;;  %v404_v35 = vmul.f32 %v400_v31, %v735_v26 }
  0xf4   :  { %v413_v36 = vadd.f32 %v409_v32, %v723_v14  ;;  %v410_v37 = vmul.f32 0.044715, %v406_v33 }
  0xf5   :  { %v411_v38 = vadd.f32 %v407_v34, %v726_v18  ;;  %v408_v39 = vmul.f32 0.044715, %v404_v35 }
  0xf6   :  { %v417_v40 = vmul.f32 0.7978846, %v413_v36  ;;  %v414_v41 = vadd.f32 %v410_v37, %v731_v23 }
  0xf7   :  { %v415_v42 = vmul.f32 0.7978846, %v411_v38  ;;  %v412_v43 = vadd.f32 %v408_v39, %v735_v26 }
  0xf8   :  { %593 = vtanh.f32 %v417_v40  ;;  %v418_v44 = vmul.f32 0.7978846, %v414_v41 }
  0xf9   :  { %v586_v45 = vpop.eup %585  ;;  %595 = vtanh.f32 %v415_v42  ;;  %v416_v47 = vmul.f32 0.7978846, %v412_v43 }
  0xfa   :  { %v588_v48 = vpop.eup %587  ;;  %v389_v50 = vadd.f32 1.0, %v586_v45  ;;  %597 = vtanh.f32 %v418_v44 }
  0xfb   :  { %v590_v51 = vpop.eup %589  ;;  %v387_v53 = vadd.f32 1.0, %v588_v48  ;;  %599 = vtanh.f32 %v416_v47 }
  0xfc   :  { %v592_v55 = vpop.eup %591  ;;  %v393_v56 = vmul.f32 0.5, %v389_v50  ;;  %v390_v57 = vadd.f32 1.0, %v590_v51 }
  0xfd   :  { %v391_v58 = vmul.f32 0.5, %v387_v53  ;;  %v388_v59 = vadd.f32 1.0, %v592_v55 }
  0xfe   :  { %v394_v60 = vmul.f32 0.5, %v390_v57  ;;  %v397_v62 = vmul.f32 %v393_v56, %v698_v46 }
  0xff   :  { %v392_v61 = vmul.f32 0.5, %v388_v59  ;;  %v395_v0 = vmul.f32 %v391_v58, %v700_v49 }
 0x100   :  { %v398_v63 = vmul.f32 %v394_v60, %v704_v52 }
 0x101   :  { %v396_v1 = vmul.f32 %v392_v61, %v708_v54 }
 0x102   :  { %v594_v2 = vpop.eup %593  ;;  %v527_v3 = vpack.c.bf16 %v398_v63, %v397_v62 }
 0x103   :  { %v596_v4 = vpop.eup %595  ;;  %v522_v5 = vpack.c.bf16 %v396_v1, %v395_v0  ;;  %v425_v6 = vadd.f32 1.0, %v594_v2 }
 0x104   :  { %v598_v7 = vpop.eup %597  ;;  %539 = vst [vmem:[%s775_s6 + $0x8] sm:$0xff] %v527_v3   ;;  %v423_v8 = vadd.f32 1.0, %v596_v4 }
 0x105   :  { %v600_v9 = vpop.eup %599  ;;  %523 = vst [vmem:[%s775_s6] sm:$0xff] %v522_v5   ;;  %v429_v46 = vmul.f32 0.5, %v425_v6  ;;  %v426_v49 = vadd.f32 1.0, %v598_v7 }
 0x106   :  { %v427_v52 = vmul.f32 0.5, %v423_v8  ;;  %v424_v54 = vadd.f32 1.0, %v600_v9 }
 0x107   :  { %v430_v10 = vmul.f32 0.5, %v426_v49  ;;  %v433_v12 = vmul.f32 %v429_v46, %v723_v14 }
 0x108   :  { %v428_v11 = vmul.f32 0.5, %v424_v54  ;;  %v431_v15 = vmul.f32 %v427_v52, %v726_v18 }
 0x109   :  { %v434_v13 = vmul.f32 %v430_v10, %v731_v23 }
 0x10a   :  { %v432_v16 = vmul.f32 %v428_v11, %v735_v26 }
 0x10b   :  { %v537_v17 = vpack.c.bf16 %v434_v13, %v433_v12 }
 0x10c   :  { %v532_v19 = vpack.c.bf16 %v432_v16, %v431_v15 }
 0x10d   :  { %540 = vst [vmem:[%s776_s7 + $0x8] sm:$0xff] %v537_v17  }
 0x10e   :  { %533 = vst [vmem:[%s776_s7] sm:$0xff] %v532_v19  }

// kernel: model_forward.17
= control target key start
LH: loop header
LB: loop body
LE: loop exit
PB: predicated region body
PF: predicated region fallthrough
CT: control target
= control target key end

     0   :  { %vm30_vm0 = vcmask 261120   ;;  %vm512_vm1 = vcmask 257024   ;;  %s1059_s2 = inlined_call_operand.vmem [shape: bf16[128,32], index: 2, kind: input, shape index: {}]   ;;  %s1060_s3 = inlined_call_operand.vmem [shape: bf16[128,32], index: 3, kind: input, shape index: {}]   ;;  %s1061_s0 = inlined_call_operand.vmem [shape: bf16[32,128], index: 0, kind: input, shape index: {}]   ;;  %s1062_s1 = inlined_call_operand.vmem [shape: bf16[32,128], index: 1, kind: input, shape index: {}]   ;;  %s1063_s4 = inlined_call_operand.vmem [shape: f32[1,32], index: 4, kind: input, shape index: {}]   ;;  %s1064_s6 = inlined_call_operand.vmem [shape: bf16[32,32], index: 6, kind: output, shape index: {0}]   ;;  %s1065_s5 = inlined_call_operand.vmem [shape: f32[1,32], index: 5, kind: input, shape index: {}]   ;;  %s1066_s7 = inlined_call_operand.vmem [shape: bf16[32,32], index: 7, kind: output, shape index: {1}]  }
   0x1   :  { %v748_v0 = vld [vmem:[%s1059_s2] sm:$0xf]  ;;  %v753_v1 = vld [vmem:[%s1059_s2 + $0x4] sm:$0xf]  ;;  %v770_v5 = vld [vmem:[%s1059_s2 + $0x8] sm:$0xf] }
   0x2   :  { %v758_v2 = vld [vmem:[%s1060_s3] sm:$0xf]  ;;  %v547_v3 = vcombine.low %v748_v0, %v753_v1  ;;  %v765_v4 = vld [vmem:[%s1060_s3 + $0x4] sm:$0xf]  ;;  %v775_v6 = vld [vmem:[%s1059_s2 + $0xc] sm:$0xf] }
   0x3   :  { %v557_v7 = vcombine.low %v758_v2, %v765_v4  ;;  %v548_v8 = vcombine.low %v770_v5, %v775_v6  ;;  %v784_v9 = vld [vmem:[%s1060_s3 + $0x8] sm:$0xf]  ;;  %v789_v10 = vld [vmem:[%s1060_s3 + $0xc] sm:$0xf]  ;;  %v794_v11 = vld [vmem:[%s1059_s2 + $0x10] sm:$0xf]  ;;  %v83_v52 = vadd.bf16 %v758_v2, %v748_v0  ;;  %v84_v53 = vadd.bf16 %v765_v4, %v753_v1 }
   0x4   :  { %623 = vmatprep.subr.bf16.mxu0 %v547_v3  ;;  %v558_v12 = vcombine.low %v784_v9, %v789_v10  ;;  %v801_v13 = vld [vmem:[%s1059_s2 + $0x14] sm:$0xf]  ;;  %v806_v14 = vld [vmem:[%s1060_s3 + $0x10] sm:$0xf]  ;;  %v820_v18 = vld [vmem:[%s1059_s2 + $0x18] sm:$0xf]  ;;  %v85_v58 = vadd.bf16 %v784_v9, %v770_v5  ;;  %v86_v59 = vadd.bf16 %v789_v10, %v775_v6 }
   0x5   :  { %v811_v15 = vld [vmem:[%s1060_s3 + $0x14] sm:$0xf]  ;;  %643 = vmatprep.subr.bf16.mxu1 %v557_v7  ;;  %624 = vmatpush3.bf16.msra.mxu0 %v547_v3  ;;  %v549_v16 = vcombine.low %v794_v11, %v801_v13  ;;  %v825_v19 = vld [vmem:[%s1059_s2 + $0x1c] sm:$0xf]  ;;  %v830_v20 = vld [vmem:[%s1060_s3 + $0x18] sm:$0xf]  ;;  %v567_v0 = vcombine.low %v83_v52, %v84_v53  ;;  %v87_v4 = vadd.bf16 %v806_v14, %v794_v11 }
   0x6   :  { %644 = vmatpush3.bf16.msra.mxu1 %v557_v7  ;;  %625 = vmatprep.subr.bf16.mxu0 %v548_v8  ;;  %v559_v17 = vcombine.low %v806_v14, %v811_v15  ;;  %v835_v21 = vld [vmem:[%s1060_s3 + $0x1c] sm:$0xf]  ;;  %v550_v22 = vcombine.low %v820_v18, %v825_v19  ;;  %v842_v23 = vld [vmem:[%s1059_s2 + $0x20] sm:$0xf]  ;;  %v847_v24 = vld [vmem:[%s1059_s2 + $0x24] sm:$0xf]  ;;  %v568_v3 = vcombine.low %v85_v58, %v86_v59 }
   0x7   :  { %645 = vmatprep.subr.bf16.mxu1 %v558_v12  ;;  %v560_v25 = vcombine.low %v830_v20, %v835_v21  ;;  %v854_v26 = vld [vmem:[%s1060_s3 + $0x20] sm:$0xf]  ;;  %v859_v27 = vld [vmem:[%s1060_s3 + $0x24] sm:$0xf]  ;;  %v551_v34 = vcombine.low %v842_v23, %v847_v24  ;;  %v892_v36 = vld [vmem:[%s1059_s2 + $0x28] sm:$0xf]  ;;  %v88_v5 = vadd.bf16 %v811_v15, %v801_v13  ;;  %v90_v9 = vadd.bf16 %v835_v21, %v825_v19 }
   0x8   :  { %v864_v28 = vld [vmem:[%s1061_s0] sm:$0xf]  ;;  %v869_v29 = vld [vmem:[%s1061_s0 + $0x4] sm:$0xf]  ;;  %v561_v35 = vcombine.low %v854_v26, %v859_v27  ;;  %v897_v37 = vld [vmem:[%s1059_s2 + $0x2c] sm:$0xf]  ;;  %v91_v11 = vadd.bf16 %v854_v26, %v842_v23 }
   0x9   :  { %626 = vmatpush3.bf16.msra.mxu0 %v548_v8  ;;  %v874_v30 = vld [vmem:[%s1062_s1] sm:$0xf]  ;;  %v879_v31 = vld [vmem:[%s1062_s1 + $0x4] sm:$0xf]  ;;  %v545_v32 = vcombine.low %v864_v28, %v869_v29  ;;  %v902_v38 = vld [vmem:[%s1060_s3 + $0x28] sm:$0xf]  ;;  %v552_v40 = vcombine.low %v892_v36, %v897_v37  ;;  %v569_v7 = vcombine.low %v87_v4, %v88_v5  ;;  %v89_v8 = vadd.bf16 %v830_v20, %v820_v18 }
   0xa   :  { %646 = vmatpush3.bf16.msra.mxu1 %v558_v12  ;;  %627 = vmatprep.subr.bf16.mxu0 %v549_v16  ;;  %v555_v33 = vcombine.low %v874_v30, %v879_v31  ;;  %v907_v39 = vld [vmem:[%s1060_s3 + $0x2c] sm:$0xf]  ;;  %v916_v42 = vld [vmem:[%s1059_s2 + $0x30] sm:$0xf]  ;;  %v921_v43 = vld [vmem:[%s1059_s2 + $0x34] sm:$0xf]  ;;  %v79_v60 = vadd.bf16 %v874_v30, %v864_v28  ;;  %v80_v61 = vadd.bf16 %v879_v31, %v869_v29 }
   0xb   :  { %647 = vmatprep.subr.bf16.mxu1 %v559_v17  ;;  %639 = vmatprep.mubr.bf16.mxu0 %v545_v32  ;;  %v562_v41 = vcombine.low %v902_v38, %v907_v39  ;;  %v926_v44 = vld [vmem:[%s1060_s3 + $0x30] sm:$0xf]  ;;  %v931_v45 = vld [vmem:[%s1060_s3 + $0x34] sm:$0xf]  ;;  %v553_v46 = vcombine.low %v916_v42, %v921_v43  ;;  %v940_v48 = vld [vmem:[%s1059_s2 + $0x38] sm:$0xf]  ;;  %v570_v10 = vcombine.low %v89_v8, %v90_v9 }
   0xc   :  { %659 = vmatprep.mubr.bf16.mxu1 %v555_v33  ;;  %v563_v47 = vcombine.low %v926_v44, %v931_v45  ;;  %v945_v49 = vld [vmem:[%s1059_s2 + $0x3c] sm:$0xf]  ;;  %v950_v50 = vld [vmem:[%s1060_s3 + $0x38] sm:$0xf]  ;;  %v41_v56 = vld [vmem:[%s1061_s0 + $0x8] sm:$0xf]  ;;  %v565_v6 = vcombine.low %v79_v60, %v80_v61  ;;  %v92_v12 = vadd.bf16 %v859_v27, %v847_v24  ;;  %v93_v14 = vadd.bf16 %v902_v38, %v892_v36 }
   0xd   :  { %628 = vmatpush3.bf16.msra.mxu0 %v549_v16  ;;  %v78_v51 = vld [vmem:[%s1060_s3 + $0x3c] sm:$0xf]  ;;  %v554_v54 = vcombine.low %v940_v48, %v945_v49  ;;  %v42_v57 = vld [vmem:[%s1061_s0 + $0xc] sm:$0xf]  ;;  %v45_v62 = vld [vmem:[%s1062_s1 + $0x8] sm:$0xf]  ;;  %v94_v15 = vadd.bf16 %v907_v39, %v897_v37  ;;  %v96_v18 = vadd.bf16 %v931_v45, %v921_v43  ;;  %v97_v20 = vadd.bf16 %v950_v50, %v940_v48 }
   0xe   :  { %648 = vmatpush3.bf16.msra.mxu1 %v559_v17  ;;  %629 = vmatprep.subr.bf16.mxu0 %v550_v22  ;;  %v564_v55 = vcombine.low %v950_v50, %v78_v51  ;;  %v46_v63 = vld [vmem:[%s1062_s1 + $0xc] sm:$0xf]  ;;  %v546_v1 = vcombine.low %v41_v56, %v42_v57  ;;  %v571_v13 = vcombine.low %v91_v11, %v92_v12  ;;  %v704_v26 = vmov 0.0  }
   0xf   :  { %649 = vmatprep.subr.bf16.mxu1 %v560_v25  ;;  %v556_v2 = vcombine.low %v45_v62, %v46_v63  ;;  %v572_v16 = vcombine.low %v93_v14, %v94_v15  ;;  %v95_v17 = vadd.bf16 %v926_v44, %v916_v42  ;;  %v98_v21 = vadd.bf16 %v78_v51, %v945_v49 }
  0x10   :  { %v81_v23 = vadd.bf16 %v45_v62, %v41_v56  ;;  %v82_v24 = vadd.bf16 %v46_v63, %v42_v57  ;;  %33 = vst.msk [vmem:[#allocation2 + $0x10] sm:$0xff] %vm30_vm0, %v704_v26  ;;  %31 = vst.msk [vmem:[#allocation2] sm:$0xff] %vm30_vm0, %v704_v26 }
  0x11   :  { %630 = vmatpush3.bf16.msra.mxu0 %v550_v22  ;;  %v573_v19 = vcombine.low %v95_v17, %v96_v18  ;;  %v574_v22 = vcombine.low %v97_v20, %v98_v21  ;;  %32 = vst.msk [vmem:[#allocation2 + $0x8] sm:$0xff] %vm30_vm0, %v704_v26  ;;  %34 = vst.msk [vmem:[#allocation2 + $0x18] sm:$0xff] %vm30_vm0, %v704_v26 }
  0x12   :  { %650 = vmatpush3.bf16.msra.mxu1 %v560_v25  ;;  %631 = vmatprep.subr.bf16.mxu0 %v551_v34  ;;  %v566_v25 = vcombine.low %v81_v23, %v82_v24  ;;  %35 = vst.msk [vmem:[#allocation3] sm:$0xff] %vm30_vm0, %v704_v26  ;;  %36 = vst.msk [vmem:[#allocation3 + $0x8] sm:$0xff] %vm30_vm0, %v704_v26 }
  0x13   :  { %651 = vmatprep.subr.bf16.mxu1 %v561_v35  ;;  %37 = vst.msk [vmem:[#allocation3 + $0x10] sm:$0xff] %vm30_vm0, %v704_v26  ;;  %38 = vst.msk [vmem:[#allocation3 + $0x18] sm:$0xff] %vm30_vm0, %v704_v26 }
  0x15   :  { %632 = vmatpush3.bf16.msra.mxu0 %v551_v34 }
  0x16   :  { %652 = vmatpush3.bf16.msra.mxu1 %v561_v35  ;;  %633 = vmatprep.subr.bf16.mxu0 %v552_v40 }
  0x17   :  { %653 = vmatprep.subr.bf16.mxu1 %v562_v41  ;;  %v428_v29 = vld [vmem:[#allocation2 + $0x10] sm:$0xff]  ;;  %v426_v33 = vld [vmem:[#allocation2] sm:$0xff] }
  0x18   :  { %v429_v37 = vld [vmem:[#allocation2 + $0x18] sm:$0xff]  ;;  %v427_v42 = vld [vmem:[#allocation2 + $0x8] sm:$0xff] }
  0x19   :  { %634 = vmatpush3.bf16.msra.mxu0 %v552_v40  ;;  %v444_v11 = vld [vmem:[#allocation3 + $0x8] sm:$0xff] }
  0x1a   :  { %654 = vmatpush3.bf16.msra.mxu1 %v562_v41  ;;  %635 = vmatprep.subr.bf16.mxu0 %v553_v46  ;;  %v445_v63 = vld [vmem:[#allocation3 + $0x10] sm:$0xff] }
  0x1b   :  { %655 = vmatprep.subr.bf16.mxu1 %v563_v47 }
  0x1d   :  { %636 = vmatpush3.bf16.msra.mxu0 %v553_v46 }
  0x1e   :  { %656 = vmatpush3.bf16.msra.mxu1 %v563_v47  ;;  %637 = vmatprep.subr.bf16.mxu0 %v554_v54  ;;  %v575_v47 = vld [vmem:[%s1063_s4] ss:$0 sm:$0xff] }
  0x1f   :  { %657 = vmatprep.subr.bf16.mxu1 %v564_v55 }
  0x21   :  { %638 = vmatpush3.bf16.msra.mxu0 %v554_v54 }
  0x22   :  { %658 = vmatpush3.bf16.msra.mxu1 %v564_v55  ;;  %663 = vmatprep.subr.bf16.mxu0 %v567_v0 }
  0x24   :  { %640 = vmatmul.mubr.bf16.vlgmr.msra.gmra.mrb[0].mxu0 %v546_v1 }
  0x25   :  { %660 = vmatmul.mubr.bf16.vlgmr.msra.gmra.mrb[0].mxu1 %v556_v2  ;;  %664 = vmatpush3.bf16.msra.mxu0 %v567_v0 }
  0x26   :  { %665 = vmatprep.subr.bf16.mxu0 %v568_v3  ;;  %679 = vmatprep.mubr.bf16.mxu0 %v565_v6 }
  0x29   :  { %666 = vmatpush3.bf16.msra.mxu0 %v568_v3  ;;  %v443_v3 = vld [vmem:[#allocation3] sm:$0xff] }
  0x2a   :  { %667 = vmatprep.subr.bf16.mxu0 %v569_v7 }
  0x2d   :  { %668 = vmatpush3.bf16.msra.mxu0 %v569_v7  ;;  %v446_v7 = vld [vmem:[#allocation3 + $0x18] sm:$0xff] }
  0x2e   :  { %669 = vmatprep.subr.bf16.mxu0 %v570_v10 }
  0x31   :  { %670 = vmatpush3.bf16.msra.mxu0 %v570_v10 }
  0x32   :  { %671 = vmatprep.subr.bf16.mxu0 %v571_v13 }
  0x35   :  { %672 = vmatpush3.bf16.msra.mxu0 %v571_v13 }
  0x36   :  { %673 = vmatprep.subr.bf16.mxu0 %v572_v16 }
  0x39   :  { %674 = vmatpush3.bf16.msra.mxu0 %v572_v16  ;;  %v576_v16 = vld [vmem:[%s1065_s5] ss:$0 sm:$0xff] }
  0x3a   :  { %675 = vmatprep.subr.bf16.mxu0 %v573_v19 }
  0x3d   :  { %676 = vmatpush3.bf16.msra.mxu0 %v573_v19 }
  0x3e   :  { %677 = vmatprep.subr.bf16.mxu0 %v574_v22 }
  0x41   :  { %678 = vmatpush3.bf16.msra.mxu0 %v574_v22 }
  0x44   :  { %680 = vmatmul.mubr.bf16.vlgmr.msra.gmra.mrb[4].mxu0 %v566_v25 }
  0xf7   :  { %v641_v27 = vpop.f32.mrb[0].mxu0 }
  0xf8   :  { %v661_v28 = vpop.f32.mrb[0].mxu1  ;;  %v193_v30 = vpop.f32.mrb[1].mxu0 }
  0xf9   :  { %v432_v31 = vsub.f32 %v641_v27, %v661_v28  ;;  %v302_v32 = vpop.f32.mrb[1].mxu1  ;;  %v642_v34 = vpop.f32.mrb[2].mxu0 }
  0xfa   :  { %v430_v35 = vsub.f32 %v193_v30, %v302_v32  ;;  %v662_v36 = vpop.f32.mrb[2].mxu1  ;;  %v196_v38 = vpop.f32.mrb[3].mxu0 }
  0xfb   :  { %v436_v39 = vadd.f32 %v432_v31, %v428_v29  ;;  %v433_v40 = vsub.f32 %v642_v34, %v662_v36  ;;  %v305_v41 = vpop.f32.mrb[3].mxu1 }
  0xfc   :  { %v434_v43 = vadd.f32 %v430_v35, %v426_v33  ;;  %v431_v44 = vsub.f32 %v196_v38, %v305_v41 }
  0xfd   :  { %441 = vst.msk [vmem:[#allocation2 + $0x10] sm:$0xff] %vm30_vm0, %v436_v39  ;;  %v437_v45 = vadd.f32 %v433_v40, %v429_v37 }
  0xfe   :  { %439 = vst.msk [vmem:[#allocation2] sm:$0xff] %vm30_vm0, %v434_v43  ;;  %v435_v46 = vadd.f32 %v431_v44, %v427_v42 }
  0xff   :  { %442 = vst.msk [vmem:[#allocation2 + $0x18] sm:$0xff] %vm30_vm0, %v437_v45 }
 0x100   :  { %440 = vst.msk [vmem:[#allocation2 + $0x8] sm:$0xff] %vm30_vm0, %v435_v46 }
 0x104   :  { %v468_v48 = vld [vmem:[#allocation2 + $0x10] sm:$0xff] }
 0x105   :  { %v479_v49 = vadd.f32 %v575_v47, %v468_v48  ;;  %v466_v50 = vld [vmem:[#allocation2] sm:$0xff] }
 0x106   :  { %v477_v51 = vadd.f32 %v575_v47, %v466_v50  ;;  %v469_v52 = vld [vmem:[#allocation2 + $0x18] sm:$0xff] }
 0x107   :  { %v587_v53 = vpack.c.bf16 %v479_v49, %v479_v49  ;;  %v480_v54 = vadd.f32 %v575_v47, %v469_v52  ;;  %v467_v55 = vld [vmem:[#allocation2 + $0x8] sm:$0xff] }
 0x108   :  { %v585_v56 = vpack.c.bf16 %v477_v51, %v477_v51  ;;  %v478_v57 = vadd.f32 %v575_v47, %v467_v55 }
 0x109   :  { %515 = vst.msk [vmem:[%s1064_s6 + $0x8] sm:$0xf] %vm512_vm1, %v587_v53  ;;  %v588_v58 = vpack.c.bf16 %v480_v54, %v480_v54 }
 0x10a   :  { %513 = vst.msk [vmem:[%s1064_s6] sm:$0xf] %vm512_vm1, %v585_v56  ;;  %v586_v59 = vpack.c.bf16 %v478_v57, %v478_v57 }
 0x10b   :  { %516 = vst.msk [vmem:[%s1064_s6 + $0xc] sm:$0xf] %vm512_vm1, %v588_v58 }
 0x10c   :  { %514 = vst.msk [vmem:[%s1064_s6 + $0x4] sm:$0xf] %vm512_vm1, %v586_v59 }
 0x117   :  { %v681_v60 = vpop.f32.mrb[4].mxu0 }
 0x118   :  { %v449_v61 = vsub.f32 %v681_v60, %v641_v27  ;;  %v411_v62 = vpop.f32.mrb[5].mxu0 }
 0x119   :  { %v447_v0 = vsub.f32 %v411_v62, %v193_v30  ;;  %v682_v1 = vpop.f32.mrb[6].mxu0 }
 0x11a   :  { %v453_v2 = vsub.f32 %v449_v61, %v661_v28  ;;  %v450_v4 = vsub.f32 %v682_v1, %v642_v34  ;;  %v414_v5 = vpop.f32.mrb[7].mxu0 }
 0x11b   :  { %v451_v6 = vsub.f32 %v447_v0, %v302_v32  ;;  %v448_v8 = vsub.f32 %v414_v5, %v196_v38 }
 0x11c   :  { %v457_v9 = vadd.f32 %v453_v2, %v445_v63  ;;  %v454_v10 = vsub.f32 %v450_v4, %v662_v36 }
 0x11d   :  { %v455_v12 = vadd.f32 %v451_v6, %v443_v3  ;;  %v452_v13 = vsub.f32 %v448_v8, %v305_v41 }
 0x11e   :  { %461 = vst.msk [vmem:[#allocation3 + $0x10] sm:$0xff] %vm30_vm0, %v457_v9  ;;  %v458_v14 = vadd.f32 %v454_v10, %v446_v7 }
 0x11f   :  { %459 = vst.msk [vmem:[#allocation3] sm:$0xff] %vm30_vm0, %v455_v12  ;;  %v456_v15 = vadd.f32 %v452_v13, %v444_v11 }
 0x120   :  { %462 = vst.msk [vmem:[#allocation3 + $0x18] sm:$0xff] %vm30_vm0, %v458_v14 }
 0x121   :  { %460 = vst.msk [vmem:[#allocation3 + $0x8] sm:$0xff] %vm30_vm0, %v456_v15 }
 0x125   :  { %v483_v17 = vld [vmem:[#allocation3 + $0x10] sm:$0xff] }
 0x126   :  { %v494_v18 = vadd.f32 %v576_v16, %v483_v17  ;;  %v481_v19 = vld [vmem:[#allocation3] sm:$0xff] }
 0x127   :  { %v492_v20 = vadd.f32 %v576_v16, %v481_v19  ;;  %v484_v21 = vld [vmem:[#allocation3 + $0x18] sm:$0xff] }
 0x128   :  { %v591_v22 = vpack.c.bf16 %v494_v18, %v494_v18  ;;  %v495_v23 = vadd.f32 %v576_v16, %v484_v21  ;;  %v482_v24 = vld [vmem:[#allocation3 + $0x8] sm:$0xff] }
 0x129   :  { %v589_v25 = vpack.c.bf16 %v492_v20, %v492_v20  ;;  %v493_v26 = vadd.f32 %v576_v16, %v482_v24 }
 0x12a   :  { %535 = vst.msk [vmem:[%s1066_s7 + $0x8] sm:$0xf] %vm512_vm1, %v591_v22  ;;  %v592_v27 = vpack.c.bf16 %v495_v23, %v495_v23 }
 0x12b   :  { %533 = vst.msk [vmem:[%s1066_s7] sm:$0xf] %vm512_vm1, %v589_v25  ;;  %v590_v28 = vpack.c.bf16 %v493_v26, %v493_v26 }
 0x12c   :  { %536 = vst.msk [vmem:[%s1066_s7 + $0xc] sm:$0xf] %vm512_vm1, %v592_v27 }
 0x12d   :  { %534 = vst.msk [vmem:[%s1066_s7 + $0x4] sm:$0xf] %vm512_vm1, %v590_v28 }

// kernel: model_forward.23
= control target key start
LH: loop header
LB: loop body
LE: loop exit
PB: predicated region body
PF: predicated region fallthrough
CT: control target
= control target key end

     0   :  { %v428_v2 = vmov 0.0   ;;  %vm429_vm0 = vmmov 0   ;;  %vm29_vm1 = vcmask 254976   ;;  %s581_s0 = inlined_call_operand.vmem [shape: bf16[2,16,32], index: 0, kind: input, shape index: {}]   ;;  %s582_s1 = inlined_call_operand.vmem [shape: bf16[2,16,32], index: 1, kind: input, shape index: {}]   ;;  %s583_s2 = inlined_call_operand.vmem [shape: bf16[32,128], index: 2, kind: input, shape index: {}]   ;;  %s584_s3 = inlined_call_operand.vmem [shape: bf16[32,128], index: 3, kind: input, shape index: {}]   ;;  %s585_s4 = inlined_call_operand.vmem [shape: f32[1,128], index: 4, kind: input, shape index: {}]   ;;  %s586_s5 = inlined_call_operand.vmem [shape: f32[1,128], index: 5, kind: input, shape index: {}]   ;;  %s587_s6 = inlined_call_operand.hbm [shape: f32[2,128], index: 6, kind: output, shape index: {}]  }
   0x1   :  { %v469_v0 = vld [vmem:[%s583_s2] sm:$0xf]  ;;  %v474_v1 = vld [vmem:[%s583_s2 + $0x4] sm:$0xf]  ;;  %371 = vmatprep.subr.bf16.mxu0 %v428_v2  ;;  %379 = vmatprep.subr.bf16.mxu1 %v428_v2  ;;  %v493_v6 = vld [vmem:[%s583_s2 + $0x8] sm:$0xf] }
   0x2   :  { %v333_v3 = vcombine.low %v469_v0, %v474_v1  ;;  %v483_v4 = vld [vmem:[%s584_s3] sm:$0xf]  ;;  %v488_v5 = vld [vmem:[%s584_s3 + $0x4] sm:$0xf]  ;;  %v500_v8 = vld [vmem:[%s583_s2 + $0xc] sm:$0xf]  ;;  %375 = vmatprep.mubr.msk.bf16.mxu0 %vm429_vm0, %v428_v2  ;;  %383 = vmatprep.mubr.msk.bf16.mxu1 %vm429_vm0, %v428_v2 }
   0x3   :  { %v336_v7 = vcombine.low %v483_v4, %v488_v5  ;;  %v505_v9 = vld [vmem:[%s584_s3 + $0x8] sm:$0xf]  ;;  %v510_v10 = vld [vmem:[%s584_s3 + $0xc] sm:$0xf]  ;;  %v334_v11 = vcombine.low %v493_v6, %v500_v8  ;;  %v345_v12 = vld [vmem:[%s581_s0] sm:$0xff]  }
   0x4   :  { %372 = vmatpush3.bf16.msra.mxu0 %v333_v3  ;;  %v360_v13 = vld [vmem:[%s581_s0 + $0x8] sm:$0xff]   ;;  %v353_v14 = vld [vmem:[%s582_s1] sm:$0xff]   ;;  %v337_v15 = vcombine.low %v505_v9, %v510_v10  ;;  %v346_v16 = vunpack.c.l.bf16 %v345_v12  ;;  %v347_v17 = vunpack.c.h.bf16 %v345_v12 }
   0x5   :  { %380 = vmatpush3.bf16.msra.mxu1 %v336_v7  ;;  %373 = vmatprep.subr.bf16.mxu0 %v428_v2  ;;  %v361_v18 = vld [vmem:[%s582_s1 + $0x8] sm:$0xff]  }
   0x6   :  { %11 = vsyncpa [#allocation5], 0  ;;  %381 = vmatprep.subr.bf16.mxu1 %v428_v2  ;;  %30 = vst.msk [vmem:[#allocation2] sm:$0x3] %vm29_vm1, %v428_v2  ;;  %v350_v19 = vunpack.c.l.bf16 %v360_v13  ;;  %v351_v20 = vunpack.c.h.bf16 %v360_v13  ;;  %vm41_vm2 = vcmask 261120   ;;  %v354_v23 = vunpack.c.l.bf16 %v353_v14  ;;  %s430_s21 = smov [#allocation4]  }
   0x7   :  { %31 = vst.msk [vmem:[#allocation3] sm:$0x3] %vm29_vm1, %v428_v2  ;;  %v42_v21 = vsel %vm41_vm2, %v346_v16, 0.0  ;;  %v43_v22 = vsel %vm41_vm2, %v347_v17, 0.0  ;;  %v355_v24 = vunpack.c.h.bf16 %v353_v14  ;;  %v358_v28 = vunpack.c.l.bf16 %v361_v18  ;;  %s325_s22 = sshll.u32 %s430_s21, 4  ;;  %s326_s22 = int_to_ptr.vmem [resolvable:$true] %s325_s22 }
   0x8   :  { %374 = vmatpush3.bf16.msra.mxu0 %v334_v11  ;;  %v44_v25 = vadd.f32 %v43_v22, %v42_v21  ;;  %v51_v26 = vsel %vm41_vm2, %v350_v19, 0.0  ;;  %v52_v27 = vsel %vm41_vm2, %v351_v20, 0.0  ;;  %v359_v30 = vunpack.c.h.bf16 %v361_v18  ;;  %p409_p1 = scmp.lt.s32.totalorder %s326_s22, %s326_s22 }
   0x9   :  { %382 = vmatpush3.bf16.msra.mxu1 %v337_v15  ;;  %387 = vmatprep.subr.bf16.mxu0 %v428_v2  ;;  %v53_v29 = vadd.f32 %v52_v27, %v51_v26  ;;  %v77_v31 = vsel %vm41_vm2, %v354_v23, 0.0  ;;  %v78_v32 = vsel %vm41_vm2, %v355_v24, 0.0  ;;  %v86_v35 = vsel %vm41_vm2, %v358_v28, 0.0  ;;  %v342_v27 = vld [vmem:[%s585_s4] ss:$0 sm:$0xff]  ;;  %s404_s4 = scalar_lea.vmem %s326_s22, 32 }
   0xa   :  { %v45_v33 = vrot.slane %v44_v25, 4  ;;  %v79_v34 = vadd.f32 %v78_v32, %v77_v31  ;;  %v87_v37 = vsel %vm41_vm2, %v359_v30, 0.0  ;;  %vm62_vm3 = vcmask 1041409   ;;  %v343_v30 = vld [vmem:[%s586_s5] ss:$0 sm:$0xff]  ;;  %p405_p0 = scmp.ne.s32.totalorder %s326_s22, %s404_s4  ;;  %p410_p2 = scmp.lt.s32.totalorder %s404_s4, %s404_s4 }
   0xb   :  { %v54_v36 = vrot.slane %v53_v29, 4  ;;  %v88_v40 = vadd.f32 %v87_v37, %v86_v35  ;;  %v230_v12 = vadd.bf16 %v483_v4, %v469_v0  ;;  %v231_v13 = vadd.bf16 %v488_v5, %v474_v1 }
   0xc   :  { %v46_v38 = vadd.f32 %v45_v33, %v44_v25  ;;  %v80_v39 = vrot.slane %v79_v34, 4  ;;  %v232_v17 = vadd.bf16 %v505_v9, %v493_v6  ;;  %v233_v18 = vadd.bf16 %v510_v10, %v500_v8  ;;  %p411_p3 = por %p410_p2, %p409_p1 }
   0xd   :  { %v55_v41 = vadd.f32 %v54_v36, %v53_v29  ;;  %v89_v44 = vrot.slane %v88_v40, 4  ;;  %v32_v57 = vld [vmem:[#allocation2] sm:$0x3]  ;;  %v339_v16 = vcombine.low %v230_v12, %v231_v13 }
   0xe   :  { %v47_v42 = vrot.slane %v46_v38, 2  ;;  %v81_v43 = vadd.f32 %v80_v39, %v79_v34  ;;  %v68_v63 = vld [vmem:[#allocation3] sm:$0x3]  ;;  %v340_v0 = vcombine.low %v232_v17, %v233_v18  ;;  %p412_p4 = pnand %p411_p3, %p405_p0 }
   0xf   :  { %v56_v45 = vrot.slane %v55_v41, 2  ;;  %v90_v48 = vadd.f32 %v89_v44, %v88_v40 }
  0x10   :  { %v48_v46 = vadd.f32 %v47_v42, %v46_v38  ;;  %v82_v47 = vrot.slane %v81_v43, 2 }
  0x11   :  { %v57_v49 = vadd.f32 %v56_v45, %v55_v41  ;;  %v91_v52 = vrot.slane %v90_v48, 2 }
  0x12   :  { %v49_v50 = vrot.slane %v48_v46, 1  ;;  %v83_v51 = vadd.f32 %v82_v47, %v81_v43 }
  0x13   :  { %v58_v53 = vrot.slane %v57_v49, 1  ;;  %v92_v56 = vadd.f32 %v91_v52, %v90_v48 }
  0x14   :  { %v50_v54 = vadd.f32 %v49_v50, %v48_v46  ;;  %v84_v55 = vrot.slane %v83_v51, 1 }
  0x15   :  { %v59_v58 = vadd.f32 %v58_v53, %v57_v49  ;;  %v93_v60 = vrot.slane %v92_v56, 1 }
  0x16   :  { %v85_v59 = vadd.f32 %v84_v55, %v83_v51 }
  0x17   :  { %v63_v61 = vsel %vm62_vm3, %v59_v58, %v50_v54  ;;  %v94_v3 = vadd.f32 %v93_v60, %v92_v56 }
  0x18   :  { %v65_v62 = vadd.f32 %v63_v61, %v32_v57 }
  0x19   :  { %v97_v7 = vsel %vm62_vm3, %v94_v3, %v85_v59 }
  0x1a   :  { %67 = vst.msk [vmem:[#allocation2] sm:$0x3] %vm29_vm1, %v65_v62  ;;  %v99_v11 = vadd.f32 %v97_v7, %v68_v63 }
  0x1c   :  { %100 = vst.msk [vmem:[#allocation3] sm:$0x3] %vm29_vm1, %v99_v11 }
  0x21   :  { %v104_v14 = vld [vmem:[#allocation2] sm:$0x3] }
  0x22   :  { %v105_v15 = vmul.f32 0.0625, %v104_v14 }
  0x23   :  { %v106_v20 = vld [vmem:[#allocation3] sm:$0x3] }
  0x24   :  { %v108_v19 = vpack.c.bf16 %v105_v15, %v105_v15  ;;  %v107_v21 = vmul.f32 0.0625, %v106_v20 }
  0x26   :  { %376 = vmatmul.mubr.msk.bf16.vlgmr.msra.gmra.mrb[0].mxu0 %vm41_vm2, %v108_v19  ;;  %v109_v22 = vpack.c.bf16 %v107_v21, %v107_v21  ;;  %v110_v23 = vadd.f32 %v107_v21, %v105_v15 }
  0x27   :  { %388 = vmatpush3.bf16.msra.mxu0 %v339_v16  ;;  %391 = vmatprep.mubr.msk.bf16.mxu0 %vm429_vm0, %v428_v2 }
  0x28   :  { %389 = vmatprep.subr.bf16.mxu0 %v428_v2  ;;  %384 = vmatmul.mubr.msk.bf16.vlgmr.msra.gmra.mrb[0].mxu1 %vm41_vm2, %v109_v22  ;;  %v111_v1 = vpack.c.bf16 %v110_v23, %v110_v23 }
  0x2b   :  { %390 = vmatpush3.bf16.msra.mxu0 %v340_v0 }
  0x2e   :  { %392 = vmatmul.mubr.msk.bf16.vlgmr.msra.gmra.mrb[4].mxu0 %vm41_vm2, %v111_v1 }
  0xf9   :  { %v169_v4 = vpop.f32.mrb[0].mxu0 }
  0xfa   :  { %v377_v5 = vpop.f32.mrb[1].mxu0 }
  0xfb   :  { %v172_v6 = vpop.f32.mrb[2].mxu0  ;;  %v224_v8 = vpop.f32.mrb[0].mxu1 }
  0xfc   :  { %v378_v9 = vpop.f32.mrb[3].mxu0  ;;  %v289_v10 = vsub.f32 %v169_v4, %v224_v8  ;;  %v385_v24 = vpop.f32.mrb[1].mxu1 }
  0xfd   :  { %v227_v25 = vpop.f32.mrb[2].mxu1 }
  0xfe   :  { %v386_v26 = vpop.f32.mrb[3].mxu1  ;;  %v297_v32 = vadd.f32 %v342_v27, %v289_v10 }
 0x100   :  { %v308_v36 = vmul.f32 %v297_v32, %v297_v32 }
 0x101   :  { %v283_v2 = vpop.f32.mrb[4].mxu0 }
 0x102   :  { %v298_v28 = vsub.f32 %v283_v2, %v169_v4  ;;  %v393_v29 = vpop.f32.mrb[5].mxu0 }
 0x103   :  { %v286_v31 = vpop.f32.mrb[6].mxu0 }
 0x104   :  { %v299_v33 = vsub.f32 %v298_v28, %v224_v8  ;;  %v394_v34 = vpop.f32.mrb[7].mxu0 }
 0x106   :  { %v307_v35 = vadd.f32 %v343_v30, %v299_v33 }
 0x108   :  { %v309_v37 = vmul.f32 %v307_v35, %v307_v35 }
 0x10a   :  { %v310_v38 = vadd.f32 %v309_v37, %v308_v36 }
 0x10c   :  { %402 = vrsqrt.f32 %v310_v38  ;;  %vm313_vm4 = vcmp.eq.f32.partialorder %v310_v38, inf  ;;  %v316_v41 = vand.u32 2147483648, %v310_v38  ;;  %vm315_vm5 = vcmp.eq.f32.partialorder %v310_v38, 0.0 }
 0x116   :  { %v403_v39 = vpop.eup %402 }
 0x117   :  { %v312_v40 = vmul.f32 %v403_v39, %v310_v38 }
 0x119   :  { %v314_v42 = vsel %vm313_vm4, %v310_v38, %v312_v40 }
 0x11a   :  { %v317_v43 = vsel %vm315_vm5, %v316_v41, %v314_v42 }
 0x11b   :  { %318 = vst [vmem:[#allocation4] sm:$0x3] %v317_v43 }
 0x11c   :  { %415 = shalt.err (!%p412_p4)
}
 0x11d   :  { %s416_s24 = scalar_lea.hbm %s587_s6, 32 }
 0x11e   :  { %p417_p5 = scmp.ne.s32.totalorder %s587_s6, %s416_s24  ;;  %p420_p6 = scmp.lt.u32.totalorder %s416_s24, %s587_s6 }
 0x120   :  { %p422_p7 = pnand %p420_p6, %p417_p5 }
 0x122   :  { %425 = shalt.err (!%p422_p7)
}
 0x123   :  { %328 = dma.vmem_to_hbm [thread:$0]  %s326_s22, 32, %s587_s6, [#allocation5]  }
 0x124   :  { %426 = dma.done.wait [#allocation5], 32  }
 0x125   :  { %427 = vsyncadd [#allocation5], 4294967264 }
 0x126   :  { %332 = vsyncpa [#allocation5], 1 }

</bundles_post_ra>
